<compile_context>
chip_gen: v6e
topology: v6e:2x2x1
jax: 0.10.0
libtpu: 0.0.40
codegen_flags: <defaults>
</compile_context>

<pallas_src>
import functools

import jax
import jax.numpy as jnp
from jax.experimental import pallas as pl
from jax.experimental.pallas import tpu as pltpu

NEG_SLOPE = 0.2                      # PyG GATv2Conv default leaky-relu slope
LANE = 128                           # TPU lane width
NEG_BIG = -1e30
A_LIN = 0.5 * (1.0 + NEG_SLOPE)      # leaky(z) = A_LIN*z + A_ABS*|z|  (0.6)
A_ABS = 0.5 * (1.0 - NEG_SLOPE)      # (0.4)


def _round_up(v, m):
    return (v + m - 1) // m * m


def _pad2(a, rows, cols):
    return jnp.pad(a, ((0, rows - a.shape[0]), (0, cols - a.shape[1])))


# ---------------------------------------------------------------------------
# Kernel 1: fused two-layer dense GATv2       grid = (layer, dst_row_tile)
# ---------------------------------------------------------------------------
def fused_gat_kernel(x_ref, wl_ref, wr_ref, bl_ref, br_ref, att_ref, attc_ref, b_ref,
                     mask_ref, o_ref, xl_s, xlt_s, xr_s, h_s, *, ti, c_att):
    layer = pl.program_id(0)
    tile = pl.program_id(1)

    # --- phase A (once per layer): dense lin_l / lin_r transforms for ALL nodes ----------
    @pl.when(tile == 0)
    def _():
        # layer-2 input is the layer-1 output kept in the VMEM scratch (no HBM round trip).
        x_in = jnp.where(layer == 0, x_ref[...], h_s[...])                       # [Npad, F]
        xl = jnp.dot(x_in, wl_ref[0], preferred_element_type=jnp.float32) + bl_ref[0]
        xr = jnp.dot(x_in, wr_ref[0], preferred_element_type=jnp.float32) + br_ref[0]
        xl_s[...] = xl                                                           # source transform
        xr_s[...] = xr                                                           # target transform
        xlt_s[...] = xl.T                                                        # [F, Npad], src on lanes

    # --- phase B (per destination-row tile): scores -> masked softmax -> aggregate -------
    row0 = pl.multiple_of(tile * ti, ti)
    xr_t = xr_s[pl.ds(row0, ti), :]                                              # [TI, F]
    xlt = xlt_s[...]                                                             # [F, Npad]
    att = att_ref[0]                                                             # [1, F] row
    attc = attc_ref[0]                                                           # [F, 1] col

    # leaky(z) = 0.6 z + 0.4 |z|.  The 0.6*(att·xr_i) piece is a per-row constant and cancels
    # in the softmax, so only the per-source 0.6*(att·xl_j) row is materialized (sublane reduce).
    e = A_LIN * jnp.sum(xlt * attc, axis=0, keepdims=True)                       # [1, Npad]

    # channel loop (abs part): e[i, j] += 0.4*att[c] * |xr[i, c] + xl[j, c]|
    # static unroll over the *real* channel count; padded channels have att == 0.
    # For real channel counts O(128+) switch this to a lax.fori_loop with dynamic lane slicing.
    att_abs = A_ABS * att
    for c in range(c_att):
        z = xr_t[:, c:c + 1] + xlt[c:c + 1, :]                                   # outer sum [TI, Npad]
        e = e + att_abs[:, c:c + 1] * jnp.abs(z)

    # masked softmax over source nodes; masked entries underflow to exactly 0 after exp,
    # so no "* mask" is needed (self-loops keep every row max finite -> no 0/0).
    maskf = mask_ref[...].astype(jnp.float32)                                    # int8 tile -> f32
    e = jnp.where(maskf > 0, e, jnp.float32(NEG_BIG))
    m = jnp.max(e, axis=-1, keepdims=True)
    p = jnp.exp(e - m)
    denom = jnp.sum(p, axis=-1, keepdims=True)
    alpha = p * pl.reciprocal(denom, approx=True)                                # EUP reciprocal

    out_t = jnp.dot(alpha, xl_s[...], preferred_element_type=jnp.float32) + b_ref[0]
    out_t = jnp.maximum(out_t, 0.0)                                              # fused relu

    h_s[pl.ds(row0, ti), :] = out_t          # feeds layer 2 through VMEM
    o_ref[...] = out_t                       # final HBM content comes from the layer==1 visits


def fused_two_layer_gat(x, params, mask_i8, *, ti=LANE):
    npad = mask_i8.shape[0]
    fpad = LANE
    ti = min(ti, npad)
    assert npad % ti == 0 and npad % LANE == 0

    # stack + zero-pad per-layer parameters to lane-dense 128-wide shapes
    wl = jnp.stack([_pad2(params["w1_l"], fpad, fpad), _pad2(params["w2_l"], fpad, fpad)])
    wr = jnp.stack([_pad2(params["w1_r"], fpad, fpad), _pad2(params["w2_r"], fpad, fpad)])
    bl = jnp.stack([_pad2(params["b1_l"], 1, fpad), _pad2(params["b2_l"], 1, fpad)])
    br = jnp.stack([_pad2(params["b1_r"], 1, fpad), _pad2(params["b2_r"], 1, fpad)])
    att = jnp.stack([_pad2(params["att1"], 1, fpad), _pad2(params["att2"], 1, fpad)])
    attc = jnp.stack([_pad2(params["att1"].T, fpad, 1), _pad2(params["att2"].T, fpad, 1)])
    bias = jnp.stack([_pad2(params["b1"], 1, fpad), _pad2(params["b2"], 1, fpad)])
    xp = _pad2(x, npad, fpad)
    c_att = max(params["att1"].shape[1], params["att2"].shape[1])   # real channels for scoring

    kernel = functools.partial(fused_gat_kernel, ti=ti, c_att=c_att)
    n_tiles = npad // ti
    return pl.pallas_call(
        kernel,
        out_shape=jax.ShapeDtypeStruct((npad, fpad), jnp.float32),
        grid=(2, n_tiles),                                               # (layer, dst tile)
        in_specs=[
            pl.BlockSpec((npad, fpad), lambda l, t: (0, 0)),             # x      (VMEM resident)
            pl.BlockSpec((1, fpad, fpad), lambda l, t: (l, 0, 0)),       # W_l    (per layer)
            pl.BlockSpec((1, fpad, fpad), lambda l, t: (l, 0, 0)),       # W_r    (per layer)
            pl.BlockSpec((1, 1, fpad), lambda l, t: (l, 0, 0)),          # b_l    (per layer)
            pl.BlockSpec((1, 1, fpad), lambda l, t: (l, 0, 0)),          # b_r    (per layer)
            pl.BlockSpec((1, 1, fpad), lambda l, t: (l, 0, 0)),          # att row
            pl.BlockSpec((1, fpad, 1), lambda l, t: (l, 0, 0)),          # att col (for sublane reduce)
            pl.BlockSpec((1, 1, fpad), lambda l, t: (l, 0, 0)),          # output bias
            pl.BlockSpec((ti, npad), lambda l, t: (t, 0)),               # int8 mask dst tile
        ],
        out_specs=pl.BlockSpec((ti, fpad), lambda l, t: (t, 0)),
        scratch_shapes=[
            pltpu.VMEM((npad, fpad), jnp.float32),   # xl   (source transform, all nodes)
            pltpu.VMEM((fpad, npad), jnp.float32),   # xl^T (channel-major, for scoring)
            pltpu.VMEM((npad, fpad), jnp.float32),   # xr   (target transform, all nodes)
            pltpu.VMEM((npad, fpad), jnp.float32),   # h    (layer-1 output, feeds layer 2)
        ],
        compiler_params=pltpu.CompilerParams(
            # layer 2 reads every layer-1 tile via the shared VMEM scratch, so the tile axis
            # must stay sequential (no megacore sharding of this fused kernel).
            dimension_semantics=("arbitrary", "arbitrary"),
        ),
    )(xp, wl, wr, bl, br, att, attc, bias, mask_i8)


# ---------------------------------------------------------------------------
# Kernel 2: edge head  (hadamard -> Linear(H2, 2) -> sum(-1)), lane-dense output
# ---------------------------------------------------------------------------
def edge_score_kernel(hsrc_t_ref, hdst_t_ref, wsum_ref, bsum_ref, o_ref):
    had_t = hsrc_t_ref[...] * hdst_t_ref[...]                         # [C, Epad]
    s = jnp.sum(had_t * wsum_ref[...], axis=0, keepdims=True)         # [1, Epad]
    o_ref[...] = s + bsum_ref[...]


def edge_score(h_pad, edge_label_index, w_post, b_post):
    cpad = h_pad.shape[1]
    c2 = w_post.shape[0]
    e = edge_label_index.shape[1]
    epad = _round_up(max(e, LANE), LANE)                              # lane-dense score row

    src = jnp.pad(edge_label_index[0], (0, epad - e))
    dst = jnp.pad(edge_label_index[1], (0, epad - e))
    # node gather (data-dependent indexing) stays in JAX glue; transposed so edges sit on lanes.
    # TODO(synk): for large E_LABEL move this gather in-kernel via PrefetchScalarGridSpec.
    hsrc_t = h_pad[src].T                                             # [C, Epad]
    hdst_t = h_pad[dst].T
    # fold Linear + sum(-1):  score = had @ W.sum(1) + b.sum()
    w_sum = jnp.pad(jnp.sum(w_post, axis=1), (0, cpad - c2)).reshape(cpad, 1)
    b_sum = jnp.sum(b_post).reshape(1, 1)

    out = pl.pallas_call(
        edge_score_kernel,
        out_shape=jax.ShapeDtypeStruct((1, epad), jnp.float32),
        grid=(1,),
        in_specs=[
            pl.BlockSpec((cpad, epad), lambda i: (0, 0)),
            pl.BlockSpec((cpad, epad), lambda i: (0, 0)),
            pl.BlockSpec((cpad, 1), lambda i: (0, 0)),
            pl.BlockSpec((1, 1), lambda i: (0, 0)),
        ],
        out_specs=pl.BlockSpec((1, epad), lambda i: (0, 0)),
    )(hsrc_t, hdst_t, w_sum, b_sum)
    return out[0, :e]                                                 # [E]


# ---------------------------------------------------------------------------
# Glue
# ---------------------------------------------------------------------------
def build_mask(edge_index, npad):
    """mask[i, j] = 1 iff edge j -> i exists, plus self loops (GATv2 add_self_loops=True).
    Self loops are also set on padded rows so every softmax row stays finite."""
    src, dst = edge_index[0], edge_index[1]
    m = jnp.zeros((npad, npad), jnp.int8)
    m = m.at[dst, src].set(1)
    diag = jnp.arange(npad)
    m = m.at[diag, diag].set(1)
    return m


def icews_gat_forward(params, x, edge_index, edge_label_index, *, ti=LANE):
    n = x.shape[0]
    npad = _round_up(max(n, LANE), LANE)          # lane-dense source axis, multiple of LANE
    mask = build_mask(edge_index, npad)
    h = fused_two_layer_gat(x, params, mask, ti=ti)               # [Npad, 128] padded h2
    return edge_score(h, edge_label_index, params["w_post"], params["b_post"])


# pure-JAX reference with identical math (sanity check only)
def reference_forward(params, x, edge_index, edge_label_index):
    n = x.shape[0]
    src, dst = edge_index[0], edge_index[1]
    mask = jnp.zeros((n, n), jnp.float32).at[dst, src].set(1.0)
    mask = mask.at[jnp.arange(n), jnp.arange(n)].set(1.0)

    def layer(x, wl, wr, bl, br, att, b):
        xl = x @ wl + bl
        xr = x @ wr + br
        s = xr[:, None, :] + xl[None, :, :]
        s = jnp.where(s > 0, s, NEG_SLOPE * s)
        e = jnp.sum(s * att[None, :, :], axis=-1)
        e = jnp.where(mask > 0, e, NEG_BIG)
        p = jnp.exp(e - jnp.max(e, axis=-1, keepdims=True)) * mask
        alpha = p / jnp.sum(p, axis=-1, keepdims=True)
        return jnp.maximum(alpha @ xl + b, 0.0)

    h = layer(x, params["w1_l"], params["w1_r"], params["b1_l"], params["b1_r"],
              params["att1"], params["b1"])
    h = layer(h, params["w2_l"], params["w2_r"], params["b2_l"], params["b2_r"],
              params["att2"], params["b2"])
    had = h[edge_label_index[0]] * h[edge_label_index[1]]
    logits = had @ params["w_post"] + params["b_post"]
    return jnp.sum(logits, axis=-1)


def init_params(key, in_channels, hidden1, hidden2):
    ks = jax.random.split(key, 12)
    g = lambda k, shape: (jax.random.normal(k, shape, jnp.float32) * 0.1)
    return {
        "w1_l": g(ks[0], (in_channels, hidden1)),
        "w1_r": g(ks[1], (in_channels, hidden1)),
        "b1_l": g(ks[2], (1, hidden1)),
        "b1_r": g(ks[3], (1, hidden1)),
        "att1": g(ks[4], (1, hidden1)),
        "b1":   jnp.zeros((1, hidden1), jnp.float32),
        "w2_l": g(ks[5], (hidden1, hidden2)),
        "w2_r": g(ks[6], (hidden1, hidden2)),
        "b2_l": g(ks[7], (1, hidden2)),
        "b2_r": g(ks[8], (1, hidden2)),
        "att2": g(ks[9], (1, hidden2)),
        "b2":   jnp.zeros((1, hidden2), jnp.float32),
        "w_post": g(ks[10], (hidden2, 2)),
        "b_post": g(ks[11], (1, 2)),
    }


if __name__ == "__main__":
    N, IN_C, H1, H2 = 16, 8, 16, 16
    E, E_LABEL = 24, 8

    key = jax.random.PRNGKey(0)
    kx, ke, kl, kp = jax.random.split(key, 4)

    x = jax.random.normal(kx, (N, IN_C), jnp.float32)
    edge_index = jax.random.randint(ke, (2, E), 0, N, jnp.int32)
    edge_label_index = jax.random.randint(kl, (2, E_LABEL), 0, N, jnp.int32)
    params = init_params(kp, IN_C, H1, H2)

    out = jax.jit(icews_gat_forward)(params, x, edge_index, edge_label_index)
    out = jax.block_until_ready(out)

    ref = reference_forward(params, x, edge_index, edge_label_index)
    assert out.shape == (E_LABEL,)
    # tolerance covers the approx (EUP) reciprocal in the softmax, the leaky-relu linear/abs
    # decomposition, and summation reordering
    assert jnp.allclose(out, ref, atol=2e-3, rtol=2e-3), (out, ref)

    print("KERNEL_OK")
</pallas_src>

<mosaic_0001>
module attributes {stable_mosaic.version = 11 : i64} {
  func.func @fused_gat_kernel(%arg0: i32, %arg1: i32, %arg2: memref<128x128xf32, #tpu.memory_space<vmem>>, %arg3: memref<1x128x128xf32, #tpu.memory_space<vmem>>, %arg4: memref<1x128x128xf32, #tpu.memory_space<vmem>>, %arg5: memref<1x1x128xf32, #tpu.memory_space<vmem>>, %arg6: memref<1x1x128xf32, #tpu.memory_space<vmem>>, %arg7: memref<1x1x128xf32, #tpu.memory_space<vmem>>, %arg8: memref<1x128x1xf32, #tpu.memory_space<vmem>>, %arg9: memref<1x1x128xf32, #tpu.memory_space<vmem>>, %arg10: memref<128x128xi8, #tpu.memory_space<vmem>>, %arg11: memref<128x128xf32, #tpu.memory_space<vmem>>, %arg12: memref<128x128xf32, #tpu.memory_space<vmem>>, %arg13: memref<128x128xf32, #tpu.memory_space<vmem>>, %arg14: memref<128x128xf32, #tpu.memory_space<vmem>>, %arg15: memref<128x128xf32, #tpu.memory_space<vmem>>) attributes {dimension_semantics = [#tpu.dimension_semantics<arbitrary>, #tpu.dimension_semantics<arbitrary>], iteration_bounds = array<i64: 2, 1>, scalar_prefetch = 0 : i64, scratch_operands = 4 : i64, tpu.core_type = #tpu.core_type<tc>, window_params = [{pipeline_mode = #tpu.pipeline_mode<synchronous>, transform_indices = @transform_0, window_bounds = array<i64: 128, 128>}, {transform_indices = @transform_1, window_bounds = array<i64: 1, 128, 128>}, {transform_indices = @transform_2, window_bounds = array<i64: 1, 128, 128>}, {transform_indices = @transform_3, window_bounds = array<i64: 1, 1, 128>}, {transform_indices = @transform_4, window_bounds = array<i64: 1, 1, 128>}, {transform_indices = @transform_5, window_bounds = array<i64: 1, 1, 128>}, {transform_indices = @transform_6, window_bounds = array<i64: 1, 128, 1>}, {transform_indices = @transform_7, window_bounds = array<i64: 1, 1, 128>}, {transform_indices = @transform_8, window_bounds = array<i64: 128, 128>}, {transform_indices = @transform_9, window_bounds = array<i64: 128, 128>}]} {
    %c0_i32 = arith.constant 0 : i32
    %0 = arith.cmpi eq, %arg1, %c0_i32 : i32
    %1 = arith.extui %0 : i1 to i32
    %c0_i32_0 = arith.constant 0 : i32
    %2 = arith.cmpi ne, %1, %c0_i32_0 : i32
    scf.if %2 {
      %c0_i32_27 = arith.constant 0 : i32
      %208 = arith.cmpi eq, %arg0, %c0_i32_27 : i32
      %c0_28 = arith.constant 0 : index
      %c0_29 = arith.constant 0 : index
      %209 = vector.load %arg2[%c0_28, %c0_29] : memref<128x128xf32, #tpu.memory_space<vmem>>, vector<128x128xf32>
      %c0_30 = arith.constant 0 : index
      %c0_31 = arith.constant 0 : index
      %210 = vector.load %arg15[%c0_30, %c0_31] : memref<128x128xf32, #tpu.memory_space<vmem>>, vector<128x128xf32>
      %211 = arith.select %208, %209, %210 : vector<128x128xf32>
      %c0_32 = arith.constant 0 : index
      %c0_33 = arith.constant 0 : index
      %c0_34 = arith.constant 0 : index
      %212 = vector.load %arg3[%c0_32, %c0_33, %c0_34] : memref<1x128x128xf32, #tpu.memory_space<vmem>>, vector<1x128x128xf32>
      %213 = vector.shape_cast %212 : vector<1x128x128xf32> to vector<128x128xf32>
      %cst_35 = arith.constant dense<0.000000e+00> : vector<128x128xf32>
      %214 = tpu.matmul %211, %213, %cst_35 {dimension_numbers = #tpu.dot_dimension_numbers<[1], [0], [0], [1], [0, 0, 1, 1], [], []>} : vector<128x128xf32>, vector<128x128xf32>, vector<128x128xf32> -> vector<128x128xf32>
      %c0_36 = arith.constant 0 : index
      %c0_37 = arith.constant 0 : index
      %c0_38 = arith.constant 0 : index
      %215 = vector.load %arg5[%c0_36, %c0_37, %c0_38] : memref<1x1x128xf32, #tpu.memory_space<vmem>>, vector<1x1x128xf32>
      %216 = vector.shape_cast %215 : vector<1x1x128xf32> to vector<1x128xf32>
      %217 = vector.broadcast %216 : vector<1x128xf32> to vector<128x128xf32>
      %218 = arith.addf %214, %217 : vector<128x128xf32>
      %c0_39 = arith.constant 0 : index
      %c0_40 = arith.constant 0 : index
      %c0_41 = arith.constant 0 : index
      %219 = vector.load %arg4[%c0_39, %c0_40, %c0_41] : memref<1x128x128xf32, #tpu.memory_space<vmem>>, vector<1x128x128xf32>
      %220 = vector.shape_cast %219 : vector<1x128x128xf32> to vector<128x128xf32>
      %cst_42 = arith.constant dense<0.000000e+00> : vector<128x128xf32>
      %221 = tpu.matmul %211, %220, %cst_42 {dimension_numbers = #tpu.dot_dimension_numbers<[1], [0], [0], [1], [0, 0, 1, 1], [], []>} : vector<128x128xf32>, vector<128x128xf32>, vector<128x128xf32> -> vector<128x128xf32>
      %c0_43 = arith.constant 0 : index
      %c0_44 = arith.constant 0 : index
      %c0_45 = arith.constant 0 : index
      %222 = vector.load %arg6[%c0_43, %c0_44, %c0_45] : memref<1x1x128xf32, #tpu.memory_space<vmem>>, vector<1x1x128xf32>
      %223 = vector.shape_cast %222 : vector<1x1x128xf32> to vector<1x128xf32>
      %224 = vector.broadcast %223 : vector<1x128xf32> to vector<128x128xf32>
      %225 = arith.addf %221, %224 : vector<128x128xf32>
      %c0_46 = arith.constant 0 : index
      %c0_47 = arith.constant 0 : index
      %226 = vector.load %arg12[%c0_46, %c0_47] : memref<128x128xf32, #tpu.memory_space<vmem>>, vector<128x128xf32>
      tpu.vector_store %arg12[%c0_46, %c0_47], %218 {strides = array<i32>} : memref<128x128xf32, #tpu.memory_space<vmem>>, vector<128x128xf32>,
      %c0_48 = arith.constant 0 : index
      %c0_49 = arith.constant 0 : index
      %227 = vector.load %arg14[%c0_48, %c0_49] : memref<128x128xf32, #tpu.memory_space<vmem>>, vector<128x128xf32>
      tpu.vector_store %arg14[%c0_48, %c0_49], %225 {strides = array<i32>} : memref<128x128xf32, #tpu.memory_space<vmem>>, vector<128x128xf32>,
      %228 = tpu.transpose %218, [1, 0] : vector<128x128xf32> -> vector<128x128xf32>
      %c0_50 = arith.constant 0 : index
      %c0_51 = arith.constant 0 : index
      %229 = vector.load %arg13[%c0_50, %c0_51] : memref<128x128xf32, #tpu.memory_space<vmem>>, vector<128x128xf32>
      tpu.vector_store %arg13[%c0_50, %c0_51], %228 {strides = array<i32>} : memref<128x128xf32, #tpu.memory_space<vmem>>, vector<128x128xf32>,
    } else {
    }
    %c128_i32 = arith.constant 128 : i32
    %3 = arith.muli %arg1, %c128_i32 : i32
    %4 = tpu.assume_multiple %3, 128 : i32
    %5 = arith.index_cast %4 : i32 to index
    %c0 = arith.constant 0 : index
    %6 = vector.load %arg14[%5, %c0] : memref<128x128xf32, #tpu.memory_space<vmem>>, vector<128x128xf32>
    %c0_1 = arith.constant 0 : index
    %c0_2 = arith.constant 0 : index
    %7 = vector.load %arg13[%c0_1, %c0_2] : memref<128x128xf32, #tpu.memory_space<vmem>>, vector<128x128xf32>
    %c0_3 = arith.constant 0 : index
    %c0_4 = arith.constant 0 : index
    %c0_5 = arith.constant 0 : index
    %8 = vector.load %arg7[%c0_3, %c0_4, %c0_5] : memref<1x1x128xf32, #tpu.memory_space<vmem>>, vector<1x1x128xf32>
    %9 = vector.shape_cast %8 : vector<1x1x128xf32> to vector<1x128xf32>
    %c0_6 = arith.constant 0 : index
    %c0_7 = arith.constant 0 : index
    %c0_8 = arith.constant 0 : index
    %10 = vector.load %arg8[%c0_6, %c0_7, %c0_8] : memref<1x128x1xf32, #tpu.memory_space<vmem>>, vector<1x128x1xf32>
    %11 = vector.shape_cast %10 : vector<1x128x1xf32> to vector<128x1xf32>
    %12 = vector.broadcast %11 : vector<128x1xf32> to vector<128x128xf32>
    %13 = arith.mulf %7, %12 : vector<128x128xf32>
    %cst = arith.constant dense<0.000000e+00> : vector<128xf32>
    %14 = vector.multi_reduction <add>, %13, %cst [0] : vector<128x128xf32> to vector<128xf32>
    %15 = vector.shape_cast %14 : vector<128xf32> to vector<1x128xf32>
    %cst_9 = arith.constant 6.000000e-01 : f32
    %16 = vector.broadcast %cst_9 : f32 to vector<1x128xf32>
    %17 = arith.mulf %16, %15 : vector<1x128xf32>
    %cst_10 = arith.constant 4.000000e-01 : f32
    %18 = vector.broadcast %cst_10 : f32 to vector<1x128xf32>
    %19 = arith.mulf %18, %9 : vector<1x128xf32>
    %20 = vector.extract_strided_slice %6 {offsets = [0, 0], sizes = [128, 1], strides = [1, 1]} : vector<128x128xf32> to vector<128x1xf32>
    %21 = vector.extract_strided_slice %7 {offsets = [0, 0], sizes = [1, 128], strides = [1, 1]} : vector<128x128xf32> to vector<1x128xf32>
    %22 = vector.broadcast %20 : vector<128x1xf32> to vector<128x128xf32>
    %23 = vector.broadcast %21 : vector<1x128xf32> to vector<128x128xf32>
    %24 = arith.addf %22, %23 : vector<128x128xf32>
    %25 = vector.extract_strided_slice %19 {offsets = [0, 0], sizes = [1, 1], strides = [1, 1]} : vector<1x128xf32> to vector<1x1xf32>
    %26 = math.absf %24 : vector<128x128xf32>
    %27 = vector.broadcast %25 : vector<1x1xf32> to vector<128x128xf32>
    %28 = arith.mulf %27, %26 : vector<128x128xf32>
    %29 = vector.broadcast %17 : vector<1x128xf32> to vector<128x128xf32>
    %30 = arith.addf %29, %28 : vector<128x128xf32>
    %31 = vector.extract_strided_slice %6 {offsets = [0, 1], sizes = [128, 1], strides = [1, 1]} : vector<128x128xf32> to vector<128x1xf32>
    %32 = vector.extract_strided_slice %7 {offsets = [1, 0], sizes = [1, 128], strides = [1, 1]} : vector<128x128xf32> to vector<1x128xf32>
    %33 = vector.broadcast %31 : vector<128x1xf32> to vector<128x128xf32>
    %34 = vector.broadcast %32 : vector<1x128xf32> to vector<128x128xf32>
    %35 = arith.addf %33, %34 : vector<128x128xf32>
    %36 = vector.extract_strided_slice %19 {offsets = [0, 1], sizes = [1, 1], strides = [1, 1]} : vector<1x128xf32> to vector<1x1xf32>
    %37 = math.absf %35 : vector<128x128xf32>
    %38 = vector.broadcast %36 : vector<1x1xf32> to vector<128x128xf32>
    %39 = arith.mulf %38, %37 : vector<128x128xf32>
    %40 = arith.addf %30, %39 : vector<128x128xf32>
    %41 = vector.extract_strided_slice %6 {offsets = [0, 2], sizes = [128, 1], strides = [1, 1]} : vector<128x128xf32> to vector<128x1xf32>
    %42 = vector.extract_strided_slice %7 {offsets = [2, 0], sizes = [1, 128], strides = [1, 1]} : vector<128x128xf32> to vector<1x128xf32>
    %43 = vector.broadcast %41 : vector<128x1xf32> to vector<128x128xf32>
    %44 = vector.broadcast %42 : vector<1x128xf32> to vector<128x128xf32>
    %45 = arith.addf %43, %44 : vector<128x128xf32>
    %46 = vector.extract_strided_slice %19 {offsets = [0, 2], sizes = [1, 1], strides = [1, 1]} : vector<1x128xf32> to vector<1x1xf32>
    %47 = math.absf %45 : vector<128x128xf32>
    %48 = vector.broadcast %46 : vector<1x1xf32> to vector<128x128xf32>
    %49 = arith.mulf %48, %47 : vector<128x128xf32>
    %50 = arith.addf %40, %49 : vector<128x128xf32>
    %51 = vector.extract_strided_slice %6 {offsets = [0, 3], sizes = [128, 1], strides = [1, 1]} : vector<128x128xf32> to vector<128x1xf32>
    %52 = vector.extract_strided_slice %7 {offsets = [3, 0], sizes = [1, 128], strides = [1, 1]} : vector<128x128xf32> to vector<1x128xf32>
    %53 = vector.broadcast %51 : vector<128x1xf32> to vector<128x128xf32>
    %54 = vector.broadcast %52 : vector<1x128xf32> to vector<128x128xf32>
    %55 = arith.addf %53, %54 : vector<128x128xf32>
    %56 = vector.extract_strided_slice %19 {offsets = [0, 3], sizes = [1, 1], strides = [1, 1]} : vector<1x128xf32> to vector<1x1xf32>
    %57 = math.absf %55 : vector<128x128xf32>
    %58 = vector.broadcast %56 : vector<1x1xf32> to vector<128x128xf32>
    %59 = arith.mulf %58, %57 : vector<128x128xf32>
    %60 = arith.addf %50, %59 : vector<128x128xf32>
    %61 = vector.extract_strided_slice %6 {offsets = [0, 4], sizes = [128, 1], strides = [1, 1]} : vector<128x128xf32> to vector<128x1xf32>
    %62 = vector.extract_strided_slice %7 {offsets = [4, 0], sizes = [1, 128], strides = [1, 1]} : vector<128x128xf32> to vector<1x128xf32>
    %63 = vector.broadcast %61 : vector<128x1xf32> to vector<128x128xf32>
    %64 = vector.broadcast %62 : vector<1x128xf32> to vector<128x128xf32>
    %65 = arith.addf %63, %64 : vector<128x128xf32>
    %66 = vector.extract_strided_slice %19 {offsets = [0, 4], sizes = [1, 1], strides = [1, 1]} : vector<1x128xf32> to vector<1x1xf32>
    %67 = math.absf %65 : vector<128x128xf32>
    %68 = vector.broadcast %66 : vector<1x1xf32> to vector<128x128xf32>
    %69 = arith.mulf %68, %67 : vector<128x128xf32>
    %70 = arith.addf %60, %69 : vector<128x128xf32>
    %71 = vector.extract_strided_slice %6 {offsets = [0, 5], sizes = [128, 1], strides = [1, 1]} : vector<128x128xf32> to vector<128x1xf32>
    %72 = vector.extract_strided_slice %7 {offsets = [5, 0], sizes = [1, 128], strides = [1, 1]} : vector<128x128xf32> to vector<1x128xf32>
    %73 = vector.broadcast %71 : vector<128x1xf32> to vector<128x128xf32>
    %74 = vector.broadcast %72 : vector<1x128xf32> to vector<128x128xf32>
    %75 = arith.addf %73, %74 : vector<128x128xf32>
    %76 = vector.extract_strided_slice %19 {offsets = [0, 5], sizes = [1, 1], strides = [1, 1]} : vector<1x128xf32> to vector<1x1xf32>
    %77 = math.absf %75 : vector<128x128xf32>
    %78 = vector.broadcast %76 : vector<1x1xf32> to vector<128x128xf32>
    %79 = arith.mulf %78, %77 : vector<128x128xf32>
    %80 = arith.addf %70, %79 : vector<128x128xf32>
    %81 = vector.extract_strided_slice %6 {offsets = [0, 6], sizes = [128, 1], strides = [1, 1]} : vector<128x128xf32> to vector<128x1xf32>
    %82 = vector.extract_strided_slice %7 {offsets = [6, 0], sizes = [1, 128], strides = [1, 1]} : vector<128x128xf32> to vector<1x128xf32>
    %83 = vector.broadcast %81 : vector<128x1xf32> to vector<128x128xf32>
    %84 = vector.broadcast %82 : vector<1x128xf32> to vector<128x128xf32>
    %85 = arith.addf %83, %84 : vector<128x128xf32>
    %86 = vector.extract_strided_slice %19 {offsets = [0, 6], sizes = [1, 1], strides = [1, 1]} : vector<1x128xf32> to vector<1x1xf32>
    %87 = math.absf %85 : vector<128x128xf32>
    %88 = vector.broadcast %86 : vector<1x1xf32> to vector<128x128xf32>
    %89 = arith.mulf %88, %87 : vector<128x128xf32>
    %90 = arith.addf %80, %89 : vector<128x128xf32>
    %91 = vector.extract_strided_slice %6 {offsets = [0, 7], sizes = [128, 1], strides = [1, 1]} : vector<128x128xf32> to vector<128x1xf32>
    %92 = vector.extract_strided_slice %7 {offsets = [7, 0], sizes = [1, 128], strides = [1, 1]} : vector<128x128xf32> to vector<1x128xf32>
    %93 = vector.broadcast %91 : vector<128x1xf32> to vector<128x128xf32>
    %94 = vector.broadcast %92 : vector<1x128xf32> to vector<128x128xf32>
    %95 = arith.addf %93, %94 : vector<128x128xf32>
    %96 = vector.extract_strided_slice %19 {offsets = [0, 7], sizes = [1, 1], strides = [1, 1]} : vector<1x128xf32> to vector<1x1xf32>
    %97 = math.absf %95 : vector<128x128xf32>
    %98 = vector.broadcast %96 : vector<1x1xf32> to vector<128x128xf32>
    %99 = arith.mulf %98, %97 : vector<128x128xf32>
    %100 = arith.addf %90, %99 : vector<128x128xf32>
    %101 = vector.extract_strided_slice %6 {offsets = [0, 8], sizes = [128, 1], strides = [1, 1]} : vector<128x128xf32> to vector<128x1xf32>
    %102 = vector.extract_strided_slice %7 {offsets = [8, 0], sizes = [1, 128], strides = [1, 1]} : vector<128x128xf32> to vector<1x128xf32>
    %103 = vector.broadcast %101 : vector<128x1xf32> to vector<128x128xf32>
    %104 = vector.broadcast %102 : vector<1x128xf32> to vector<128x128xf32>
    %105 = arith.addf %103, %104 : vector<128x128xf32>
    %106 = vector.extract_strided_slice %19 {offsets = [0, 8], sizes = [1, 1], strides = [1, 1]} : vector<1x128xf32> to vector<1x1xf32>
    %107 = math.absf %105 : vector<128x128xf32>
    %108 = vector.broadcast %106 : vector<1x1xf32> to vector<128x128xf32>
    %109 = arith.mulf %108, %107 : vector<128x128xf32>
    %110 = arith.addf %100, %109 : vector<128x128xf32>
    %111 = vector.extract_strided_slice %6 {offsets = [0, 9], sizes = [128, 1], strides = [1, 1]} : vector<128x128xf32> to vector<128x1xf32>
    %112 = vector.extract_strided_slice %7 {offsets = [9, 0], sizes = [1, 128], strides = [1, 1]} : vector<128x128xf32> to vector<1x128xf32>
    %113 = vector.broadcast %111 : vector<128x1xf32> to vector<128x128xf32>
    %114 = vector.broadcast %112 : vector<1x128xf32> to vector<128x128xf32>
    %115 = arith.addf %113, %114 : vector<128x128xf32>
    %116 = vector.extract_strided_slice %19 {offsets = [0, 9], sizes = [1, 1], strides = [1, 1]} : vector<1x128xf32> to vector<1x1xf32>
    %117 = math.absf %115 : vector<128x128xf32>
    %118 = vector.broadcast %116 : vector<1x1xf32> to vector<128x128xf32>
    %119 = arith.mulf %118, %117 : vector<128x128xf32>
    %120 = arith.addf %110, %119 : vector<128x128xf32>
    %121 = vector.extract_strided_slice %6 {offsets = [0, 10], sizes = [128, 1], strides = [1, 1]} : vector<128x128xf32> to vector<128x1xf32>
    %122 = vector.extract_strided_slice %7 {offsets = [10, 0], sizes = [1, 128], strides = [1, 1]} : vector<128x128xf32> to vector<1x128xf32>
    %123 = vector.broadcast %121 : vector<128x1xf32> to vector<128x128xf32>
    %124 = vector.broadcast %122 : vector<1x128xf32> to vector<128x128xf32>
    %125 = arith.addf %123, %124 : vector<128x128xf32>
    %126 = vector.extract_strided_slice %19 {offsets = [0, 10], sizes = [1, 1], strides = [1, 1]} : vector<1x128xf32> to vector<1x1xf32>
    %127 = math.absf %125 : vector<128x128xf32>
    %128 = vector.broadcast %126 : vector<1x1xf32> to vector<128x128xf32>
    %129 = arith.mulf %128, %127 : vector<128x128xf32>
    %130 = arith.addf %120, %129 : vector<128x128xf32>
    %131 = vector.extract_strided_slice %6 {offsets = [0, 11], sizes = [128, 1], strides = [1, 1]} : vector<128x128xf32> to vector<128x1xf32>
    %132 = vector.extract_strided_slice %7 {offsets = [11, 0], sizes = [1, 128], strides = [1, 1]} : vector<128x128xf32> to vector<1x128xf32>
    %133 = vector.broadcast %131 : vector<128x1xf32> to vector<128x128xf32>
    %134 = vector.broadcast %132 : vector<1x128xf32> to vector<128x128xf32>
    %135 = arith.addf %133, %134 : vector<128x128xf32>
    %136 = vector.extract_strided_slice %19 {offsets = [0, 11], sizes = [1, 1], strides = [1, 1]} : vector<1x128xf32> to vector<1x1xf32>
    %137 = math.absf %135 : vector<128x128xf32>
    %138 = vector.broadcast %136 : vector<1x1xf32> to vector<128x128xf32>
    %139 = arith.mulf %138, %137 : vector<128x128xf32>
    %140 = arith.addf %130, %139 : vector<128x128xf32>
    %141 = vector.extract_strided_slice %6 {offsets = [0, 12], sizes = [128, 1], strides = [1, 1]} : vector<128x128xf32> to vector<128x1xf32>
    %142 = vector.extract_strided_slice %7 {offsets = [12, 0], sizes = [1, 128], strides = [1, 1]} : vector<128x128xf32> to vector<1x128xf32>
    %143 = vector.broadcast %141 : vector<128x1xf32> to vector<128x128xf32>
    %144 = vector.broadcast %142 : vector<1x128xf32> to vector<128x128xf32>
    %145 = arith.addf %143, %144 : vector<128x128xf32>
    %146 = vector.extract_strided_slice %19 {offsets = [0, 12], sizes = [1, 1], strides = [1, 1]} : vector<1x128xf32> to vector<1x1xf32>
    %147 = math.absf %145 : vector<128x128xf32>
    %148 = vector.broadcast %146 : vector<1x1xf32> to vector<128x128xf32>
    %149 = arith.mulf %148, %147 : vector<128x128xf32>
    %150 = arith.addf %140, %149 : vector<128x128xf32>
    %151 = vector.extract_strided_slice %6 {offsets = [0, 13], sizes = [128, 1], strides = [1, 1]} : vector<128x128xf32> to vector<128x1xf32>
    %152 = vector.extract_strided_slice %7 {offsets = [13, 0], sizes = [1, 128], strides = [1, 1]} : vector<128x128xf32> to vector<1x128xf32>
    %153 = vector.broadcast %151 : vector<128x1xf32> to vector<128x128xf32>
    %154 = vector.broadcast %152 : vector<1x128xf32> to vector<128x128xf32>
    %155 = arith.addf %153, %154 : vector<128x128xf32>
    %156 = vector.extract_strided_slice %19 {offsets = [0, 13], sizes = [1, 1], strides = [1, 1]} : vector<1x128xf32> to vector<1x1xf32>
    %157 = math.absf %155 : vector<128x128xf32>
    %158 = vector.broadcast %156 : vector<1x1xf32> to vector<128x128xf32>
    %159 = arith.mulf %158, %157 : vector<128x128xf32>
    %160 = arith.addf %150, %159 : vector<128x128xf32>
    %161 = vector.extract_strided_slice %6 {offsets = [0, 14], sizes = [128, 1], strides = [1, 1]} : vector<128x128xf32> to vector<128x1xf32>
    %162 = vector.extract_strided_slice %7 {offsets = [14, 0], sizes = [1, 128], strides = [1, 1]} : vector<128x128xf32> to vector<1x128xf32>
    %163 = vector.broadcast %161 : vector<128x1xf32> to vector<128x128xf32>
    %164 = vector.broadcast %162 : vector<1x128xf32> to vector<128x128xf32>
    %165 = arith.addf %163, %164 : vector<128x128xf32>
    %166 = vector.extract_strided_slice %19 {offsets = [0, 14], sizes = [1, 1], strides = [1, 1]} : vector<1x128xf32> to vector<1x1xf32>
    %167 = math.absf %165 : vector<128x128xf32>
    %168 = vector.broadcast %166 : vector<1x1xf32> to vector<128x128xf32>
    %169 = arith.mulf %168, %167 : vector<128x128xf32>
    %170 = arith.addf %160, %169 : vector<128x128xf32>
    %171 = vector.extract_strided_slice %6 {offsets = [0, 15], sizes = [128, 1], strides = [1, 1]} : vector<128x128xf32> to vector<128x1xf32>
    %172 = vector.extract_strided_slice %7 {offsets = [15, 0], sizes = [1, 128], strides = [1, 1]} : vector<128x128xf32> to vector<1x128xf32>
    %173 = vector.broadcast %171 : vector<128x1xf32> to vector<128x128xf32>
    %174 = vector.broadcast %172 : vector<1x128xf32> to vector<128x128xf32>
    %175 = arith.addf %173, %174 : vector<128x128xf32>
    %176 = vector.extract_strided_slice %19 {offsets = [0, 15], sizes = [1, 1], strides = [1, 1]} : vector<1x128xf32> to vector<1x1xf32>
    %177 = math.absf %175 : vector<128x128xf32>
    %178 = vector.broadcast %176 : vector<1x1xf32> to vector<128x128xf32>
    %179 = arith.mulf %178, %177 : vector<128x128xf32>
    %180 = arith.addf %170, %179 : vector<128x128xf32>
    %c0_11 = arith.constant 0 : index
    %c0_12 = arith.constant 0 : index
    %181 = vector.load %arg10[%c0_11, %c0_12] : memref<128x128xi8, #tpu.memory_space<vmem>>, vector<128x128xi8>
    %182 = arith.sitofp %181 : vector<128x128xi8> to vector<128x128xf32>
    %cst_13 = arith.constant 0.000000e+00 : f32
    %183 = vector.broadcast %cst_13 : f32 to vector<128x128xf32>
    %184 = arith.cmpf ogt, %182, %183 : vector<128x128xf32>
    %cst_14 = arith.constant -1.000000e+30 : f32
    %185 = vector.broadcast %cst_14 : f32 to vector<128x128xf32>
    %186 = arith.select %184, %180, %185 : vector<128x128xi1>, vector<128x128xf32>
    %cst_15 = arith.constant dense<0xFF800000> : vector<128xf32>
    %187 = vector.multi_reduction <maximumf>, %186, %cst_15 [1] : vector<128x128xf32> to vector<128xf32>
    %188 = vector.shape_cast %187 : vector<128xf32> to vector<128x1xf32>
    %189 = vector.broadcast %188 : vector<128x1xf32> to vector<128x128xf32>
    %190 = arith.subf %186, %189 : vector<128x128xf32>
    %191 = math.exp %190 : vector<128x128xf32>
    %cst_16 = arith.constant dense<0.000000e+00> : vector<128xf32>
    %192 = vector.multi_reduction <add>, %191, %cst_16 [1] : vector<128x128xf32> to vector<128xf32>
    %193 = vector.shape_cast %192 : vector<128xf32> to vector<128x1xf32>
    %194 = tpu.reciprocal %193 {approx = true} : vector<128x1xf32> -> vector<128x1xf32>
    %195 = vector.broadcast %194 : vector<128x1xf32> to vector<128x128xf32>
    %196 = arith.mulf %191, %195 : vector<128x128xf32>
    %c0_17 = arith.constant 0 : index
    %c0_18 = arith.constant 0 : index
    %197 = vector.load %arg12[%c0_17, %c0_18] : memref<128x128xf32, #tpu.memory_space<vmem>>, vector<128x128xf32>
    %cst_19 = arith.constant dense<0.000000e+00> : vector<128x128xf32>
    %198 = tpu.matmul %196, %197, %cst_19 {dimension_numbers = #tpu.dot_dimension_numbers<[1], [0], [0], [1], [0, 0, 1, 1], [], []>} : vector<128x128xf32>, vector<128x128xf32>, vector<128x128xf32> -> vector<128x128xf32>
    %c0_20 = arith.constant 0 : index
    %c0_21 = arith.constant 0 : index
    %c0_22 = arith.constant 0 : index
    %199 = vector.load %arg9[%c0_20, %c0_21, %c0_22] : memref<1x1x128xf32, #tpu.memory_space<vmem>>, vector<1x1x128xf32>
    %200 = vector.shape_cast %199 : vector<1x1x128xf32> to vector<1x128xf32>
    %201 = vector.broadcast %200 : vector<1x128xf32> to vector<128x128xf32>
    %202 = arith.addf %198, %201 : vector<128x128xf32>
    %cst_23 = arith.constant 0.000000e+00 : f32
    %203 = vector.broadcast %cst_23 : f32 to vector<128x128xf32>
    %204 = arith.maximumf %202, %203 : vector<128x128xf32>
    %205 = arith.index_cast %4 : i32 to index
    %c0_24 = arith.constant 0 : index
    %206 = vector.load %arg15[%205, %c0_24] : memref<128x128xf32, #tpu.memory_space<vmem>>, vector<128x128xf32>
    tpu.vector_store %arg15[%205, %c0_24], %204 {strides = array<i32>} : memref<128x128xf32, #tpu.memory_space<vmem>>, vector<128x128xf32>,
    %c0_25 = arith.constant 0 : index
    %c0_26 = arith.constant 0 : index
    %207 = vector.load %arg11[%c0_25, %c0_26] : memref<128x128xf32, #tpu.memory_space<vmem>>, vector<128x128xf32>
    tpu.vector_store %arg11[%c0_25, %c0_26], %204 {strides = array<i32>} : memref<128x128xf32, #tpu.memory_space<vmem>>, vector<128x128xf32>,
    return
  }
  func.func @transform_0(%arg0: i32, %arg1: i32) -> (i32, i32) {
    %c0_i32 = arith.constant 0 : i32
    %c0_i32_0 = arith.constant 0 : i32
    %c0_i32_1 = arith.constant 0 : i32
    return %c0_i32, %c0_i32_0 : i32, i32
  }
  func.func @transform_1(%arg0: i32, %arg1: i32) -> (i32, i32, i32) {
    %c0_i32 = arith.constant 0 : i32
    %c0_i32_0 = arith.constant 0 : i32
    %c0_i32_1 = arith.constant 0 : i32
    return %arg0, %c0_i32, %c0_i32_0 : i32, i32, i32
  }
  func.func @transform_2(%arg0: i32, %arg1: i32) -> (i32, i32, i32) {
    %c0_i32 = arith.constant 0 : i32
    %c0_i32_0 = arith.constant 0 : i32
    %c0_i32_1 = arith.constant 0 : i32
    return %arg0, %c0_i32, %c0_i32_0 : i32, i32, i32
  }
  func.func @transform_3(%arg0: i32, %arg1: i32) -> (i32, i32, i32) {
    %c0_i32 = arith.constant 0 : i32
    %c0_i32_0 = arith.constant 0 : i32
    %c0_i32_1 = arith.constant 0 : i32
    return %arg0, %c0_i32, %c0_i32_0 : i32, i32, i32
  }
  func.func @transform_4(%arg0: i32, %arg1: i32) -> (i32, i32, i32) {
    %c0_i32 = arith.constant 0 : i32
    %c0_i32_0 = arith.constant 0 : i32
    %c0_i32_1 = arith.constant 0 : i32
    return %arg0, %c0_i32, %c0_i32_0 : i32, i32, i32
  }
  func.func @transform_5(%arg0: i32, %arg1: i32) -> (i32, i32, i32) {
    %c0_i32 = arith.constant 0 : i32
    %c0_i32_0 = arith.constant 0 : i32
    %c0_i32_1 = arith.constant 0 : i32
    return %arg0, %c0_i32, %c0_i32_0 : i32, i32, i32
  }
  func.func @transform_6(%arg0: i32, %arg1: i32) -> (i32, i32, i32) {
    %c0_i32 = arith.constant 0 : i32
    %c0_i32_0 = arith.constant 0 : i32
    %c0_i32_1 = arith.constant 0 : i32
    return %arg0, %c0_i32, %c0_i32_0 : i32, i32, i32
  }
  func.func @transform_7(%arg0: i32, %arg1: i32) -> (i32, i32, i32) {
    %c0_i32 = arith.constant 0 : i32
    %c0_i32_0 = arith.constant 0 : i32
    %c0_i32_1 = arith.constant 0 : i32
    return %arg0, %c0_i32, %c0_i32_0 : i32, i32, i32
  }
  func.func @transform_8(%arg0: i32, %arg1: i32) -> (i32, i32) {
    %c0_i32 = arith.constant 0 : i32
    %c0_i32_0 = arith.constant 0 : i32
    return %arg1, %c0_i32 : i32, i32
  }
  func.func @transform_9(%arg0: i32, %arg1: i32) -> (i32, i32) {
    %c0_i32 = arith.constant 0 : i32
    %c0_i32_0 = arith.constant 0 : i32
    return %arg1, %c0_i32 : i32, i32
  }
}

module attributes {stable_mosaic.version = 11 : i64} {
  func.func @edge_score_kernel(%arg0: i32, %arg1: memref<128x128xf32, #tpu.memory_space<vmem>>, %arg2: memref<128x128xf32, #tpu.memory_space<vmem>>, %arg3: memref<128x1xf32, #tpu.memory_space<vmem>>, %arg4: memref<1x1xf32, #tpu.memory_space<vmem>>, %arg5: memref<1x128xf32, #tpu.memory_space<vmem>>) attributes {dimension_semantics = [#tpu.dimension_semantics<arbitrary>], iteration_bounds = array<i64: 1>, scalar_prefetch = 0 : i64, scratch_operands = 0 : i64, tpu.core_type = #tpu.core_type<tc>, window_params = [{pipeline_mode = #tpu.pipeline_mode<synchronous>, transform_indices = @transform_0, window_bounds = array<i64: 128, 128>}, {pipeline_mode = #tpu.pipeline_mode<synchronous>, transform_indices = @transform_1, window_bounds = array<i64: 128, 128>}, {pipeline_mode = #tpu.pipeline_mode<synchronous>, transform_indices = @transform_2, window_bounds = array<i64: 128, 1>}, {pipeline_mode = #tpu.pipeline_mode<synchronous>, transform_indices = @transform_3, window_bounds = array<i64: 1, 1>}, {pipeline_mode = #tpu.pipeline_mode<synchronous>, transform_indices = @transform_4, window_bounds = array<i64: 1, 128>}]} {
    %c0 = arith.constant 0 : index
    %c0_0 = arith.constant 0 : index
    %0 = vector.load %arg1[%c0, %c0_0] : memref<128x128xf32, #tpu.memory_space<vmem>>, vector<128x128xf32>
    %c0_1 = arith.constant 0 : index
    %c0_2 = arith.constant 0 : index
    %1 = vector.load %arg2[%c0_1, %c0_2] : memref<128x128xf32, #tpu.memory_space<vmem>>, vector<128x128xf32>
    %2 = arith.mulf %0, %1 : vector<128x128xf32>
    %c0_3 = arith.constant 0 : index
    %c0_4 = arith.constant 0 : index
    %3 = vector.load %arg3[%c0_3, %c0_4] : memref<128x1xf32, #tpu.memory_space<vmem>>, vector<128x1xf32>
    %4 = vector.broadcast %3 : vector<128x1xf32> to vector<128x128xf32>
    %5 = arith.mulf %2, %4 : vector<128x128xf32>
    %cst = arith.constant dense<0.000000e+00> : vector<128xf32>
    %6 = vector.multi_reduction <add>, %5, %cst [0] : vector<128x128xf32> to vector<128xf32>
    %7 = vector.shape_cast %6 : vector<128xf32> to vector<1x128xf32>
    %c0_5 = arith.constant 0 : index
    %c0_6 = arith.constant 0 : index
    %8 = vector.load %arg4[%c0_5, %c0_6] : memref<1x1xf32, #tpu.memory_space<vmem>>, vector<1x1xf32>
    %9 = vector.broadcast %8 : vector<1x1xf32> to vector<1x128xf32>
    %10 = arith.addf %7, %9 : vector<1x128xf32>
    %c0_7 = arith.constant 0 : index
    %c0_8 = arith.constant 0 : index
    %11 = vector.load %arg5[%c0_7, %c0_8] : memref<1x128xf32, #tpu.memory_space<vmem>>, vector<1x128xf32>
    tpu.vector_store %arg5[%c0_7, %c0_8], %10 {strides = array<i32>} : memref<1x128xf32, #tpu.memory_space<vmem>>, vector<1x128xf32>,
    return
  }
  func.func @transform_0(%arg0: i32) -> (i32, i32) {
    %c0_i32 = arith.constant 0 : i32
    %c0_i32_0 = arith.constant 0 : i32
    %c0_i32_1 = arith.constant 0 : i32
    return %c0_i32, %c0_i32_0 : i32, i32
  }
  func.func @transform_1(%arg0: i32) -> (i32, i32) {
    %c0_i32 = arith.constant 0 : i32
    %c0_i32_0 = arith.constant 0 : i32
    %c0_i32_1 = arith.constant 0 : i32
    return %c0_i32, %c0_i32_0 : i32, i32
  }
  func.func @transform_2(%arg0: i32) -> (i32, i32) {
    %c0_i32 = arith.constant 0 : i32
    %c0_i32_0 = arith.constant 0 : i32
    %c0_i32_1 = arith.constant 0 : i32
    return %c0_i32, %c0_i32_0 : i32, i32
  }
  func.func @transform_3(%arg0: i32) -> (i32, i32) {
    %c0_i32 = arith.constant 0 : i32
    %c0_i32_0 = arith.constant 0 : i32
    %c0_i32_1 = arith.constant 0 : i32
    return %c0_i32, %c0_i32_0 : i32, i32
  }
  func.func @transform_4(%arg0: i32) -> (i32, i32) {
    %c0_i32 = arith.constant 0 : i32
    %c0_i32_0 = arith.constant 0 : i32
    %c0_i32_1 = arith.constant 0 : i32
    return %c0_i32, %c0_i32_0 : i32, i32
  }
}

</mosaic_0001>

<bundles_post_ra>
// kernel: icews_gat_forward.3
= control target key start
LH: loop header
LB: loop body
LE: loop exit
PB: predicated region body
PF: predicated region fallthrough
CT: control target
= control target key end

     0   :  { %v219_v0 = vmov 0   ;;  %s395_s2 = inlined_call_operand.vmem [shape: f32[128,1], index: 2, kind: input, shape index: {}]   ;;  %s396_s3 = inlined_call_operand.<no memory space> [shape: f32[1,1], index: 3, kind: input, shape index: {}]   ;;  %s397_s0 = inlined_call_operand.vmem [shape: f32[128,128], index: 0, kind: input, shape index: {}]   ;;  %s398_s1 = inlined_call_operand.vmem [shape: f32[128,128], index: 1, kind: input, shape index: {}]   ;;  %s399_s4 = inlined_call_operand.vmem [shape: f32[1,128], index: 4, kind: output, shape index: {}]  }
   0x1   :  { %218 = vset.pattern.permute.xlu1 %v219_v0  ;;  %217 = vset.pattern.permute.xlu0 %v219_v0  ;;  %v69_v1 = vld [vmem:[%s395_s2 + $0x10] sm:$0xff]  ;;  %v67_v2 = vld [vmem:[%s395_s2] sm:$0xff]  ;;  %v9_v3 = vstv %s396_s3  ;;  %v70_v4 = vld [vmem:[%s395_s2 + $0x18] sm:$0xff] }
   0x2   :  { %95 = vperm.xlu1 %218, %v69_v1   ;;  %85 = vperm.xlu0 %217, %v67_v2   ;;  %10 = vst [vmem:[#allocation2] sm:$0x1] %v9_v3  ;;  %v68_v5 = vld [vmem:[%s395_s2 + $0x8] sm:$0xff]  ;;  %v71_v7 = vld [vmem:[%s395_s2 + $0x20] sm:$0xff]  ;;  %v74_v8 = vld [vmem:[%s395_s2 + $0x38] sm:$0xff] }
   0x3   :  { %v72_v6 = vld [vmem:[%s395_s2 + $0x28] sm:$0xff]  ;;  %v73_v9 = vld [vmem:[%s395_s2 + $0x30] sm:$0xff]  ;;  %v75_v11 = vld [vmem:[%s395_s2 + $0x40] sm:$0xff] }
   0x4   :  { %v76_v10 = vld [vmem:[%s395_s2 + $0x48] sm:$0xff]  ;;  %v78_v12 = vld [vmem:[%s395_s2 + $0x58] sm:$0xff]  ;;  %v77_v13 = vld [vmem:[%s395_s2 + $0x50] sm:$0xff] }
   0x5   :  { %v80_v14 = vld [vmem:[%s395_s2 + $0x68] sm:$0xff]  ;;  %v79_v15 = vld [vmem:[%s395_s2 + $0x60] sm:$0xff]  ;;  %v82_v16 = vld [vmem:[%s395_s2 + $0x78] sm:$0xff] }
   0x6   :  { %100 = vperm.xlu1 %218, %v70_v4   ;;  %90 = vperm.xlu0 %217, %v68_v5   ;;  %v81_v17 = vld [vmem:[%s395_s2 + $0x70] sm:$0xff]  ;;  %v19_v19 = vld [vmem:[%s397_s0] sm:$0xff]  ;;  %v20_v21 = vld [vmem:[%s397_s0 + $0x8] sm:$0xff] }
   0x7   :  { %v35_v20 = vld [vmem:[%s398_s1] sm:$0xff]  ;;  %v36_v22 = vld [vmem:[%s398_s1 + $0x8] sm:$0xff]  ;;  %v21_v24 = vld [vmem:[%s397_s0 + $0x10] sm:$0xff] }
   0x8   :  { %v37_v25 = vld [vmem:[%s398_s1 + $0x10] sm:$0xff]  ;;  %v51_v27 = vmul.f32 %v35_v20, %v19_v19  ;;  %v52_v28 = vmul.f32 %v36_v22, %v20_v21  ;;  %v22_v29 = vld [vmem:[%s397_s0 + $0x18] sm:$0xff]  ;;  %v23_v34 = vld [vmem:[%s397_s0 + $0x20] sm:$0xff] }
   0x9   :  { %v200_v18 = vld [vmem:[#allocation2] sm:$0x1]  ;;  %v38_v30 = vld [vmem:[%s398_s1 + $0x18] sm:$0xff]  ;;  %v53_v31 = vmul.f32 %v37_v25, %v21_v24  ;;  %v24_v39 = vld [vmem:[%s397_s0 + $0x28] sm:$0xff] }
   0xa   :  { %110 = vperm.xlu1 %218, %v72_v6   ;;  %105 = vperm.xlu0 %217, %v71_v7   ;;  %v39_v35 = vld [vmem:[%s398_s1 + $0x20] sm:$0xff]  ;;  %v54_v37 = vmul.f32 %v38_v30, %v22_v29  ;;  %v40_v40 = vld [vmem:[%s398_s1 + $0x28] sm:$0xff]  ;;  %v25_v46 = vld [vmem:[%s397_s0 + $0x30] sm:$0xff] }
   0xb   :  { %v55_v43 = vmul.f32 %v39_v35, %v23_v34  ;;  %v41_v47 = vld [vmem:[%s398_s1 + $0x30] sm:$0xff]  ;;  %v56_v50 = vmul.f32 %v40_v40, %v24_v39  ;;  %v26_v51 = vld [vmem:[%s397_s0 + $0x38] sm:$0xff]  ;;  %v27_v58 = vld [vmem:[%s397_s0 + $0x40] sm:$0xff] }
   0xc   :  { %v42_v52 = vld [vmem:[%s398_s1 + $0x38] sm:$0xff]  ;;  %v57_v55 = vmul.f32 %v41_v47, %v25_v46  ;;  %v43_v59 = vld [vmem:[%s398_s1 + $0x40] sm:$0xff]  ;;  %v28_v63 = vld [vmem:[%s397_s0 + $0x48] sm:$0xff] }
   0xd   :  { %v58_v62 = vmul.f32 %v42_v52, %v26_v51  ;;  %v44_v0 = vld [vmem:[%s398_s1 + $0x48] sm:$0xff]  ;;  %v59_v3 = vmul.f32 %v43_v59, %v27_v58  ;;  %v29_v6 = vld [vmem:[%s397_s0 + $0x50] sm:$0xff]  ;;  %v47_v19 = vld [vmem:[%s398_s1 + $0x60] sm:$0xff] }
   0xe   :  { %120 = vperm.xlu1 %218, %v74_v8   ;;  %115 = vperm.xlu0 %217, %v73_v9   ;;  %v45_v7 = vld [vmem:[%s398_s1 + $0x50] sm:$0xff]  ;;  %v48_v24 = vld [vmem:[%s398_s1 + $0x68] sm:$0xff]  ;;  %v34_v35 = vld [vmem:[%s397_s0 + $0x78] sm:$0xff] }
   0xf   :  { %v33_v30 = vld [vmem:[%s397_s0 + $0x70] sm:$0xff] }
  0x12   :  { %130 = vperm.xlu1 %218, %v76_v10   ;;  %125 = vperm.xlu0 %217, %v75_v11   ;;  %v60_v10 = vmul.f32 %v44_v0, %v28_v63  ;;  %v30_v11 = vld [vmem:[%s397_s0 + $0x58] sm:$0xff] }
  0x16   :  { %140 = vperm.xlu1 %218, %v78_v12   ;;  %135 = vperm.xlu0 %217, %v77_v13   ;;  %v46_v12 = vld [vmem:[%s398_s1 + $0x58] sm:$0xff] }
  0x17   :  { %v62_v22 = vmul.f32 %v46_v12, %v30_v11 }
  0x1a   :  { %150 = vperm.xlu1 %218, %v80_v14   ;;  %145 = vperm.xlu0 %217, %v79_v15   ;;  %v61_v15 = vmul.f32 %v45_v7, %v29_v6 }
  0x1e   :  { %160 = vperm.xlu1 %218, %v82_v16   ;;  %155 = vperm.xlu0 %217, %v81_v17  }
  0x22   :  { %203 = vperm.xlu0 %217, %v200_v18   ;;  %v31_v18 = vld [vmem:[%s397_s0 + $0x60] sm:$0xff] }
  0x7d   :  { %v96_v23 = vpop.permute.xlu1 %95  ;;  %v86_v26 = vpop.permute.xlu0 %85 }
  0x7e   :  { %v163_v36 = vmul.f32 %v86_v26, %v51_v27  ;;  %v165_v41 = vmul.f32 %v96_v23, %v53_v31  ;;  %v32_v23 = vld [vmem:[%s397_s0 + $0x68] sm:$0xff]  ;;  %v63_v27 = vmul.f32 %v47_v19, %v31_v18  ;;  %v49_v31 = vld [vmem:[%s398_s1 + $0x70] sm:$0xff] }
  0x7f   :  { %v64_v34 = vmul.f32 %v48_v24, %v32_v23  ;;  %v65_v39 = vmul.f32 %v49_v31, %v33_v30 }
  0x81   :  { %v101_v32 = vpop.permute.xlu1 %100  ;;  %v91_v33 = vpop.permute.xlu0 %90 }
  0x82   :  { %v164_v38 = vmul.f32 %v91_v33, %v52_v28  ;;  %v166_v48 = vmul.f32 %v101_v32, %v54_v37 }
  0x84   :  { %v179_v42 = vadd.f32 %v164_v38, %v163_v36  ;;  %v50_v36 = vld [vmem:[%s398_s1 + $0x78] sm:$0xff] }
  0x85   :  { %v111_v44 = vpop.permute.xlu1 %110  ;;  %v106_v45 = vpop.permute.xlu0 %105 }
  0x86   :  { %v180_v49 = vadd.f32 %v179_v42, %v165_v41  ;;  %v167_v53 = vmul.f32 %v106_v45, %v55_v43  ;;  %v168_v60 = vmul.f32 %v111_v44, %v56_v50  ;;  %v66_v43 = vmul.f32 %v50_v36, %v34_v35 }
  0x87   :  { %v206_v50 = vlaneseq }
  0x88   :  { %v181_v54 = vadd.f32 %v180_v49, %v166_v48 }
  0x89   :  { %v121_v56 = vpop.permute.xlu1 %120  ;;  %v116_v57 = vpop.permute.xlu0 %115 }
  0x8a   :  { %v182_v61 = vadd.f32 %v181_v54, %v167_v53  ;;  %v169_v1 = vmul.f32 %v116_v57, %v57_v55  ;;  %v170_v8 = vmul.f32 %v121_v56, %v58_v62  ;;  %v207_v53 = vshrl.u32 %v206_v50, 7 }
  0x8c   :  { %v183_v2 = vadd.f32 %v182_v61, %v168_v60  ;;  %v208_v55 = vsub.s32 0, %v207_v53 }
  0x8d   :  { %v131_v4 = vpop.permute.xlu1 %130  ;;  %v126_v5 = vpop.permute.xlu0 %125 }
  0x8e   :  { %v184_v9 = vadd.f32 %v183_v2, %v169_v1  ;;  %v171_v13 = vmul.f32 %v126_v5, %v59_v3  ;;  %v172_v20 = vmul.f32 %v131_v4, %v60_v10 }
  0x90   :  { %v185_v14 = vadd.f32 %v184_v9, %v170_v8 }
  0x91   :  { %v141_v16 = vpop.permute.xlu1 %140  ;;  %v136_v17 = vpop.permute.xlu0 %135 }
  0x92   :  { %v186_v21 = vadd.f32 %v185_v14, %v171_v13  ;;  %v173_v25 = vmul.f32 %v136_v17, %v61_v15  ;;  %v174_v32 = vmul.f32 %v141_v16, %v62_v22 }
  0x94   :  { %v187_v26 = vadd.f32 %v186_v21, %v172_v20 }
  0x95   :  { %v151_v28 = vpop.permute.xlu1 %150  ;;  %v146_v29 = vpop.permute.xlu0 %145 }
  0x96   :  { %v188_v33 = vadd.f32 %v187_v26, %v173_v25  ;;  %v175_v37 = vmul.f32 %v146_v29, %v63_v27  ;;  %v176_v41 = vmul.f32 %v151_v28, %v64_v34 }
  0x98   :  { %v189_v38 = vadd.f32 %v188_v33, %v174_v32 }
  0x99   :  { %v156_v40 = vpop.permute.xlu0 %155  ;;  %v161_v44 = vpop.permute.xlu1 %160 }
  0x9a   :  { %v190_v42 = vadd.f32 %v189_v38, %v175_v37  ;;  %v177_v45 = vmul.f32 %v156_v40, %v65_v39  ;;  %v178_v47 = vmul.f32 %v161_v44, %v66_v43 }
  0x9c   :  { %v191_v46 = vadd.f32 %v190_v42, %v176_v41 }
  0x9d   :  { %v204_v57 = vpop.permute.xlu0 %203 }
  0x9e   :  { %v192_v48 = vadd.f32 %v191_v46, %v177_v45  ;;  %v209_v60 = vrot.slane %v204_v57, %v208_v55 }
  0xa0   :  { %v193_v49 = vadd.f32 %v192_v48, %v178_v47 }
  0xa2   :  { %v194_v51 = vrot.slane %v193_v49, 4 }
  0xa4   :  { %v195_v52 = vadd.f32 %v194_v51, %v193_v49 }
  0xa6   :  { %v196_v54 = vrot.slane %v195_v52, 2 }
  0xa8   :  { %v197_v56 = vadd.f32 %v196_v54, %v195_v52 }
  0xaa   :  { %v198_v58 = vrot.slane %v197_v56, 1 }
  0xac   :  { %v199_v59 = vadd.f32 %v198_v58, %v197_v56 }
  0xae   :  { %v210_v61 = vadd.f32 %v209_v60, %v199_v59 }
  0xb0   :  { %211 = vst [vmem:[%s399_s4] sm:$0x1] %v210_v61 }

// kernel: icews_gat_forward.2
= control target key start
LH: loop header
LB: loop body
LE: loop exit
PB: predicated region body
PF: predicated region fallthrough
CT: control target
= control target key end

     0   :  { %s4574_s30 = smov 0   ;;  %s4576_s10 = smov 0   ;;  %s7400_s0 = inlined_call_operand.vmem [shape: f32[128,128], index: 0, kind: input, shape index: {}]   ;;  %s7401_s1 = inlined_call_operand.vmem [shape: f32[2,128,128], index: 1, kind: input, shape index: {}]   ;;  %s7402_s2 = inlined_call_operand.vmem [shape: f32[2,128,128], index: 2, kind: input, shape index: {}]   ;;  %s7403_s3 = inlined_call_operand.vmem [shape: f32[2,1,128], index: 3, kind: input, shape index: {}]   ;;  %s7404_s4 = inlined_call_operand.vmem [shape: f32[2,1,128], index: 4, kind: input, shape index: {}]   ;;  %s7405_s5 = inlined_call_operand.vmem [shape: f32[2,1,128], index: 5, kind: input, shape index: {}]   ;;  %s7406_s6 = inlined_call_operand.vmem [shape: f32[2,128,1], index: 6, kind: input, shape index: {}]   ;;  %s7407_s7 = inlined_call_operand.vmem [shape: f32[2,1,128], index: 7, kind: input, shape index: {}]   ;;  %s7408_s8 = inlined_call_operand.vmem [shape: s8[128,128], index: 8, kind: input, shape index: {}]   ;;  %s7409_s9 = inlined_call_operand.vmem [shape: f32[128,128], index: 9, kind: output, shape index: {}]  }
   0x1   :  { %s4578_s11 = smov 0  }
   0x2 LB: > { %s31_s12 = sadd.s32 1, %s4502_s10  ;;  %p3889_p0 = scmp.ge.s32.totalorder %s4506_s11, 1  ;;  %s4506_s11 = sphi %s4578_s11, %s19_s11   ;;  %s4502_s10 = sphi %s4576_s10, %s8026_s10   ;;  %s4498_s30 = sphi %s4574_s30, %s8025_s30  }
   0x3   : > { %p33_p1 = scmp.ge.s32.totalorder %s31_s12, 2  ;;  %p362_p2 = scmp.lt.s32.totalorder %s4506_s11, 3 }
   0x5   : > { %s8028_s12 = smov (%p33_p1, %s31_s12), 0  ;;  %p363_p3 = pnand %p3889_p0, %p362_p2 }
   0x7   : > { %366 = sbr.rel (%p363_p3) target bundleno = 1620 (0x654), region = 56 }
   0xc   : > { %p425_p4 = scmp.lt.s32.totalorder %s4498_s30, 1  ;;  %v1186_v0 = vlaneseq  ;;  %p468_p5 = scmp.eq.s32.totalorder %s4498_s30, 0  ;;  %v7416_v1 = vmov 0   ;;  %v7418_v3 = vmov 2   ;;  %v469_v5 = vld [vmem:[%s7400_s0] sm:$0xff]  ;;  %v485_v6 = vld [vmem:[#allocation5 + $0x30] sm:$0xff] }
   0xd   : > { %4281 = vset.pattern.permute.xlu1 %v7416_v1  ;;  %4282 = vset.pattern.permute.xlu0 %v7418_v3  ;;  %v7414_v21 = vmov 3   ;;  %v7412_v25 = vmov 4   ;;  %v7420_v39 = vmov 1   ;;  %v470_v42 = vld [vmem:[%s7400_s0 + $0x8] sm:$0xff]  ;;  %v486_v43 = vld [vmem:[#allocation5] sm:$0xff]  ;;  %v471_v44 = vld [vmem:[%s7400_s0 + $0x10] sm:$0xff] }
   0xe   : > { %s8030_s30 = smov (!%p425_p4, %s4498_s30), 1  ;;  %v4595_v2 = vshrl.u32 %v1186_v0, 7  ;;  %v487_v46 = vld [vmem:[#allocation5 + $0x58] sm:$0xff]  ;;  %v473_v52 = vld [vmem:[%s7400_s0 + $0x20] sm:$0xff]  ;;  %v489_v53 = vld [vmem:[#allocation5 + $0x50] sm:$0xff] }
   0xf   : > { %s501_s13 = scalar_select %p468_p5, 1, 0  ;;  %v472_v50 = vld [vmem:[%s7400_s0 + $0x18] sm:$0xff]  ;;  %v474_v57 = vld [vmem:[%s7400_s0 + $0x28] sm:$0xff]  ;;  %v475_v59 = vld [vmem:[%s7400_s0 + $0x30] sm:$0xff] }
  0x10   : > { %s4599_s14 = sshll.u32 %s8030_s30, 7  ;;  %s443_s17 = scalar_lea.vmem %s7405_s5, %s8030_s30  ;;  %v4606_v4 = vsub.s32 0, %v4595_v2  ;;  %v488_v51 = vld [vmem:[#allocation5 + $0x18] sm:$0xff]  ;;  %v490_v58 = vld [vmem:[#allocation5 + $0x68] sm:$0xff] }
  0x11   : > { %s4615_s22 = scalar_lea.vmem %s7402_s2, %s4599_s14  ;;  %v970_v7 = vld [vmem:[%s443_s17] sm:$0x1]  ;;  %v502_v8 = vstv %s501_s13  ;;  %s4633_s25 = scalar_lea.vmem %s7406_s6, %s4599_s14  ;;  %v491_v60 = vld [vmem:[#allocation5 + $0x8] sm:$0xff]  ;;  %v476_v0 = vld [vmem:[%s7400_s0 + $0x38] sm:$0xff] }
  0x12   : > { %7516 = vst [vmem:[#allocation6_spill] sm:$0xff] %v4606_v4  ;;  %v703_v9 = vld [vmem:[%s4615_s22 + $0x78] sm:$0xff]  ;;  %v1105_v10 = vmul.f32 0.4, %v970_v7  ;;  %v702_v11 = vld [vmem:[%s4615_s22 + $0x70] sm:$0xff]  ;;  %vm4619_vm0 = vcmp.eq.s32.totalorder %v502_v8, 1  ;;  %s4650_s28 = scalar_lea.vmem %s7401_s1, %s4599_s14  ;;  %s440_s29 = scalar_lea.vmem %s7404_s4, %s8030_s30 }
  0x13   : > { %4090 = vmatprep.subr.mxu1 %v703_v9  ;;  %v504_v13 = vsel %vm4619_vm0, %v469_v5, %v485_v6  ;;  %v701_v15 = vld [vmem:[%s4615_s22 + $0x68] sm:$0xff]  ;;  %v700_v16 = vld [vmem:[%s4615_s22 + $0x60] sm:$0xff]  ;;  %v699_v17 = vld [vmem:[%s4615_s22 + $0x58] sm:$0xff]  ;;  %v4681_v48 = vsel %vm4619_vm0, %v470_v42, %v486_v43  ;;  %v4685_v49 = vsel %vm4619_vm0, %v471_v44, %v487_v46  ;;  %v4698_v55 = vsel %vm4619_vm0, %v472_v50, %v488_v51  ;;  %s437_s15 = scalar_lea.vmem %s7403_s3, %s8030_s30  ;;  %s451_s27 = scalar_lea.vmem %s7407_s7, %s8030_s30 }
  0x14   : > { %v4626_v14 = vrot.slane %v1105_v10, %v4606_v4  ;;  %4091 = vmatpush3.msra.mxu1 %v703_v9  ;;  %4122 = vmatprep.mubr.f32.mxu1 %v504_v13  ;;  %v971_v18 = vld [vmem:[%s4633_s25] sm:$0xff]  ;;  %v698_v19 = vld [vmem:[%s4615_s22 + $0x50] sm:$0xff]  ;;  %v972_v20 = vld [vmem:[%s4633_s25 + $0x8] sm:$0xff]  ;;  %v4702_v56 = vsel %vm4619_vm0, %v473_v52, %v489_v53  ;;  %v4715_v62 = vsel %vm4619_vm0, %v474_v57, %v490_v58 }
  0x15   : > { %4092 = vmatprep.subr.mxu1 %v702_v11  ;;  %4066 = vmatprep.mubr.f32.mxu0 %v504_v13  ;;  %v697_v22 = vld [vmem:[%s4615_s22 + $0x48] sm:$0xff]  ;;  %v696_v23 = vld [vmem:[%s4615_s22 + $0x40] sm:$0xff]  ;;  %v973_v24 = vld [vmem:[%s4633_s25 + $0x10] sm:$0xff]  ;;  %v4719_v63 = vsel %vm4619_vm0, %v475_v59, %v491_v60 }
  0x16   : > { %7519 = vst [vmem:[#allocation7_spill] sm:$0xff] %v4626_v14  ;;  %4093 = vmatpush3.msra.mxu1 %v702_v11  ;;  %1500 = vperm.xlu0 %4282, %v4626_v14   ;;  %v695_v26 = vld [vmem:[%s4615_s22 + $0x38] sm:$0xff]  ;;  %v694_v28 = vld [vmem:[%s4615_s22 + $0x30] sm:$0xff]  ;;  %v693_v31 = vld [vmem:[%s4615_s22 + $0x28] sm:$0xff] }
  0x17   : > { %4094 = vmatprep.subr.mxu1 %v701_v15  ;;  %989 = vperm.xlu1 %4281, %v971_v18   ;;  %v535_v27 = vld [vmem:[%s4650_s28 + $0x78] sm:$0xff]  ;;  %v534_v30 = vld [vmem:[%s4650_s28 + $0x70] sm:$0xff]  ;;  %v533_v32 = vld [vmem:[%s4650_s28 + $0x68] sm:$0xff] }
  0x18   : > { %4095 = vmatpush3.msra.mxu1 %v701_v15  ;;  %v974_v29 = vld [vmem:[%s4633_s25 + $0x18] sm:$0xff]  ;;  %4034 = vmatprep.subr.mxu0 %v535_v27  ;;  %v692_v33 = vld [vmem:[%s4615_s22 + $0x20] sm:$0xff]  ;;  %v690_v37 = vld [vmem:[%s4615_s22 + $0x10] sm:$0xff] }
  0x19   : > { %4096 = vmatprep.subr.mxu1 %v700_v16  ;;  %4035 = vmatpush3.msra.mxu0 %v535_v27  ;;  %v975_v34 = vld [vmem:[%s4633_s25 + $0x20] sm:$0xff]  ;;  %v691_v36 = vld [vmem:[%s4615_s22 + $0x18] sm:$0xff]  ;;  %v976_v38 = vld [vmem:[%s4633_s25 + $0x28] sm:$0xff] }
  0x1a   : > { %4097 = vmatpush3.msra.mxu1 %v700_v16  ;;  %4283 = vset.pattern.permute.xlu0 %v7414_v21  ;;  %v532_v35 = vld [vmem:[%s4650_s28 + $0x60] sm:$0xff]  ;;  %v689_v40 = vld [vmem:[%s4615_s22 + $0x8] sm:$0xff]  ;;  %v531_v41 = vld [vmem:[%s4650_s28 + $0x58] sm:$0xff] }
  0x1b   : > { %4098 = vmatprep.subr.mxu1 %v699_v17  ;;  %1636 = vperm.xlu0 %4283, %v4626_v14   ;;  %v688_v45 = vld [vmem:[%s4615_s22] sm:$0xff]  ;;  %v977_v47 = vld [vmem:[%s4633_s25 + $0x30] sm:$0xff]  ;;  %v978_v54 = vld [vmem:[%s4633_s25 + $0x38] sm:$0xff] }
  0x1c   : > { %4099 = vmatpush3.msra.mxu1 %v699_v17  ;;  %994 = vperm.xlu1 %4281, %v972_v20   ;;  %v979_v61 = vld [vmem:[%s4633_s25 + $0x40] sm:$0xff]  ;;  %v492_v5 = vld [vmem:[#allocation5 + $0x48] sm:$0xff]  ;;  %v479_v15 = vld [vmem:[%s7400_s0 + $0x50] sm:$0xff] }
  0x1d   : > { %4100 = vmatprep.subr.mxu1 %v698_v19  ;;  %4036 = vmatprep.subr.mxu0 %v534_v30  ;;  %v477_v6 = vld [vmem:[%s7400_s0 + $0x40] sm:$0xff]  ;;  %v980_v8 = vld [vmem:[%s4633_s25 + $0x48] sm:$0xff]  ;;  %v4732_v9 = vsel %vm4619_vm0, %v476_v0, %v492_v5  ;;  %v495_v16 = vld [vmem:[#allocation5 + $0x10] sm:$0xff] }
  0x1e   : > { %4101 = vmatpush3.msra.mxu1 %v698_v19  ;;  %4037 = vmatpush3.msra.mxu0 %v534_v30  ;;  %v493_v7 = vld [vmem:[#allocation5 + $0x40] sm:$0xff]  ;;  %v478_v11 = vld [vmem:[%s7400_s0 + $0x48] sm:$0xff]  ;;  %v981_v17 = vld [vmem:[%s4633_s25 + $0x50] sm:$0xff]  ;;  %v4753_v19 = vsel %vm4619_vm0, %v479_v15, %v495_v16 }
  0x1f   : > { %4102 = vmatprep.subr.mxu1 %v697_v22  ;;  %4284 = vset.pattern.permute.xlu0 %v7412_v25  ;;  %v4736_v10 = vsel %vm4619_vm0, %v477_v6, %v493_v7  ;;  %v494_v13 = vld [vmem:[#allocation5 + $0x20] sm:$0xff]  ;;  %v480_v20 = vld [vmem:[%s7400_s0 + $0x58] sm:$0xff]  ;;  %v498_v30 = vld [vmem:[#allocation5 + $0x70] sm:$0xff] }
  0x20   : > { %4103 = vmatpush3.msra.mxu1 %v697_v22  ;;  %1772 = vperm.xlu0 %4284, %v4626_v14   ;;  %v4749_v18 = vsel %vm4619_vm0, %v478_v11, %v494_v13  ;;  %v496_v22 = vld [vmem:[#allocation5 + $0x38] sm:$0xff]  ;;  %v530_v43 = vld [vmem:[%s4650_s28 + $0x50] sm:$0xff]  ;;  %v529_v44 = vld [vmem:[%s4650_s28 + $0x48] sm:$0xff] }
  0x21   : > { %4104 = vmatprep.subr.mxu1 %v696_v23  ;;  %999 = vperm.xlu1 %4281, %v973_v24   ;;  %v497_v24 = vld [vmem:[#allocation5 + $0x60] sm:$0xff]  ;;  %v4766_v27 = vsel %vm4619_vm0, %v480_v20, %v496_v22  ;;  %v986_v42 = vld [vmem:[%s4633_s25 + $0x78] sm:$0xff]  ;;  %v526_v46 = vld [vmem:[%s4650_s28 + $0x30] sm:$0xff] }
  0x22   : > { %4105 = vmatpush3.msra.mxu1 %v696_v23  ;;  %4038 = vmatprep.subr.mxu0 %v533_v32  ;;  %v481_v23 = vld [vmem:[%s7400_s0 + $0x60] sm:$0xff]  ;;  %v527_v12 = vld [vmem:[%s4650_s28 + $0x38] sm:$0xff]  ;;  %v522_v52 = vld [vmem:[%s4650_s28 + $0x10] sm:$0xff] }
  0x23   : > { %4106 = vmatprep.subr.mxu1 %v695_v26  ;;  %4039 = vmatpush3.msra.mxu0 %v533_v32  ;;  %v483_v32 = vld [vmem:[%s7400_s0 + $0x70] sm:$0xff]  ;;  %v524_v50 = vld [vmem:[%s4650_s28 + $0x20] sm:$0xff]  ;;  %v523_v51 = vld [vmem:[%s4650_s28 + $0x18] sm:$0xff] }
  0x24   : > { %4107 = vmatpush3.msra.mxu1 %v695_v26  ;;  %4040 = vmatprep.subr.mxu0 %v532_v35  ;;  %v982_v26 = vld [vmem:[%s4633_s25 + $0x58] sm:$0xff]  ;;  %v521_v53 = vld [vmem:[%s4650_s28 + $0x8] sm:$0xff] }
  0x25   : > { %4108 = vmatprep.subr.mxu1 %v694_v28  ;;  %1004 = vperm.xlu1 %4281, %v974_v29   ;;  %v482_v29 = vld [vmem:[%s7400_s0 + $0x68] sm:$0xff] }
  0x26   : > { %4109 = vmatpush3.msra.mxu1 %v694_v28  ;;  %4285 = vset.pattern.permute.xlu0 %v7420_v39  ;;  %v4770_v28 = vsel %vm4619_vm0, %v481_v23, %v497_v24 }
  0x27   : > { %4110 = vmatprep.subr.mxu1 %v693_v31  ;;  %4041 = vmatpush3.msra.mxu0 %v532_v35 }
  0x28   : > { %4111 = vmatpush3.msra.mxu1 %v693_v31  ;;  %1364 = vperm.xlu0 %4285, %v4626_v14   ;;  %v983_v31 = vld [vmem:[%s4633_s25 + $0x60] sm:$0xff] }
  0x29   : > { %4112 = vmatprep.subr.mxu1 %v692_v33  ;;  %1009 = vperm.xlu1 %4281, %v975_v34   ;;  %v517_v34 = vsel %vm4619_vm0, %v482_v29, %v498_v30 }
  0x2a   : > { %4113 = vmatpush3.msra.mxu1 %v692_v33  ;;  %4042 = vmatprep.subr.mxu0 %v531_v41  ;;  %v499_v33 = vld [vmem:[#allocation5 + $0x78] sm:$0xff] }
  0x2b   : > { %4114 = vmatprep.subr.mxu1 %v691_v36  ;;  %4043 = vmatpush3.msra.mxu0 %v531_v41  ;;  %v518_v35 = vsel %vm4619_vm0, %v483_v32, %v499_v33  ;;  %v985_v41 = vld [vmem:[%s4633_s25 + $0x70] sm:$0xff] }
  0x2c   : > { %4115 = vmatpush3.msra.mxu1 %v691_v36  ;;  %v484_v36 = vld [vmem:[%s7400_s0 + $0x78] sm:$0xff]  ;;  %4044 = vmatprep.subr.mxu0 %v530_v43 }
  0x2d   : > { %4116 = vmatprep.subr.mxu1 %v690_v37  ;;  %1014 = vperm.xlu1 %4281, %v976_v38   ;;  %v984_v38 = vld [vmem:[%s4633_s25 + $0x68] sm:$0xff] }
  0x2e   : > { %4117 = vmatpush3.msra.mxu1 %v690_v37  ;;  %v500_v37 = vld [vmem:[#allocation5 + $0x28] sm:$0xff]  ;;  %4045 = vmatpush3.msra.mxu0 %v530_v43 }
  0x2f   : > { %4118 = vmatprep.subr.mxu1 %v689_v40  ;;  %4046 = vmatprep.subr.mxu0 %v529_v44 }
  0x30   : > { %4119 = vmatpush3.msra.mxu1 %v689_v40  ;;  %v519_v40 = vsel %vm4619_vm0, %v484_v36, %v500_v37  ;;  %4047 = vmatpush3.msra.mxu0 %v529_v44 }
  0x31   : > { %4120 = vmatprep.subr.mxu1 %v688_v45  ;;  %1019 = vperm.xlu1 %4281, %v977_v47   ;;  %v525_v47 = vld [vmem:[%s4650_s28 + $0x28] sm:$0xff] }
  0x32   : > { %4121 = vmatpush3.msra.mxu1 %v688_v45  ;;  %v528_v45 = vld [vmem:[%s4650_s28 + $0x40] sm:$0xff] }
  0x33   : > { %4123 = vmatmul.mubr.f32.vlgmr.msra.gmra.mxu1 %v4681_v48  ;;  %4048 = vmatprep.subr.mxu0 %v528_v45 }
  0x34   : > { %4125 = vmatprep.mubr.f32.mxu1 %v4685_v49  ;;  %4049 = vmatpush3.msra.mxu0 %v528_v45 }
  0x35   : > { %1024 = vperm.xlu1 %4281, %v978_v54   ;;  %4050 = vmatprep.subr.mxu0 %v527_v12  ;;  %v520_v54 = vld [vmem:[%s4650_s28] sm:$0xff] }
  0x36   : > { %4051 = vmatpush3.msra.mxu0 %v527_v12 }
  0x37   : > { %4126 = vmatmul.mubr.f32.gmra.mxu1 %v4698_v55  ;;  %4052 = vmatprep.subr.mxu0 %v526_v46 }
  0x38   : > { %4128 = vmatprep.mubr.f32.mxu1 %v4702_v56  ;;  %4053 = vmatpush3.msra.mxu0 %v526_v46 }
  0x39   : > { %1029 = vperm.xlu1 %4281, %v979_v61   ;;  %4054 = vmatprep.subr.mxu0 %v525_v47 }
  0x3a   : > { %4055 = vmatpush3.msra.mxu0 %v525_v47 }
  0x3b   : > { %4129 = vmatmul.mubr.f32.gmra.mxu1 %v4715_v62  ;;  %4056 = vmatprep.subr.mxu0 %v524_v50 }
  0x3c   : > { %4131 = vmatprep.mubr.f32.mxu1 %v4719_v63  ;;  %4057 = vmatpush3.msra.mxu0 %v524_v50 }
  0x3d   : > { %1034 = vperm.xlu1 %4281, %v980_v8   ;;  %4058 = vmatprep.subr.mxu0 %v523_v51 }
  0x3e   : > { %4059 = vmatpush3.msra.mxu0 %v523_v51 }
  0x3f   : > { %4132 = vmatmul.mubr.f32.gmra.mxu1 %v4732_v9  ;;  %4060 = vmatprep.subr.mxu0 %v522_v52 }
  0x40   : > { %4134 = vmatprep.mubr.f32.mxu1 %v4736_v10  ;;  %4061 = vmatpush3.msra.mxu0 %v522_v52 }
  0x41   : > { %1039 = vperm.xlu1 %4281, %v981_v17   ;;  %4062 = vmatprep.subr.mxu0 %v521_v53 }
  0x42   : > { %4063 = vmatpush3.msra.mxu0 %v521_v53 }
  0x43   : > { %4135 = vmatmul.mubr.f32.gmra.mxu1 %v4749_v18  ;;  %4064 = vmatprep.subr.mxu0 %v520_v54 }
  0x44   : > { %4137 = vmatprep.mubr.f32.mxu1 %v4753_v19  ;;  %4065 = vmatpush3.msra.mxu0 %v520_v54 }
  0x45   : > { %1044 = vperm.xlu1 %4281, %v982_v26   ;;  %4067 = vmatmul.mubr.f32.vlgmr.msra.gmra.mxu0 %v4681_v48  ;;  %v4820_v48 = vld [vmem:[%s440_s29] ss:$0 sm:$0xff] }
  0x46   : > { %4069 = vmatprep.mubr.f32.mxu0 %v4685_v49 }
  0x47   : > { %4138 = vmatmul.mubr.f32.gmra.mxu1 %v4766_v27 }
  0x48   : > { %4140 = vmatprep.mubr.f32.mxu1 %v4770_v28 }
  0x49   : > { %1049 = vperm.xlu1 %4281, %v983_v31   ;;  %4070 = vmatmul.mubr.f32.gmra.mxu0 %v4698_v55 }
  0x4a   : > { %4072 = vmatprep.mubr.f32.mxu0 %v4702_v56 }
  0x4b   : > { %4141 = vmatmul.mubr.f32.gmra.mxu1 %v517_v34 }
  0x4c   : > { %4143 = vmatprep.mubr.f32.mxu1 %v518_v35 }
  0x4d   : > { %1054 = vperm.xlu1 %4281, %v984_v38   ;;  %4073 = vmatmul.mubr.f32.gmra.mxu0 %v4715_v62 }
  0x4e   : > { %4075 = vmatprep.mubr.f32.mxu0 %v4719_v63 }
  0x4f   : > { %4144 = vmatmul.mubr.f32.gmra.mxu1 %v519_v40 }
  0x51   : > { %1059 = vperm.xlu1 %4281, %v985_v41   ;;  %4076 = vmatmul.mubr.f32.gmra.mxu0 %v4732_v9 }
  0x52   : > { %4078 = vmatprep.mubr.f32.mxu0 %v4736_v10  ;;  %v7410_v10 = vmov 5  }
  0x55   : > { %1064 = vperm.xlu1 %4281, %v986_v42   ;;  %4079 = vmatmul.mubr.f32.gmra.mxu0 %v4749_v18 }
  0x56   : > { %4081 = vmatprep.mubr.f32.mxu0 %v4753_v19 }
  0x59   : > { %4082 = vmatmul.mubr.f32.gmra.mxu0 %v4766_v27 }
  0x5a   : > { %4084 = vmatprep.mubr.f32.mxu0 %v4770_v28 }
  0x5d   : > { %4085 = vmatmul.mubr.f32.gmra.mxu0 %v517_v34 }
  0x5e   : > { %4087 = vmatprep.mubr.f32.mxu0 %v518_v35 }
  0x61   : > { %4088 = vmatmul.mubr.f32.gmra.mxu0 %v519_v40 }
  0x91   : > { %v4976_v40 = vpop.permute.xlu0 %1500 }
  0x92   : > { %v4874_v18 = vpop.permute.xlu1 %989  ;;  %7527 = vst [vmem:[#allocation15_spill] sm:$0xff] %v4976_v40  ;;  %v7564_v40 = vmov 5  }
  0x96   : > { %v4993_v45 = vpop.permute.xlu0 %1636 }
  0x97   : > { %v4882_v19 = vpop.permute.xlu1 %994  ;;  %7529 = vst [vmem:[#allocation17_spill] sm:$0xff] %v4993_v45 }
  0x9b   : > { %v5004_v50 = vpop.permute.xlu0 %1772 }
  0x9c   : > { %v4890_v20 = vpop.permute.xlu1 %999  ;;  %7530 = vst [vmem:[#allocation18_spill] sm:$0xff] %v5004_v50 }
  0xa0   : > { %v4899_v23 = vpop.permute.xlu1 %1004 }
  0xa3   : > { %v5016_v54 = vpop.permute.xlu0 %1364 }
  0xa4   : > { %v4905_v24 = vpop.permute.xlu1 %1009  ;;  %7531 = vst [vmem:[#allocation19_spill] sm:$0xff] %v5016_v54 }
  0xa8   : > { %v4915_v27 = vpop.permute.xlu1 %1014 }
  0xac   : > { %v4926_v29 = vpop.permute.xlu1 %1019 }
  0xb0   : > { %v4934_v30 = vpop.permute.xlu1 %1024 }
  0xb4   : > { %v4944_v32 = vpop.permute.xlu1 %1029 }
  0xb8   : > { %v4954_v34 = vpop.permute.xlu1 %1034 }
  0xbc   : > { %v4960_v35 = vpop.permute.xlu1 %1039 }
  0xc0   : > { %v4968_v36 = vpop.permute.xlu1 %1044 }
  0xc4   : > { %v4982_v42 = vpop.permute.xlu1 %1049 }
  0xc8   : > { %v4997_v46 = vpop.permute.xlu1 %1054 }
  0xcc   : > { %v5008_v52 = vpop.permute.xlu1 %1059 }
  0xf3   : > { %v4124_v49 = vpop.f32.mrf.mxu1 }
  0xf4   : > { %v4823_v55 = vadd.f32 %v4124_v49, %v4820_v48 }
  0xf5   : > { %v777_v56 = vpop.f32.mrf.mxu1 }
  0xf6   : > { %1268 = vperm.xlu0 %4285, %v4823_v55   ;;  %1113 = vperm.xlu1 %4281, %v4823_v55   ;;  %v4828_v58 = vadd.f32 %v4820_v48, %v777_v56  ;;  %v5021_v56 = vpop.permute.xlu1 %1064 }
  0xf7   : > { %v4127_v57 = vpop.f32.mrf.mxu1 }
  0xf8   : > { %v4872_v17 = vadd.f32 %v4127_v57, %v4820_v48 }
  0xf9   : > { %v4830_v59 = vpop.f32.mrf.mxu1 }
  0xfa   : > { %4286 = vset.pattern.permute.xlu0 %v7418_v3  ;;  %4290 = vset.pattern.permute.xlu1 %v7420_v39  ;;  %7523 = vst [vmem:[#allocation11_spill] sm:$0xff] %v4872_v17  ;;  %v4909_v26 = vadd.f32 %v4820_v48, %v4830_v59 }
  0xfb   : > { %1404 = vperm.xlu0 %4286, %v4823_v55   ;;  %1264 = vperm.xlu1 %4290, %v4828_v58   ;;  %v4836_v60 = vpop.f32.mrf.mxu1 }
  0xfc   : > { %v4942_v31 = vadd.f32 %v4836_v60, %v4820_v48 }
  0xfd   : > { %v797_v61 = vpop.f32.mrf.mxu1 }
  0xfe   : > { %v4862_v13 = vadd.f32 %v4820_v48, %v797_v61  ;;  %7525 = vst [vmem:[#allocation13_spill] sm:$0xff] %v4942_v31 }
  0xff   : > { %4287 = vset.pattern.permute.xlu0 %v7414_v21  ;;  %4291 = vset.pattern.permute.xlu1 %v7418_v3  ;;  %v4133_v62 = vpop.f32.mrf.mxu1 }
 0x100   : > { %1540 = vperm.xlu0 %4287, %v4823_v55   ;;  %1400 = vperm.xlu1 %4291, %v4828_v58   ;;  %v4843_v63 = vadd.f32 %v4133_v62, %v4820_v48  ;;  %7521 = vst [vmem:[#allocation9_spill] sm:$0xff] %v4862_v13 }
 0x101   : > { %v807_v0 = vpop.f32.mrf.mxu1 }
 0x102   : > { %7520 = vst [vmem:[#allocation8_spill] sm:$0xff] %v4843_v63  ;;  %v4893_v22 = vadd.f32 %v4820_v48, %v807_v0 }
 0x103   : > { %v4136_v5 = vpop.f32.mrf.mxu1 }
 0x104   : > { %4288 = vset.pattern.permute.xlu0 %v7412_v25  ;;  %4292 = vset.pattern.permute.xlu1 %v7414_v21  ;;  %v4848_v6 = vadd.f32 %v4136_v5, %v4820_v48  ;;  %7524 = vst [vmem:[#allocation12_spill] sm:$0xff] %v4893_v22 }
 0x105   : > { %1676 = vperm.xlu0 %4288, %v4823_v55   ;;  %1536 = vperm.xlu1 %4292, %v4828_v58   ;;  %v817_v7 = vpop.f32.mrf.mxu1  ;;  %v4972_v37 = vpop.f32.mrf.mxu0 }
 0x106   : > { %v4922_v28 = vadd.f32 %v4820_v48, %v817_v7 }
 0x107   : > { %v4139_v8 = vpop.f32.mrf.mxu1  ;;  %v4980_v41 = vpop.f32.mrf.mxu0 }
 0x108   : > { %v4853_v9 = vadd.f32 %v4139_v8, %v4820_v48 }
 0x109   : > { %4289 = vset.pattern.permute.xlu0 %v7410_v10  ;;  %4293 = vset.pattern.permute.xlu1 %v7412_v25  ;;  %v4857_v11 = vpop.f32.mrf.mxu1  ;;  %v4987_v44 = vpop.f32.mrf.mxu0 }
 0x10a   : > { %1812 = vperm.xlu0 %4289, %v4823_v55   ;;  %1672 = vperm.xlu1 %4293, %v4828_v58   ;;  %v4952_v33 = vadd.f32 %v4820_v48, %v4857_v11 }
 0x10b   : > { %v4142_v15 = vpop.f32.mrf.mxu1  ;;  %v4995_v12 = vpop.f32.mrf.mxu0 }
 0x10c   : > { %v4865_v16 = vadd.f32 %v4142_v15, %v4820_v48  ;;  %7526 = vst [vmem:[#allocation14_spill] sm:$0xff] %v4952_v33 }
 0x10d   : > { %v837_v38 = vpop.f32.mrf.mxu1  ;;  %v4999_v47 = vpop.f32.mrf.mxu0 }
 0x10e   : > { %7522 = vst [vmem:[#allocation10_spill] sm:$0xff] %v4865_v16  ;;  %4311 = vset.pattern.permute.xlu0 %v7420_v39  ;;  %4294 = vset.pattern.permute.xlu1 %v7410_v10  ;;  %v4985_v43 = vadd.f32 %v4820_v48, %v837_v38 }
 0x10f   : > { %1280 = vperm.xlu0 %4311, %v4862_v13   ;;  %1808 = vperm.xlu1 %4294, %v4828_v58   ;;  %v5006_v51 = vpop.f32.mrf.mxu0 }
 0x110   : > { %7528 = vst [vmem:[#allocation16_spill] sm:$0xff] %v4985_v43 }
 0x111   : > { %v5013_v53 = vpop.f32.mrf.mxu0 }
 0x113   : > { %4312 = vset.pattern.permute.xlu0 %v7418_v3  ;;  %4295 = vset.pattern.permute.xlu1 %v7416_v1  ;;  %v5019_v49 = vpop.f32.mrf.mxu0 }
 0x114   : > { %1416 = vperm.xlu0 %4312, %v4862_v13   ;;  %1123 = vperm.xlu1 %4295, %v4872_v17  }
 0x115   : > { %v5026_v57 = vpop.f32.mrf.mxu0 }
 0x117   : > { %v5035_v61 = vpop.f32.mrf.mxu0 }
 0x118   : > { %4313 = vset.pattern.permute.xlu0 %v7414_v21  ;;  %4296 = vset.pattern.permute.xlu1 %v7420_v39 }
 0x119   : > { %1552 = vperm.xlu0 %4313, %v4862_v13   ;;  %1276 = vperm.xlu1 %4296, %v4872_v17   ;;  %v4083_v62 = vpop.f32.mrf.mxu0 }
 0x11b   : > { %v659_v7 = vpop.f32.mrf.mxu0 }
 0x11d   : > { %4314 = vset.pattern.permute.xlu0 %v7412_v25  ;;  %4297 = vset.pattern.permute.xlu1 %v7418_v3  ;;  %v4086_v8 = vpop.f32.mrf.mxu0 }
 0x11e   : > { %1688 = vperm.xlu0 %4314, %v4862_v13   ;;  %1412 = vperm.xlu1 %4297, %v4872_v17  }
 0x11f   : > { %v669_v38 = vpop.f32.mrf.mxu0 }
 0x122   : > { %4320 = vset.pattern.permute.xlu0 %v7420_v39  ;;  %4298 = vset.pattern.permute.xlu1 %v7414_v21 }
 0x123   : > { %1288 = vperm.xlu0 %4320, %v4893_v22   ;;  %1548 = vperm.xlu1 %4298, %v4872_v17  }
 0x127   : > { %4321 = vset.pattern.permute.xlu0 %v7418_v3  ;;  %4299 = vset.pattern.permute.xlu1 %v7412_v25 }
 0x128   : > { %1424 = vperm.xlu0 %4321, %v4893_v22   ;;  %1684 = vperm.xlu1 %4299, %v4872_v17  }
 0x12c   : > { %4322 = vset.pattern.permute.xlu0 %v7414_v21  ;;  %4300 = vset.pattern.permute.xlu1 %v7416_v1 }
 0x12d   : > { %1560 = vperm.xlu0 %4322, %v4893_v22   ;;  %1118 = vperm.xlu1 %4300, %v4909_v26  }
 0x131   : > { %4323 = vset.pattern.permute.xlu0 %v7412_v25  ;;  %4301 = vset.pattern.permute.xlu1 %v7420_v39 }
 0x132   : > { %1696 = vperm.xlu0 %4323, %v4893_v22   ;;  %1272 = vperm.xlu1 %4301, %v4909_v26  }
 0x136   : > { %4329 = vset.pattern.permute.xlu0 %v7420_v39  ;;  %4302 = vset.pattern.permute.xlu1 %v7418_v3 }
 0x137   : > { %1296 = vperm.xlu0 %4329, %v4922_v28   ;;  %1408 = vperm.xlu1 %4302, %v4909_v26  }
 0x13b   : > { %4330 = vset.pattern.permute.xlu0 %v7418_v3  ;;  %4303 = vset.pattern.permute.xlu1 %v7414_v21 }
 0x13c   : > { %1432 = vperm.xlu0 %4330, %v4922_v28   ;;  %1544 = vperm.xlu1 %4303, %v4909_v26  }
 0x140   : > { %4331 = vset.pattern.permute.xlu0 %v7414_v21  ;;  %4304 = vset.pattern.permute.xlu1 %v7412_v25 }
 0x141   : > { %1568 = vperm.xlu0 %4331, %v4922_v28   ;;  %1680 = vperm.xlu1 %4304, %v4909_v26  }
 0x145   : > { %4332 = vset.pattern.permute.xlu0 %v7412_v25  ;;  %4305 = vset.pattern.permute.xlu1 %v7416_v1 }
 0x146   : > { %1704 = vperm.xlu0 %4332, %v4922_v28   ;;  %1133 = vperm.xlu1 %4305, %v4942_v31  }
 0x14a   : > { %4338 = vset.pattern.permute.xlu0 %v7420_v39  ;;  %4306 = vset.pattern.permute.xlu1 %v7420_v39 }
 0x14b   : > { %1304 = vperm.xlu0 %4338, %v4952_v33   ;;  %1284 = vperm.xlu1 %4306, %v4942_v31  }
 0x14f   : > { %4339 = vset.pattern.permute.xlu0 %v7418_v3  ;;  %4307 = vset.pattern.permute.xlu1 %v7418_v3 }
 0x150   : > { %1440 = vperm.xlu0 %4339, %v4952_v33   ;;  %1420 = vperm.xlu1 %4307, %v4942_v31  }
 0x154   : > { %4340 = vset.pattern.permute.xlu0 %v7414_v21  ;;  %4308 = vset.pattern.permute.xlu1 %v7414_v21 }
 0x155   : > { %1576 = vperm.xlu0 %4340, %v4952_v33   ;;  %1556 = vperm.xlu1 %4308, %v4942_v31  }
 0x159   : > { %4341 = vset.pattern.permute.xlu0 %v7412_v25  ;;  %4309 = vset.pattern.permute.xlu1 %v7412_v25 }
 0x15a   : > { %1712 = vperm.xlu0 %4341, %v4952_v33   ;;  %1692 = vperm.xlu1 %4309, %v4942_v31  }
 0x15e   : > { %4346 = vset.pattern.permute.xlu0 %v7420_v39  ;;  %4310 = vset.pattern.permute.xlu1 %v7416_v1 }
 0x15f   : > { %1312 = vperm.xlu0 %4346, %v4985_v43   ;;  %1128 = vperm.xlu1 %4310, %v4862_v13  }
 0x163   : > { %4347 = vset.pattern.permute.xlu0 %v7418_v3  ;;  %1143 = vperm.xlu1 %4310, %v4843_v63  }
 0x164   : > { %1448 = vperm.xlu0 %4347, %v4985_v43  }
 0x167   : > { %4315 = vset.pattern.permute.xlu1 %v7420_v39 }
 0x168   : > { %4348 = vset.pattern.permute.xlu0 %v7414_v21  ;;  %1292 = vperm.xlu1 %4315, %v4843_v63  }
 0x169   : > { %1584 = vperm.xlu0 %4348, %v4985_v43  }
 0x16c   : > { %4316 = vset.pattern.permute.xlu1 %v7418_v3 }
 0x16d   : > { %4349 = vset.pattern.permute.xlu0 %v7412_v25  ;;  %1428 = vperm.xlu1 %4316, %v4843_v63  }
 0x16e   : > { %1720 = vperm.xlu0 %4349, %v4985_v43  }
 0x171   : > { %v5028_v59 = vpop.permute.xlu0 %1268  ;;  %v5030_v60 = vpop.permute.xlu1 %1113  ;;  %4317 = vset.pattern.permute.xlu1 %v7414_v21  ;;  %v5062_v21 = vld [vmem:[%s437_s15] ss:$0 sm:$0xff] }
 0x172   : > { %7532 = vst [vmem:[#allocation20_spill] sm:$0xff] %v5028_v59  ;;  %7533 = vst [vmem:[#allocation21_spill] sm:$0xff] %v5030_v60  ;;  %4356 = vset.pattern.permute.xlu0 %v7410_v10  ;;  %1564 = vperm.xlu1 %4317, %v4843_v63   ;;  %v7545_v60 = vmov 0   ;;  %v5140_v50 = vadd.f32 %v5026_v57, %v5062_v21  ;;  %v5152_v57 = vadd.f32 %v5062_v21, %v5035_v61  ;;  %v7555_v61 = vmov 1  }
 0x173   : > { %1824 = vperm.xlu0 %4356, %v4862_v13   ;;  %v5200_v45 = vadd.f32 %v5062_v21, %v5006_v51 }
 0x176   : > { %v5038_v0 = vpop.permute.xlu0 %1404  ;;  %4318 = vset.pattern.permute.xlu1 %v7412_v25  ;;  %v5041_v5 = vpop.permute.xlu1 %1264 }
 0x177   : > { %7534 = vst [vmem:[#allocation22_spill] sm:$0xff] %v5038_v0  ;;  %7535 = vst [vmem:[#allocation23_spill] sm:$0xff] %v5041_v5  ;;  %1832 = vperm.xlu0 %4356, %v4893_v22   ;;  %1700 = vperm.xlu1 %4318, %v4843_v63  }
 0x17b   : > { %v5045_v11 = vpop.permute.xlu0 %1540  ;;  %1840 = vperm.xlu0 %4356, %v4922_v28   ;;  %4319 = vset.pattern.permute.xlu1 %v7416_v1  ;;  %v5049_v15 = vpop.permute.xlu1 %1400 }
 0x17c   : > { %7536 = vst [vmem:[#allocation24_spill] sm:$0xff] %v5045_v11  ;;  %7537 = vst [vmem:[#allocation25_spill] sm:$0xff] %v5049_v15  ;;  %1138 = vperm.xlu1 %4319, %v4893_v22   ;;  %v4089_v1 = vpop.f32.mrf.mxu0  ;;  %v5115_v15 = vadd.f32 %v4083_v62, %v5062_v21  ;;  %v7549_v62 = vmov 4  }
 0x17d   : > { %v5065_v3 = vadd.f32 %v4089_v1, %v5062_v21  ;;  %v5084_v1 = vadd.f32 %v4086_v8, %v5062_v21  ;;  %v5098_v8 = vadd.f32 %v5062_v21, %v669_v38 }
 0x17e   : > { %v679_v11 = vpop.f32.mrf.mxu0 }
 0x17f   : > { %1848 = vperm.xlu0 %4356, %v4952_v33   ;;  %4146 = vmatprep.subr.mxu0 %v5065_v3  ;;  %v5074_v0 = vadd.f32 %v5062_v21, %v679_v11  ;;  %v7542_v11 = vmov 2  }
 0x180   : > { %v5057_v10 = vpop.permute.xlu0 %1676  ;;  %1153 = vperm.xlu1 %4319, %v4848_v6   ;;  %v5060_v25 = vpop.permute.xlu1 %1536  ;;  %4202 = vmatprep.subr.mxu1 %v5065_v3 }
 0x181   : > { %7538 = vst [vmem:[#allocation26_spill] sm:$0xff] %v5057_v10  ;;  %7539 = vst [vmem:[#allocation27_spill] sm:$0xff] %v5060_v25  ;;  %4147 = vmatpush3.msra.mxu0 %v5065_v3  ;;  %4218 = vmatpush3.msra.mxu1 %v5065_v3 }
 0x182   : > { %4148 = vmatprep.subr.mxu0 %v5074_v0  ;;  %4203 = vmatprep.subr.mxu1 %v5074_v0 }
 0x183   : > { %1856 = vperm.xlu0 %4356, %v4985_v43   ;;  %4149 = vmatpush3.msra.mxu0 %v5074_v0 }
 0x184   : > { %4324 = vset.pattern.permute.xlu1 %v7420_v39  ;;  %4219 = vmatpush3.msra.mxu1 %v5074_v0 }
 0x185   : > { %1300 = vperm.xlu1 %4324, %v4848_v6   ;;  %v5071_v10 = vpop.permute.xlu1 %1672  ;;  %v5077_v59 = vpop.permute.xlu0 %1812  ;;  %4150 = vmatprep.subr.mxu0 %v5084_v1 }
 0x186   : > { %7540 = vst [vmem:[#allocation28_spill] sm:$0xff] %v5071_v10  ;;  %7541 = vst [vmem:[#allocation29_spill] sm:$0xff] %v5077_v59  ;;  %4204 = vmatprep.subr.mxu1 %v5084_v1  ;;  %4151 = vmatpush3.msra.mxu0 %v5084_v1  ;;  %v5103_v10 = vpop.f32.mrf.mxu1 }
 0x187   : > { %1908 = vperm.xlu0 %4356, %v4626_v14   ;;  %4220 = vmatpush3.msra.mxu1 %v5084_v1 }
 0x188   : > { %4152 = vmatprep.subr.mxu0 %v5098_v8  ;;  %4205 = vmatprep.subr.mxu1 %v5098_v8  ;;  %v847_v5 = vpop.f32.mrf.mxu1 }
 0x189   : > { %4325 = vset.pattern.permute.xlu1 %v7542_v11  ;;  %4153 = vmatpush3.msra.mxu0 %v5098_v8 }
 0x18a   : > { %1436 = vperm.xlu1 %4325, %v4848_v6   ;;  %v5091_v39 = vpop.permute.xlu1 %1808  ;;  %v5093_v59 = vpop.permute.xlu0 %1280  ;;  %4221 = vmatpush3.msra.mxu1 %v5098_v8 }
 0x18b   : > { %7543 = vst [vmem:[#allocation30_spill] sm:$0xff] %v5091_v39  ;;  %7544 = vst [vmem:[#allocation31_spill] sm:$0xff] %v5093_v59  ;;  %4357 = vset.pattern.permute.xlu0 %v7545_v60  ;;  %v7546_v39 = vmov 3   ;;  %v5121_v59 = vadd.f32 %v5062_v21, %v659_v7  ;;  %4154 = vmatprep.subr.mxu0 %v5115_v15  ;;  %v5134_v7 = vadd.f32 %v4820_v48, %v847_v5 }
 0x18c   : > { %1108 = vperm.xlu0 %4357, %v4828_v58   ;;  %4206 = vmatprep.subr.mxu1 %v5115_v15 }
 0x18d   : > { %4155 = vmatpush3.msra.mxu0 %v5115_v15  ;;  %4222 = vmatpush3.msra.mxu1 %v5115_v15  ;;  %7551 = vst [vmem:[#allocation35_spill] sm:$0xff] %v5134_v7 }
 0x18e   : > { %4326 = vset.pattern.permute.xlu1 %v7546_v39  ;;  %4156 = vmatprep.subr.mxu0 %v5121_v59 }
 0x18f   : > { %1572 = vperm.xlu1 %4326, %v4848_v6   ;;  %v5110_v38 = vpop.permute.xlu1 %1123  ;;  %v5112_v25 = vpop.permute.xlu0 %1416  ;;  %4207 = vmatprep.subr.mxu1 %v5121_v59 }
 0x190   : > { %7547 = vst [vmem:[#allocation32_spill] sm:$0xff] %v5110_v38  ;;  %7548 = vst [vmem:[#allocation33_spill] sm:$0xff] %v5112_v25  ;;  %1168 = vperm.xlu0 %4357, %v4985_v43   ;;  %4157 = vmatpush3.msra.mxu0 %v5121_v59 }
 0x191   : > { %4223 = vmatpush3.msra.mxu1 %v5121_v59  ;;  %4158 = vmatprep.subr.mxu0 %v5140_v50 }
 0x192   : > { %4208 = vmatprep.subr.mxu1 %v5140_v50  ;;  %4159 = vmatpush3.msra.mxu0 %v5140_v50 }
 0x193   : > { %4327 = vset.pattern.permute.xlu1 %v7549_v62  ;;  %4224 = vmatpush3.msra.mxu1 %v5140_v50 }
 0x194   : > { %1228 = vperm.xlu0 %4357, %v4626_v14   ;;  %1708 = vperm.xlu1 %4327, %v4848_v6   ;;  %v5131_v38 = vpop.permute.xlu1 %1276  ;;  %v5136_v25 = vpop.permute.xlu0 %1552 }
 0x195   : > { %7550 = vst [vmem:[#allocation34_spill] sm:$0xff] %v5131_v38  ;;  %7552 = vst [vmem:[#allocation36_spill] sm:$0xff] %v5136_v25  ;;  %v5162_v25 = vadd.f32 %v5013_v53, %v5062_v21  ;;  %4160 = vmatprep.subr.mxu0 %v5152_v57  ;;  %4209 = vmatprep.subr.mxu1 %v5152_v57  ;;  %v5174_v53 = vadd.f32 %v5062_v21, %v5019_v49 }
 0x196   : > { %4161 = vmatpush3.msra.mxu0 %v5152_v57  ;;  %4225 = vmatpush3.msra.mxu1 %v5152_v57  ;;  %v5190_v49 = vadd.f32 %v4999_v47, %v5062_v21  ;;  %v5214_v47 = vadd.f32 %v4987_v44, %v5062_v21  ;;  %v620_v44 = vadd.f32 %v5062_v21, %v4995_v12 }
 0x197   : > { %4162 = vmatprep.subr.mxu0 %v5162_v25  ;;  %4210 = vmatprep.subr.mxu1 %v5162_v25  ;;  %v610_v12 = vadd.f32 %v5062_v21, %v4980_v41 }
 0x198   : > { %1178 = vperm.xlu0 %4357, %v5134_v7   ;;  %4328 = vset.pattern.permute.xlu1 %v7545_v60 }
 0x199   : > { %1148 = vperm.xlu1 %4328, %v4922_v28   ;;  %v5155_v5 = vpop.permute.xlu1 %1412  ;;  %v5157_v38 = vpop.permute.xlu0 %1688  ;;  %4163 = vmatpush3.msra.mxu0 %v5162_v25 }
 0x19a   : > { %7553 = vst [vmem:[#allocation37_spill] sm:$0xff] %v5155_v5  ;;  %7554 = vst [vmem:[#allocation38_spill] sm:$0xff] %v5157_v38  ;;  %4226 = vmatpush3.msra.mxu1 %v5162_v25  ;;  %4164 = vmatprep.subr.mxu0 %v5174_v53 }
 0x19b   : > { %4211 = vmatprep.subr.mxu1 %v5174_v53  ;;  %4165 = vmatpush3.msra.mxu0 %v5174_v53 }
 0x19c   : > { %4359 = vset.pattern.permute.xlu0 %v7555_v61  ;;  %4227 = vmatpush3.msra.mxu1 %v5174_v53 }
 0x19d   : > { %1320 = vperm.xlu0 %4359, %v5134_v7   ;;  %1163 = vperm.xlu1 %4328, %v4853_v9  }
 0x19e   : > { %v5176_v5 = vpop.permute.xlu1 %1548  ;;  %v5178_v38 = vpop.permute.xlu0 %1288  ;;  %4166 = vmatprep.subr.mxu0 %v5190_v49  ;;  %4212 = vmatprep.subr.mxu1 %v5190_v49 }
 0x19f   : > { %7556 = vst [vmem:[#allocation39_spill] sm:$0xff] %v5176_v5  ;;  %7557 = vst [vmem:[#allocation40_spill] sm:$0xff] %v5178_v38  ;;  %4167 = vmatpush3.msra.mxu0 %v5190_v49  ;;  %4228 = vmatpush3.msra.mxu1 %v5190_v49 }
 0x1a0   : > { %4168 = vmatprep.subr.mxu0 %v5200_v45  ;;  %4213 = vmatprep.subr.mxu1 %v5200_v45 }
 0x1a1   : > { %4360 = vset.pattern.permute.xlu0 %v7542_v11  ;;  %4333 = vset.pattern.permute.xlu1 %v7555_v61 }
 0x1a2   : > { %1456 = vperm.xlu0 %4360, %v5134_v7   ;;  %1308 = vperm.xlu1 %4333, %v4853_v9  }
 0x1a3   : > { %v5194_v5 = vpop.permute.xlu1 %1684  ;;  %v5196_v38 = vpop.permute.xlu0 %1424  ;;  %4169 = vmatpush3.msra.mxu0 %v5200_v45  ;;  %4229 = vmatpush3.msra.mxu1 %v5200_v45 }
 0x1a4   : > { %7558 = vst [vmem:[#allocation41_spill] sm:$0xff] %v5194_v5  ;;  %7559 = vst [vmem:[#allocation42_spill] sm:$0xff] %v5196_v38  ;;  %4170 = vmatprep.subr.mxu0 %v5214_v47  ;;  %4214 = vmatprep.subr.mxu1 %v5214_v47  ;;  %v615_v38 = vadd.f32 %v4972_v37, %v5062_v21 }
 0x1a5   : > { %4171 = vmatpush3.msra.mxu0 %v5214_v47  ;;  %4230 = vmatpush3.msra.mxu1 %v5214_v47 }
 0x1a6   : > { %4361 = vset.pattern.permute.xlu0 %v7546_v39  ;;  %4334 = vset.pattern.permute.xlu1 %v7542_v11 }
 0x1a7   : > { %1592 = vperm.xlu0 %4361, %v5134_v7   ;;  %1444 = vperm.xlu1 %4334, %v4853_v9  }
 0x1a8   : > { %v5216_v51 = vpop.permute.xlu1 %1118  ;;  %v5218_v5 = vpop.permute.xlu0 %1560  ;;  %4172 = vmatprep.subr.mxu0 %v620_v44  ;;  %4215 = vmatprep.subr.mxu1 %v620_v44 }
 0x1a9   : > { %7560 = vst [vmem:[#allocation43_spill] sm:$0xff] %v5216_v51  ;;  %7561 = vst [vmem:[#allocation44_spill] sm:$0xff] %v5218_v5  ;;  %4173 = vmatpush3.msra.mxu0 %v620_v44  ;;  %4231 = vmatpush3.msra.mxu1 %v620_v44 }
 0x1aa   : > { %4174 = vmatprep.subr.mxu0 %v615_v38  ;;  %4216 = vmatprep.subr.mxu1 %v615_v38 }
 0x1ab   : > { %4362 = vset.pattern.permute.xlu0 %v7549_v62  ;;  %4335 = vset.pattern.permute.xlu1 %v7546_v39 }
 0x1ac   : > { %1728 = vperm.xlu0 %4362, %v5134_v7   ;;  %1580 = vperm.xlu1 %4335, %v4853_v9  }
 0x1ad   : > { %v5232_v51 = vpop.permute.xlu1 %1272  ;;  %v5234_v5 = vpop.permute.xlu0 %1696  ;;  %4175 = vmatpush3.msra.mxu0 %v615_v38  ;;  %4232 = vmatpush3.msra.mxu1 %v615_v38 }
 0x1ae   : > { %7562 = vst [vmem:[#allocation45_spill] sm:$0xff] %v5232_v51  ;;  %7563 = vst [vmem:[#allocation46_spill] sm:$0xff] %v5234_v5  ;;  %4176 = vmatprep.subr.mxu0 %v610_v12  ;;  %4217 = vmatprep.subr.mxu1 %v610_v12 }
 0x1af   : > { %4177 = vmatpush3.msra.mxu0 %v610_v12  ;;  %4233 = vmatpush3.msra.mxu1 %v610_v12 }
 0x1b0   : > { %4363 = vset.pattern.permute.xlu0 %v7564_v40  ;;  %4336 = vset.pattern.permute.xlu1 %v7549_v62 }
 0x1b1   : > { %1864 = vperm.xlu0 %4363, %v5134_v7   ;;  %1716 = vperm.xlu1 %4336, %v4853_v9  }
 0x1b2   : > { %v5245_v51 = vpop.permute.xlu1 %1408  ;;  %v5247_v37 = vpop.permute.xlu0 %1296 }
 0x1b3   : > { %7565 = vst [vmem:[#allocation47_spill] sm:$0xff] %v5245_v51  ;;  %7566 = vst [vmem:[#allocation48_spill] sm:$0xff] %v5247_v37 }
 0x1b5   : > { %4337 = vset.pattern.permute.xlu1 %v7545_v60 }
 0x1b6   : > { %1158 = vperm.xlu1 %4337, %v4952_v33  }
 0x1b7   : > { %v5251_v5 = vpop.permute.xlu1 %1544  ;;  %v5253_v54 = vpop.permute.xlu0 %1432 }
 0x1b8   : > { %7567 = vst [vmem:[#allocation49_spill] sm:$0xff] %v5251_v5  ;;  %7568 = vst [vmem:[#allocation50_spill] sm:$0xff] %v5253_v54 }
 0x1ba   : > { %1173 = vperm.xlu1 %4337, %v4865_v16  }
 0x1bc   : > { %v5256_v21 = vpop.permute.xlu1 %1680  ;;  %v5258_v41 = vpop.permute.xlu0 %1568 }
 0x1bd   : > { %7569 = vst [vmem:[#allocation51_spill] sm:$0xff] %v5256_v21  ;;  %7570 = vst [vmem:[#allocation52_spill] sm:$0xff] %v5258_v41 }
 0x1be   : > { %4342 = vset.pattern.permute.xlu1 %v7555_v61 }
 0x1bf   : > { %1316 = vperm.xlu1 %4342, %v4865_v16  }
 0x1c1   : > { %v5262_v51 = vpop.permute.xlu1 %1133  ;;  %v5264_v37 = vpop.permute.xlu0 %1704 }
 0x1c2   : > { %7571 = vst [vmem:[#allocation53_spill] sm:$0xff] %v5262_v51  ;;  %7572 = vst [vmem:[#allocation54_spill] sm:$0xff] %v5264_v37  ;;  %v5282_v51 = vadd.f32 %v5103_v10, %v4820_v48 }
 0x1c3   : > { %4343 = vset.pattern.permute.xlu1 %v7542_v11 }
 0x1c4   : > { %1452 = vperm.xlu1 %4343, %v4865_v16   ;;  %7577 = vst [vmem:[#allocation59_spill] sm:$0xff] %v5282_v51 }
 0x1c6   : > { %v5268_v5 = vpop.permute.xlu1 %1284  ;;  %v5270_v54 = vpop.permute.xlu0 %1304 }
 0x1c7   : > { %7573 = vst [vmem:[#allocation55_spill] sm:$0xff] %v5268_v5  ;;  %7574 = vst [vmem:[#allocation56_spill] sm:$0xff] %v5270_v54 }
 0x1c8   : > { %4344 = vset.pattern.permute.xlu1 %v7546_v39 }
 0x1c9   : > { %1588 = vperm.xlu1 %4344, %v4865_v16  }
 0x1cb   : > { %v5274_v21 = vpop.permute.xlu1 %1420  ;;  %v5276_v41 = vpop.permute.xlu0 %1440 }
 0x1cc   : > { %7575 = vst [vmem:[#allocation57_spill] sm:$0xff] %v5274_v21  ;;  %7576 = vst [vmem:[#allocation58_spill] sm:$0xff] %v5276_v41 }
 0x1cd   : > { %4345 = vset.pattern.permute.xlu1 %v7549_v62 }
 0x1ce   : > { %1724 = vperm.xlu1 %4345, %v4865_v16  }
 0x1cf   : > { %888 = vxpose.xlu0.b32.start [1/16] %v610_v12, 128 }
 0x1d0   : > { %v5284_v5 = vpop.permute.xlu1 %1556  ;;  %v5286_v37 = vpop.permute.xlu0 %1576 }
 0x1d1   : > { %7578 = vst [vmem:[#allocation60_spill] sm:$0xff] %v5284_v5  ;;  %7579 = vst [vmem:[#allocation61_spill] sm:$0xff] %v5286_v37 }
 0x1d2   : > { %4350 = vset.pattern.permute.xlu1 %v7545_v60 }
 0x1d3   : > { %1183 = vperm.xlu1 %4350, %v5282_v51   ;;  %889 = vxpose.xlu0.b32.cont [2/16] %v615_v38, 128 }
 0x1d5   : > { %v5290_v21 = vpop.permute.xlu1 %1692  ;;  %v5292_v41 = vpop.permute.xlu0 %1712 }
 0x1d6   : > { %7580 = vst [vmem:[#allocation62_spill] sm:$0xff] %v5290_v21  ;;  %7581 = vst [vmem:[#allocation63_spill] sm:$0xff] %v5292_v41 }
 0x1d7   : > { %4351 = vset.pattern.permute.xlu1 %v7555_v61  ;;  %890 = vxpose.xlu0.b32.cont [3/16] %v620_v44, 128 }
 0x1d8   : > { %1324 = vperm.xlu1 %4351, %v5282_v51  }
 0x1da   : > { %v5296_v48 = vpop.permute.xlu1 %1128  ;;  %v5299_v10 = vpop.permute.xlu0 %1312 }
 0x1db   : > { %7582 = vst [vmem:[#allocation64_spill] sm:$0xff] %v5296_v48  ;;  %891 = vxpose.xlu0.b32.cont [4/16] %v5214_v47, 128  ;;  %7583 = vst [vmem:[#allocation65_spill] sm:$0xff] %v5299_v10 }
 0x1dc   : > { %4352 = vset.pattern.permute.xlu1 %v7542_v11 }
 0x1dd   : > { %1460 = vperm.xlu1 %4352, %v5282_v51  }
 0x1de   : > { %v5303_v60 = vpop.permute.xlu1 %1143 }
 0x1df   : > { %7584 = vst [vmem:[#allocation66_spill] sm:$0xff] %v5303_v60  ;;  %892 = vxpose.xlu0.b32.cont [5/16] %v5200_v45, 128  ;;  %v5307_v38 = vpop.permute.xlu0 %1448 }
 0x1e0   : > { %7585 = vst [vmem:[#allocation67_spill] sm:$0xff] %v5307_v38 }
 0x1e1   : > { %4353 = vset.pattern.permute.xlu1 %v7546_v39 }
 0x1e2   : > { %1596 = vperm.xlu1 %4353, %v5282_v51  }
 0x1e3   : > { %v5310_v61 = vpop.permute.xlu1 %1292  ;;  %893 = vxpose.xlu0.b32.cont [6/16] %v5190_v49, 128 }
 0x1e4   : > { %7586 = vst [vmem:[#allocation68_spill] sm:$0xff] %v5310_v61  ;;  %v5314_v47 = vpop.permute.xlu0 %1584 }
 0x1e5   : > { %7587 = vst [vmem:[#allocation69_spill] sm:$0xff] %v5314_v47 }
 0x1e6   : > { %4354 = vset.pattern.permute.xlu1 %v7549_v62 }
 0x1e7   : > { %1732 = vperm.xlu1 %4354, %v5282_v51   ;;  %894 = vxpose.xlu0.b32.cont [7/16] %v5174_v53, 128 }
 0x1e8   : > { %v5318_v11 = vpop.permute.xlu1 %1428 }
 0x1e9   : > { %7588 = vst [vmem:[#allocation70_spill] sm:$0xff] %v5318_v11  ;;  %v5323_v39 = vpop.permute.xlu0 %1720 }
 0x1ea   : > { %7589 = vst [vmem:[#allocation71_spill] sm:$0xff] %v5323_v39 }
 0x1eb   : > { %4355 = vset.pattern.permute.xlu1 %v7564_v40  ;;  %895 = vxpose.xlu0.b32.cont [8/16] %v5162_v25, 128 }
 0x1ec   : > { %1816 = vperm.xlu1 %4355, %v4909_v26  }
 0x1ed   : > { %v5325_v45 = vpop.permute.xlu1 %1564 }
 0x1ee   : > { %7590 = vst [vmem:[#allocation72_spill] sm:$0xff] %v5325_v45  ;;  %v5331_v49 = vpop.permute.xlu0 %1824 }
 0x1ef   : > { %896 = vxpose.xlu0.b32.cont [9/16] %v5152_v57, 128  ;;  %7592 = vst [vmem:[#allocation74_spill] sm:$0xff] %v5331_v49 }
 0x1f0   : > { %1820 = vperm.xlu1 %4355, %v4872_v17  }
 0x1f2   : > { %v5329_v62 = vpop.permute.xlu1 %1700  ;;  %v5339_v25 = vpop.permute.xlu0 %1832 }
 0x1f3   : > { %7591 = vst [vmem:[#allocation73_spill] sm:$0xff] %v5329_v62  ;;  %897 = vxpose.xlu0.b32.cont [10/16] %v5140_v50, 128  ;;  %7594 = vst [vmem:[#allocation76_spill] sm:$0xff] %v5339_v25 }
 0x1f4   : > { %1828 = vperm.xlu1 %4355, %v4942_v31  }
 0x1f6   : > { %v5345_v57 = vpop.permute.xlu0 %1840 }
 0x1f7   : > { %v5335_v40 = vpop.permute.xlu1 %1138  ;;  %898 = vxpose.xlu0.b32.cont [11/16] %v5121_v59, 128  ;;  %7596 = vst [vmem:[#allocation78_spill] sm:$0xff] %v5345_v57 }
 0x1f8   : > { %7593 = vst [vmem:[#allocation75_spill] sm:$0xff] %v5335_v40  ;;  %1836 = vperm.xlu1 %4355, %v4843_v63  }
 0x1fa   : > { %v5353_v59 = vpop.permute.xlu0 %1848 }
 0x1fb   : > { %v5341_v53 = vpop.permute.xlu1 %1153  ;;  %899 = vxpose.xlu0.b32.cont [12/16] %v5115_v15, 128  ;;  %7598 = vst [vmem:[#allocation80_spill] sm:$0xff] %v5353_v59 }
 0x1fc   : > { %7595 = vst [vmem:[#allocation77_spill] sm:$0xff] %v5341_v53  ;;  %1844 = vperm.xlu1 %4355, %v4848_v6  }
 0x1fe   : > { %v5361_v12 = vpop.permute.xlu0 %1856 }
 0x1ff   : > { %900 = vxpose.xlu0.b32.cont [13/16] %v5098_v8, 128  ;;  %7601 = vst [vmem:[#allocation83_spill] sm:$0xff] %v5361_v12  ;;  %v4514_v8 = vmov 6  }
 0x200   : > { %1852 = vperm.xlu1 %4355, %v4853_v9   ;;  %v5349_v50 = vpop.permute.xlu1 %1300 }
 0x201   : > { %7597 = vst [vmem:[#allocation79_spill] sm:$0xff] %v5349_v50  ;;  %v4516_v50 = vmov 8  }
 0x202   : > { %v5367_v21 = vpop.permute.xlu0 %1908 }
 0x203   : > { %901 = vxpose.xlu0.b32.cont [14/16] %v5084_v1, 128  ;;  %7603 = vst [vmem:[#allocation85_spill] sm:$0xff] %v5367_v21 }
 0x204   : > { %1860 = vperm.xlu1 %4355, %v4865_v16  }
 0x205   : > { %v5355_v44 = vpop.permute.xlu1 %1436 }
 0x206   : > { %7599 = vst [vmem:[#allocation81_spill] sm:$0xff] %v5355_v44 }
 0x207   : > { %902 = vxpose.xlu0.b32.cont [15/16] %v5074_v0, 128  ;;  %v5373_v0 = vpop.permute.xlu0 %1108 }
 0x208   : > { %1868 = vperm.xlu1 %4355, %v5282_v51   ;;  %7605 = vst [vmem:[#allocation87_spill] sm:$0xff] %v5373_v0 }
 0x20a   : > { %v5359_v15 = vpop.permute.xlu1 %1572 }
 0x20b   : > { %7600 = vst [vmem:[#allocation82_spill] sm:$0xff] %v5359_v15  ;;  %903 = vxpose.xlu0.b32.end [16/16] %v5065_v3, 128  ;;  %v5378_v3 = vpop.permute.xlu0 %1168 }
 0x20c   : > { %4358 = vset.pattern.permute.xlu1 %v4514_v8  ;;  %7607 = vst [vmem:[#allocation89_spill] sm:$0xff] %v5378_v3  ;;  %v4515_v3 = vmov 7  }
 0x20d   : > { %1944 = vperm.xlu1 %4358, %v4828_v58  }
 0x20f   : > { %v5365_v1 = vpop.permute.xlu1 %1708  ;;  %v5384_v39 = vpop.permute.xlu0 %1228 }
 0x210   : > { %7602 = vst [vmem:[#allocation84_spill] sm:$0xff] %v5365_v1  ;;  %7609 = vst [vmem:[#allocation91_spill] sm:$0xff] %v5384_v39 }
 0x211   : > { %1952 = vperm.xlu1 %4358, %v4909_v26  }
 0x213   : > { %v5391_v0 = vpop.permute.xlu0 %1178 }
 0x214   : > { %v5370_v5 = vpop.permute.xlu1 %1148  ;;  %7612 = vst [vmem:[#allocation94_spill] sm:$0xff] %v5391_v0  ;;  %v4517_v0 = vmov 9  }
 0x215   : > { %7604 = vst [vmem:[#allocation86_spill] sm:$0xff] %v5370_v5  ;;  %1956 = vperm.xlu1 %4358, %v4872_v17  }
 0x218   : > { %v5375_v49 = vpop.permute.xlu1 %1163  ;;  %v5397_v57 = vpop.permute.xlu0 %1320 }
 0x219   : > { %7606 = vst [vmem:[#allocation88_spill] sm:$0xff] %v5375_v49  ;;  %1964 = vperm.xlu1 %4358, %v4942_v31   ;;  %7614 = vst [vmem:[#allocation96_spill] sm:$0xff] %v5397_v57 }
 0x21d   : > { %1972 = vperm.xlu1 %4358, %v4843_v63   ;;  %v5381_v12 = vpop.permute.xlu1 %1308 }
 0x21e   : > { %7608 = vst [vmem:[#allocation90_spill] sm:$0xff] %v5381_v12 }
 0x221   : > { %1980 = vperm.xlu1 %4358, %v4848_v6  }
 0x222   : > { %v5386_v47 = vpop.permute.xlu1 %1444 }
 0x223   : > { %7610 = vst [vmem:[#allocation92_spill] sm:$0xff] %v5386_v47  ;;  %v5402_v47 = vpop.permute.xlu0 %1456 }
 0x224   : > { %7616 = vst [vmem:[#allocation98_spill] sm:$0xff] %v5402_v47 }
 0x225   : > { %1988 = vperm.xlu1 %4358, %v4853_v9  }
 0x227   : > { %v5389_v38 = vpop.permute.xlu1 %1580 }
 0x228   : > { %7611 = vst [vmem:[#allocation93_spill] sm:$0xff] %v5389_v38 }
 0x229   : > { %1996 = vperm.xlu1 %4358, %v4865_v16  }
 0x22c   : > { %v5394_v10 = vpop.permute.xlu1 %1716 }
 0x22d   : > { %7613 = vst [vmem:[#allocation95_spill] sm:$0xff] %v5394_v10  ;;  %2004 = vperm.xlu1 %4358, %v5282_v51   ;;  %v5409_v10 = vpop.permute.xlu0 %1592 }
 0x22e   : > { %7617 = vst [vmem:[#allocation99_spill] sm:$0xff] %v5409_v10 }
 0x231   : > { %4365 = vset.pattern.permute.xlu1 %v4515_v3  ;;  %v5399_v12 = vpop.permute.xlu1 %1158 }
 0x232   : > { %7615 = vst [vmem:[#allocation97_spill] sm:$0xff] %v5399_v12  ;;  %2080 = vperm.xlu1 %4365, %v4828_v58  }
 0x234   : > { %4364 = vset.pattern.permute.xlu0 %v4514_v8  ;;  %v5418_v8 = vpop.permute.xlu0 %1728 }
 0x235   : > { %v5404_v38 = vpop.permute.xlu1 %1173  ;;  %1948 = vperm.xlu0 %4364, %v4823_v55   ;;  %7619 = vst [vmem:[#allocation101_spill] sm:$0xff] %v5418_v8 }
 0x236   : > { %2088 = vperm.xlu1 %4365, %v4909_v26  }
 0x238   : > { %v5425_v41 = vpop.permute.xlu0 %1864 }
 0x239   : > { %1960 = vperm.xlu0 %4364, %v4862_v13   ;;  %7621 = vst [vmem:[#allocation103_spill] sm:$0xff] %v5425_v41 }
 0x23a   : > { %2092 = vperm.xlu1 %4365, %v4872_v17   ;;  %v5412_v49 = vpop.permute.xlu1 %1316 }
 0x23d   : > { %1968 = vperm.xlu0 %4364, %v4893_v22  }
 0x23e   : > { %2100 = vperm.xlu1 %4365, %v4942_v31  }
 0x23f   : > { %v5416_v48 = vpop.permute.xlu1 %1452 }
 0x240   : > { %7618 = vst [vmem:[#allocation100_spill] sm:$0xff] %v5416_v48 }
 0x241   : > { %1976 = vperm.xlu0 %4364, %v4922_v28  }
 0x242   : > { %2108 = vperm.xlu1 %4365, %v4843_v63  }
 0x244   : > { %v5422_v59 = vpop.permute.xlu1 %1588 }
 0x245   : > { %7620 = vst [vmem:[#allocation102_spill] sm:$0xff] %v5422_v59  ;;  %1984 = vperm.xlu0 %4364, %v4952_v33  }
 0x246   : > { %2116 = vperm.xlu1 %4365, %v4848_v6  }
 0x249   : > { %v5428_v37 = vpop.permute.xlu1 %1724  ;;  %1992 = vperm.xlu0 %4364, %v4985_v43  }
 0x24a   : > { %7622 = vst [vmem:[#allocation104_spill] sm:$0xff] %v5428_v37  ;;  %2124 = vperm.xlu1 %4365, %v4853_v9  }
 0x24b   : > { %v5432_v54 = vpop.trf.xlu0 }
 0x24c   : > { %7623 = vst [vmem:[#allocation105_spill] sm:$0xff] %v5432_v54 }
 0x24d   : > { %2000 = vperm.xlu0 %4364, %v5134_v7  }
 0x24e   : > { %2132 = vperm.xlu1 %4365, %v4865_v16   ;;  %v5436_v12 = vpop.permute.xlu1 %1183 }
 0x24f   : > { %v5438_v1 = vpop.trf.xlu0 }
 0x250   : > { %7624 = vst [vmem:[#allocation106_spill] sm:$0xff] %v5438_v1 }
 0x251   : > { %2044 = vperm.xlu0 %4364, %v4626_v14  }
 0x252   : > { %2140 = vperm.xlu1 %4365, %v5282_v51  }
 0x253   : > { %v5442_v15 = vpop.permute.xlu1 %1324  ;;  %v906_v44 = vpop.trf.xlu0 }
 0x254   : > { %v1069_v39 = vmul.f32 %v4890_v20, %v906_v44 }
 0x255   : > { %4366 = vset.pattern.permute.xlu0 %v4515_v3 }
 0x256   : > { %4367 = vset.pattern.permute.xlu1 %v4516_v50  ;;  %2084 = vperm.xlu0 %4366, %v4823_v55  }
 0x257   : > { %2216 = vperm.xlu1 %4367, %v4828_v58   ;;  %v907_v53 = vpop.trf.xlu0 }
 0x258   : > { %v5446_v5 = vpop.permute.xlu1 %1460 }
 0x25a   : > { %2096 = vperm.xlu0 %4366, %v4862_v13  }
 0x25b   : > { %2224 = vperm.xlu1 %4367, %v4909_v26   ;;  %v908_v21 = vpop.trf.xlu0 }
 0x25d   : > { %v5450_v41 = vpop.permute.xlu1 %1596 }
 0x25e   : > { %2104 = vperm.xlu0 %4366, %v4893_v22  }
 0x25f   : > { %2228 = vperm.xlu1 %4367, %v4872_v17   ;;  %v909_v3 = vpop.trf.xlu0 }
 0x260   : > { %v1072_v44 = vmul.f32 %v4915_v27, %v909_v3 }
 0x262   : > { %v5454_v25 = vpop.permute.xlu1 %1732  ;;  %2112 = vperm.xlu0 %4366, %v4922_v28  }
 0x263   : > { %2236 = vperm.xlu1 %4367, %v4942_v31   ;;  %v910_v62 = vpop.trf.xlu0 }
 0x264   : > { %v1073_v59 = vmul.f32 %v4926_v29, %v910_v62 }
 0x266   : > { %2120 = vperm.xlu0 %4366, %v4952_v33  }
 0x267   : > { %2244 = vperm.xlu1 %4367, %v4843_v63   ;;  %v5460_v8 = vpop.permute.xlu1 %1816  ;;  %v911_v45 = vpop.trf.xlu0 }
 0x268   : > { %7625 = vst [vmem:[#allocation107_spill] sm:$0xff] %v5460_v8 }
 0x26a   : > { %2128 = vperm.xlu0 %4366, %v4985_v43  }
 0x26b   : > { %2252 = vperm.xlu1 %4367, %v4848_v6   ;;  %v5464_v10 = vpop.permute.xlu1 %1820  ;;  %v912_v11 = vpop.trf.xlu0 }
 0x26c   : > { %7626 = vst [vmem:[#allocation108_spill] sm:$0xff] %v5464_v10  ;;  %v1068_v10 = vmul.f32 %v4882_v19, %v5438_v1  ;;  %v1071_v19 = vmul.f32 %v4905_v24, %v908_v21  ;;  %v1074_v24 = vmul.f32 %v4934_v30, %v911_v45 }
 0x26e   : > { %2136 = vperm.xlu0 %4366, %v5134_v7  }
 0x26f   : > { %2260 = vperm.xlu1 %4367, %v4853_v9   ;;  %v5468_v47 = vpop.permute.xlu1 %1828  ;;  %v913_v37 = vpop.trf.xlu0 }
 0x270   : > { %7627 = vst [vmem:[#allocation109_spill] sm:$0xff] %v5468_v47  ;;  %v1067_v47 = vmul.f32 %v4874_v18, %v5432_v54 }
 0x272   : > { %2180 = vperm.xlu0 %4366, %v4626_v14  }
 0x273   : > { %2268 = vperm.xlu1 %4367, %v4865_v16   ;;  %v5472_v8 = vpop.permute.xlu1 %1836  ;;  %v914_v61 = vpop.trf.xlu0 }
 0x274   : > { %7628 = vst [vmem:[#allocation110_spill] sm:$0xff] %v5472_v8 }
 0x276   : > { %4368 = vset.pattern.permute.xlu0 %v4516_v50  ;;  %v1083_v50 = vadd.f32 %v1068_v10, %v1067_v47  ;;  %v1075_v47 = vmul.f32 %v4944_v32, %v912_v11 }
 0x277   : > { %2276 = vperm.xlu1 %4367, %v5282_v51   ;;  %v5475_v57 = vpop.permute.xlu1 %1844  ;;  %2220 = vperm.xlu0 %4368, %v4823_v55   ;;  %v915_v60 = vpop.trf.xlu0 }
 0x278   : > { %7629 = vst [vmem:[#allocation111_spill] sm:$0xff] %v5475_v57  ;;  %v1070_v57 = vmul.f32 %v4899_v23, %v907_v53  ;;  %v1084_v40 = vadd.f32 %v1083_v50, %v1069_v39  ;;  %v1076_v39 = vmul.f32 %v4954_v34, %v913_v37  ;;  %v1078_v11 = vmul.f32 %v4968_v36, %v915_v60 }
 0x27a   : > { %v1085_v20 = vadd.f32 %v1084_v40, %v1070_v57  ;;  %v1077_v40 = vmul.f32 %v4960_v35, %v914_v61 }
 0x27b   : > { %4369 = vset.pattern.permute.xlu1 %v4517_v0  ;;  %v5483_v8 = vpop.permute.xlu1 %1852  ;;  %2232 = vperm.xlu0 %4368, %v4862_v13   ;;  %v916_v18 = vpop.trf.xlu0 }
 0x27c   : > { %7630 = vst [vmem:[#allocation112_spill] sm:$0xff] %v5483_v8  ;;  %2352 = vperm.xlu1 %4369, %v4828_v58   ;;  %v1086_v8 = vadd.f32 %v1085_v20, %v1071_v19  ;;  %v1079_v57 = vmul.f32 %v4982_v42, %v916_v18  ;;  %v7437_v18 = vmov 10  }
 0x27e   : > { %v1087_v23 = vadd.f32 %v1086_v8, %v1072_v44 }
 0x27f   : > { %v5489_v1 = vpop.permute.xlu1 %1860  ;;  %2240 = vperm.xlu0 %4368, %v4893_v22   ;;  %v917_v21 = vpop.trf.xlu0 }
 0x280   : > { %2360 = vperm.xlu1 %4369, %v4909_v26   ;;  %v1088_v10 = vadd.f32 %v1087_v23, %v1073_v59  ;;  %v1080_v37 = vmul.f32 %v4997_v46, %v917_v21  ;;  %v7433_v23 = vsub.s32 1, %v4595_v2  ;;  %v5545_v21 = vrot.slane %v5432_v54, %v4606_v4  ;;  %v7664_v4 = vld [vmem:[#allocation98_spill] sm:$0xff] }
 0x282   : > { %v1089_v29 = vadd.f32 %v1088_v10, %v1074_v24  ;;  %v7432_v24 = vsub.s32 2, %v4595_v2  ;;  %7637 = vst [vmem:[#allocation119_spill] sm:$0xff] %v5545_v21 }
 0x283   : > { %v5495_v48 = vpop.permute.xlu1 %1868  ;;  %2248 = vperm.xlu0 %4368, %v4922_v28   ;;  %v918_v53 = vpop.trf.xlu0 }
 0x284   : > { %2364 = vperm.xlu1 %4369, %v4872_v17   ;;  %v1090_v62 = vadd.f32 %v1089_v29, %v1075_v47  ;;  %v1081_v8 = vmul.f32 %v5008_v52, %v918_v53  ;;  %v7431_v47 = vsub.s32 3, %v4595_v2  ;;  %v1205_v53 = vadd.f32 %v5545_v21, %v5436_v12 }
 0x286   : > { %v1091_v32 = vadd.f32 %v1090_v62, %v1076_v39  ;;  %v7430_v39 = vsub.s32 4, %v4595_v2  ;;  %v5556_v62 = vrot.slane %v5432_v54, %v7433_v23 }
 0x287   : > { %2256 = vperm.xlu0 %4368, %v4952_v33   ;;  %v919_v61 = vpop.trf.xlu0 }
 0x288   : > { %2372 = vperm.xlu1 %4369, %v4942_v31   ;;  %v5503_v27 = vpop.permute.xlu1 %1944  ;;  %v1092_v45 = vadd.f32 %v1091_v32, %v1077_v40  ;;  %v1082_v60 = vmul.f32 %v5021_v56, %v919_v61  ;;  %7638 = vst [vmem:[#allocation120_spill] sm:$0xff] %v5556_v62  ;;  %v5561_v40 = vrot.slane %v5432_v54, %v7432_v24 }
 0x289   : > { %7631 = vst [vmem:[#allocation113_spill] sm:$0xff] %v5503_v27  ;;  %v5569_v32 = vrot.slane %v5432_v54, %v7431_v47 }
 0x28a   : > { %v1093_v35 = vadd.f32 %v1092_v45, %v1078_v11  ;;  %7639 = vst [vmem:[#allocation121_spill] sm:$0xff] %v5561_v40  ;;  %v1346_v11 = vadd.f32 %v5556_v62, %v5442_v15  ;;  %v1482_v12 = vadd.f32 %v5561_v40, %v5446_v5  ;;  %v7439_v15 = vsub.s32 6, %v4595_v2 }
 0x28b   : > { %2264 = vperm.xlu0 %4368, %v4985_v43   ;;  %v1618_v61 = vadd.f32 %v5569_v32, %v5450_v41  ;;  %v1203_v41 = vadd.f32 %v5545_v21, %v5404_v38 }
 0x28c   : > { %2380 = vperm.xlu1 %4369, %v4843_v63   ;;  %v5509_v30 = vpop.permute.xlu1 %1952  ;;  %v1094_v59 = vadd.f32 %v1093_v35, %v1079_v57  ;;  %v5579_v35 = vrot.slane %v5432_v54, %v7430_v39  ;;  %v7645_v39 = vld [vmem:[#allocation75_spill] sm:$0xff] }
 0x28d   : > { %7632 = vst [vmem:[#allocation114_spill] sm:$0xff] %v5509_v30  ;;  %v1196_v38 = vadd.f32 %v5545_v21, %v7645_v39 }
 0x28e   : > { %v1095_v42 = vadd.f32 %v1094_v59, %v1080_v37  ;;  %v7434_v37 = vsub.s32 5, %v4595_v2  ;;  %v1221_v59 = vand.u32 2147483647, %v1205_v53  ;;  %v7644_v53 = vld [vmem:[#allocation102_spill] sm:$0xff] }
 0x28f   : > { %2272 = vperm.xlu0 %4368, %v5134_v7  }
 0x290   : > { %2388 = vperm.xlu1 %4369, %v4848_v6   ;;  %v5515_v34 = vpop.permute.xlu1 %1956  ;;  %v1096_v3 = vadd.f32 %v1095_v42, %v1081_v8  ;;  %v1754_v8 = vadd.f32 %v5579_v35, %v5454_v25  ;;  %v1344_v25 = vadd.f32 %v5556_v62, %v5412_v49  ;;  %v5616_v49 = vrot.slane %v5432_v54, %v7439_v15 }
 0x291   : > { %7633 = vst [vmem:[#allocation115_spill] sm:$0xff] %v5515_v34  ;;  %v7656_v34 = vld [vmem:[#allocation40_spill] sm:$0xff] }
 0x292   : > { %v1097_v46 = vadd.f32 %v1096_v3, %v1082_v60  ;;  %v1362_v60 = vand.u32 2147483647, %v1346_v11  ;;  %v5607_v11 = vrot.slane %v5432_v54, %v7434_v37  ;;  %v7649_v37 = vld [vmem:[#allocation66_spill] sm:$0xff] }
 0x293   : > { %2316 = vperm.xlu0 %4368, %v4626_v14   ;;  %v7666_v54 = vld [vmem:[#allocation70_spill] sm:$0xff] }
 0x294   : > { %2396 = vperm.xlu1 %4369, %v4853_v9   ;;  %v5521_v36 = vpop.permute.xlu1 %1964  ;;  %v1098_v19 = vrot.slane %v1097_v46, 4 }
 0x295   : > { %7634 = vst [vmem:[#allocation116_spill] sm:$0xff] %v5521_v36  ;;  %v7655_v36 = vld [vmem:[#allocation17_spill] sm:$0xff] }
 0x297   : > { %4370 = vset.pattern.permute.xlu0 %v4517_v0  ;;  %v1099_v0 = vadd.f32 %v1098_v19, %v1097_v46  ;;  %v7435_v46 = vmov 11   ;;  %v1498_v19 = vand.u32 2147483647, %v1482_v12  ;;  %v7646_v12 = vld [vmem:[#allocation94_spill] sm:$0xff] }
 0x298   : > { %2404 = vperm.xlu1 %4369, %v4865_v16   ;;  %v5525_v50 = vpop.permute.xlu1 %1972  ;;  %2356 = vperm.xlu0 %4370, %v4823_v55   ;;  %v1204_v47 = vadd.f32 %v5545_v21, %v7646_v12 }
 0x299   : > { %v1100_v44 = vrot.slane %v1099_v0, 2 }
 0x29a   : > { %v1220_v30 = vand.u32 2147483647, %v1204_v47 }
 0x29b   : > { %v1101_v29 = vadd.f32 %v1100_v44, %v1099_v0  ;;  %v7643_v0 = vld [vmem:[#allocation100_spill] sm:$0xff] }
 0x29c   : > { %2412 = vperm.xlu1 %4369, %v5282_v51   ;;  %v5529_v52 = vpop.permute.xlu1 %1980  ;;  %2368 = vperm.xlu0 %4370, %v4862_v13   ;;  %v1480_v44 = vadd.f32 %v5561_v40, %v7643_v0  ;;  %v7647_v0 = vld [vmem:[#allocation91_spill] sm:$0xff] }
 0x29d   : > { %7635 = vst [vmem:[#allocation117_spill] sm:$0xff] %v5529_v52  ;;  %v1102_v45 = vrot.slane %v1101_v29, 1  ;;  %v1246_v24 = vmul.f32 %v7647_v0, %v1221_v59  ;;  %v7654_v59 = vld [vmem:[#allocation15_spill] sm:$0xff] }
 0x29f   : > { %v1103_v3 = vadd.f32 %v1102_v45, %v1101_v29  ;;  %v1616_v29 = vadd.f32 %v5569_v32, %v7644_v53  ;;  %v1634_v45 = vand.u32 2147483647, %v1618_v61  ;;  %v1770_v53 = vand.u32 2147483647, %v1754_v8 }
 0x2a0   : > { %4371 = vset.pattern.permute.xlu1 %v7437_v18  ;;  %v5533_v56 = vpop.permute.xlu1 %1988  ;;  %2376 = vperm.xlu0 %4370, %v4893_v22   ;;  %v1197_v61 = vadd.f32 %v5545_v21, %v7649_v37  ;;  %v7651_v18 = vld [vmem:[#allocation110_spill] sm:$0xff]  ;;  %v1518_v8 = vmul.f32 %v7654_v59, %v1498_v19  ;;  %v7659_v19 = vld [vmem:[#allocation96_spill] sm:$0xff] }
 0x2a1   : > { %7636 = vst [vmem:[#allocation118_spill] sm:$0xff] %v5533_v56  ;;  %2488 = vperm.xlu1 %4371, %v4828_v58   ;;  %v5627_v12 = vadd.f32 %v5607_v11, %v7651_v18  ;;  %v1496_v56 = vand.u32 2147483647, %v1480_v44  ;;  %v1632_v52 = vand.u32 2147483647, %v1616_v29  ;;  %v5636_v37 = vmul.f32 %v7655_v36, %v1634_v45  ;;  %v7660_v29 = vld [vmem:[#allocation68_spill] sm:$0xff] }
 0x2a2   : > { %v1337_v18 = vadd.f32 %v5556_v62, %v7656_v34  ;;  %v1213_v44 = vand.u32 2147483647, %v1197_v61  ;;  %v1338_v45 = vadd.f32 %v5556_v62, %v7660_v29 }
 0x2a3   : > { %v5662_v29 = vmul.f32 %v7655_v36, %v1632_v52  ;;  %v1474_v52 = vadd.f32 %v5561_v40, %v7666_v54 }
 0x2a4   : > { %v5537_v20 = vpop.permute.xlu1 %1996  ;;  %2384 = vperm.xlu0 %4370, %v4922_v28  }
 0x2a5   : > { %2496 = vperm.xlu1 %4371, %v4909_v26  }
 0x2a8   : > { %v5547_v10 = vpop.permute.xlu1 %2004  ;;  %2392 = vperm.xlu0 %4370, %v4952_v33  }
 0x2a9   : > { %2500 = vperm.xlu1 %4371, %v4872_v17  }
 0x2ac   : > { %2400 = vperm.xlu0 %4370, %v4985_v43  }
 0x2ad   : > { %2520 = vperm.xlu1 %4371, %v4922_v28   ;;  %v5574_v57 = vpop.permute.xlu1 %2080 }
 0x2ae   : > { %7640 = vst [vmem:[#allocation122_spill] sm:$0xff] %v5574_v57  ;;  %v1360_v57 = vand.u32 2147483647, %v1344_v25  ;;  %v1345_v25 = vadd.f32 %v5556_v62, %v7659_v19  ;;  %v1516_v19 = vmul.f32 %v7654_v59, %v1496_v56  ;;  %v1354_v56 = vand.u32 2147483647, %v1338_v45  ;;  %v7668_v45 = vld [vmem:[#allocation44_spill] sm:$0xff] }
 0x2b0   : > { %2408 = vperm.xlu0 %4370, %v5134_v7   ;;  %v5590_v42 = vpop.permute.xlu0 %1948  ;;  %v1361_v22 = vand.u32 2147483647, %v1345_v25 }
 0x2b1   : > { %7641 = vst [vmem:[#allocation123_spill] sm:$0xff] %v5590_v42  ;;  %4373 = vset.pattern.permute.xlu1 %v7435_v46  ;;  %v5593_v5 = vpop.permute.xlu1 %2088  ;;  %v7650_v46 = vld [vmem:[#allocation19_spill] sm:$0xff]  ;;  %v1219_v42 = vand.u32 2147483647, %v1203_v41 }
 0x2b2   : > { %7642 = vst [vmem:[#allocation124_spill] sm:$0xff] %v5593_v5  ;;  %2624 = vperm.xlu1 %4373, %v4828_v58   ;;  %v1382_v39 = vmul.f32 %v7650_v46, %v1362_v60  ;;  %v5629_v5 = vmul.f32 0.6, %v1103_v3  ;;  %v1212_v60 = vand.u32 2147483647, %v1196_v38  ;;  %v7657_v3 = vld [vmem:[#allocation18_spill] sm:$0xff]  ;;  %v1380_v61 = vmul.f32 %v7650_v46, %v1360_v57 }
 0x2b3   : > { %v5641_v27 = vmul.f32 %v7657_v3, %v1770_v53  ;;  %v1244_v47 = vmul.f32 %v7647_v0, %v1219_v42  ;;  %v7662_v53 = vld [vmem:[#allocation104_spill] sm:$0xff]  ;;  %v7663_v38 = vld [vmem:[#allocation42_spill] sm:$0xff]  ;;  %v1245_v42 = vmul.f32 %v7647_v0, %v1220_v30  ;;  %v1238_v57 = vmul.f32 %v7647_v0, %v1213_v44 }
 0x2b4   : > { %2452 = vperm.xlu0 %4370, %v4626_v14   ;;  %v5620_v23 = vpop.permute.xlu0 %1960  ;;  %7652 = vst [vmem:[#allocation102_spill] sm:$0xff] %v5629_v5  ;;  %v1262_v34 = vadd.f32 %v1246_v24, %v5629_v5  ;;  %v1752_v21 = vadd.f32 %v5579_v35, %v7662_v53  ;;  %v1237_v62 = vmul.f32 %v7647_v0, %v1212_v60  ;;  %v1353_v24 = vand.u32 2147483647, %v1337_v18  ;;  %v7671_v0 = vld [vmem:[#allocation72_spill] sm:$0xff] }
 0x2b5   : > { %7648 = vst [vmem:[#allocation100_spill] sm:$0xff] %v5620_v23  ;;  %v5631_v15 = vpop.permute.xlu1 %2092  ;;  %v1481_v53 = vadd.f32 %v5561_v40, %v7664_v4  ;;  %v1260_v18 = vadd.f32 %v1244_v47, %v5629_v5  ;;  %v5682_v4 = vadd.f32 %v5607_v11, %v5489_v1  ;;  %v1261_v44 = vadd.f32 %v1245_v42, %v5629_v5 }
 0x2b6   : > { %7653 = vst [vmem:[#allocation75_spill] sm:$0xff] %v5631_v15  ;;  %2628 = vperm.xlu1 %4373, %v4823_v55   ;;  %v7658_v15 = vmov 10   ;;  %v1398_v60 = vadd.f32 %v1382_v39, %v1262_v34  ;;  %v1768_v30 = vand.u32 2147483647, %v1752_v21  ;;  %v1254_v54 = vadd.f32 %v1238_v57, %v5629_v5 }
 0x2b7   : > { %v1373_v39 = vmul.f32 %v7650_v46, %v1353_v24  ;;  %v1609_v21 = vadd.f32 %v5569_v32, %v7668_v45  ;;  %v1497_v34 = vand.u32 2147483647, %v1481_v53  ;;  %v1490_v42 = vand.u32 2147483647, %v1474_v52 }
 0x2b8   : > { %4372 = vset.pattern.permute.xlu0 %v7658_v15  ;;  %v5644_v41 = vpop.permute.xlu0 %1968  ;;  %v1610_v57 = vadd.f32 %v5569_v32, %v7671_v0  ;;  %v1534_v24 = vadd.f32 %v1518_v8, %v1398_v60  ;;  %v1396_v45 = vadd.f32 %v1380_v61, %v1260_v18  ;;  %v1788_v53 = vmul.f32 %v7657_v3, %v1768_v30  ;;  %v7674_v8 = vld [vmem:[#allocation101_spill] sm:$0xff] }
 0x2b9   : > { %v5651_v23 = vpop.permute.xlu1 %2100  ;;  %2492 = vperm.xlu0 %4372, %v4823_v55   ;;  %v1890_v52 = vadd.f32 %v5607_v11, %v5495_v48  ;;  %v7458_v0 = vmov 12   ;;  %v1753_v61 = vadd.f32 %v5579_v35, %v7674_v8  ;;  %v1517_v18 = vmul.f32 %v7654_v59, %v1497_v34 }
 0x2ba   : > { %7661 = vst [vmem:[#allocation94_spill] sm:$0xff] %v5651_v23  ;;  %2660 = vperm.xlu1 %4373, %v4848_v6   ;;  %v1473_v23 = vadd.f32 %v5561_v40, %v7663_v38  ;;  %v1253_v38 = vadd.f32 %v1237_v62, %v5629_v5  ;;  %v7669_v62 = vld [vmem:[#allocation99_spill] sm:$0xff]  ;;  %v1626_v30 = vand.u32 2147483647, %v1610_v57 }
 0x2bb   : > { %v1617_v47 = vadd.f32 %v5569_v32, %v7669_v62  ;;  %v1906_v57 = vand.u32 2147483647, %v1890_v52 }
 0x2bc   : > { %v5670_v16 = vpop.permute.xlu0 %1976  ;;  %v1489_v25 = vand.u32 2147483647, %v1473_v23  ;;  %v1374_v23 = vmul.f32 %v7650_v46, %v1354_v56  ;;  %v1389_v40 = vadd.f32 %v1373_v39, %v1253_v38  ;;  %v7676_v38 = vld [vmem:[#allocation73_spill] sm:$0xff] }
 0x2bd   : > { %7665 = vst [vmem:[#allocation66_spill] sm:$0xff] %v5670_v16  ;;  %v5675_v63 = vpop.permute.xlu1 %2108  ;;  %2504 = vperm.xlu0 %4372, %v4862_v13   ;;  %v1381_v16 = vmul.f32 %v7650_v46, %v1361_v22  ;;  %v1633_v46 = vand.u32 2147483647, %v1617_v47  ;;  %v1746_v48 = vadd.f32 %v5579_v35, %v7676_v38  ;;  %v1769_v38 = vand.u32 2147483647, %v1753_v61 }
 0x2be   : > { %7667 = vst [vmem:[#allocation110_spill] sm:$0xff] %v5675_v63  ;;  %4374 = vset.pattern.permute.xlu1 %v7658_v15  ;;  %v1509_v62 = vmul.f32 %v7654_v59, %v1489_v25  ;;  %v1390_v56 = vadd.f32 %v1374_v23, %v1254_v54  ;;  %v1532_v54 = vadd.f32 %v1516_v19, %v1396_v45 }
 0x2bf   : > { %2588 = vperm.xlu1 %4374, %v4626_v14   ;;  %v1397_v63 = vadd.f32 %v1381_v16, %v1261_v44  ;;  %v1510_v16 = vmul.f32 %v7654_v59, %v1490_v42  ;;  %v1670_v44 = vadd.f32 %v5636_v37, %v1534_v24  ;;  %v2026_v37 = vadd.f32 %v5616_v49, %v5547_v10 }
 0x2c0   : > { %v5693_v1 = vpop.permute.xlu0 %1984  ;;  %v1525_v39 = vadd.f32 %v1509_v62, %v1389_v40  ;;  %v1653_v19 = vmul.f32 %v7655_v36, %v1633_v46  ;;  %v1762_v24 = vand.u32 2147483647, %v1746_v48  ;;  %v1668_v45 = vadd.f32 %v5662_v29, %v1532_v54 }
 0x2c1   : > { %7670 = vst [vmem:[#allocation15_spill] sm:$0xff] %v5693_v1  ;;  %v5699_v5 = vpop.permute.xlu1 %2116  ;;  %2524 = vperm.xlu0 %4372, %v4848_v6   ;;  %v7673_v1 = vld [vmem:[#allocation46_spill] sm:$0xff]  ;;  %v1533_v23 = vadd.f32 %v1517_v18, %v1397_v63  ;;  %v1526_v42 = vadd.f32 %v1510_v16, %v1390_v56  ;;  %v2024_v18 = vadd.f32 %v5616_v49, %v5537_v20  ;;  %v2042_v29 = vand.u32 2147483647, %v2026_v37 }
 0x2c2   : > { %7672 = vst [vmem:[#allocation17_spill] sm:$0xff] %v5699_v5  ;;  %v1745_v22 = vadd.f32 %v5579_v35, %v7673_v1  ;;  %v1625_v5 = vand.u32 2147483647, %v1609_v21  ;;  %v7678_v21 = vld [vmem:[#allocation76_spill] sm:$0xff]  ;;  %v1904_v1 = vand.u32 2147483647, %v5682_v4  ;;  %v1646_v4 = vmul.f32 %v7655_v36, %v1626_v30 }
 0x2c3   : > { %4375 = vset.pattern.permute.xlu1 %v7458_v0  ;;  %v1881_v47 = vadd.f32 %v5607_v11, %v7678_v21  ;;  %v7679_v0 = vld [vmem:[#allocation103_spill] sm:$0xff]  ;;  %v1669_v46 = vadd.f32 %v1653_v19, %v1533_v23  ;;  %v2017_v16 = vadd.f32 %v5616_v49, %v5644_v41  ;;  %v1782_v54 = vmul.f32 %v7657_v3, %v1762_v24 }
 0x2c4   : > { %2760 = vperm.xlu1 %4375, %v4828_v58   ;;  %v5712_v60 = vpop.permute.xlu0 %1992  ;;  %v1761_v34 = vand.u32 2147483647, %v1745_v22  ;;  %v1645_v8 = vmul.f32 %v7655_v36, %v1625_v5  ;;  %v1806_v5 = vadd.f32 %v5641_v27, %v1670_v44  ;;  %v1662_v52 = vadd.f32 %v1646_v4, %v1526_v42 }
 0x2c5   : > { %7675 = vst [vmem:[#allocation40_spill] sm:$0xff] %v5712_v60  ;;  %v5718_v25 = vpop.permute.xlu1 %2124  ;;  %2528 = vperm.xlu0 %4372, %v4952_v33   ;;  %v1897_v10 = vand.u32 2147483647, %v1881_v47  ;;  %v2018_v27 = vadd.f32 %v5616_v49, %v5525_v50  ;;  %v1789_v44 = vmul.f32 %v7657_v3, %v1769_v38  ;;  %v1804_v47 = vadd.f32 %v1788_v53, %v1668_v45 }
 0x2c6   : > { %7677 = vst [vmem:[#allocation18_spill] sm:$0xff] %v5718_v25  ;;  %v1889_v25 = vadd.f32 %v5607_v11, %v7679_v0  ;;  %v1661_v62 = vadd.f32 %v1645_v8, %v1525_v39  ;;  %v1781_v56 = vmul.f32 %v7657_v3, %v1761_v34  ;;  %v7680_v0 = vld [vmem:[#allocation85_spill] sm:$0xff]  ;;  %v7681_v39 = vmov 12  }
 0x2c7   : > { %v1926_v61 = vmul.f32 %v7680_v0, %v1906_v57  ;;  %v1798_v23 = vadd.f32 %v1782_v54, %v1662_v52  ;;  %v1924_v42 = vmul.f32 %v7680_v0, %v1904_v1  ;;  %v2040_v57 = vand.u32 2147483647, %v2024_v18 }
 0x2c8   : > { %4376 = vset.pattern.permute.xlu1 %v7658_v15  ;;  %v2001_v40 = vpop.permute.xlu0 %2000  ;;  %v1905_v30 = vand.u32 2147483647, %v1889_v25  ;;  %v1797_v34 = vadd.f32 %v1781_v56, %v1661_v62  ;;  %v1805_v25 = vadd.f32 %v1789_v44, %v1669_v46  ;;  %v2033_v8 = vand.u32 2147483647, %v2017_v16 }
 0x2c9   : > { %2532 = vperm.xlu1 %4376, %v4853_v9   ;;  %v5734_v63 = vpop.permute.xlu1 %2132  ;;  %2536 = vperm.xlu0 %4372, %v4985_v43   ;;  %v2025_v22 = vadd.f32 %v5616_v49, %v2001_v40  ;;  %v1942_v20 = vadd.f32 %v1926_v61, %v1806_v5  ;;  %v1917_v38 = vmul.f32 %v7680_v0, %v1897_v10  ;;  %v7682_v37 = vand.u32 2147483647, %v5627_v12 }
 0x2ca   : > { %v2034_v19 = vand.u32 2147483647, %v2018_v27  ;;  %v1925_v4 = vmul.f32 %v7680_v0, %v1905_v30  ;;  %v1940_v5 = vadd.f32 %v1924_v42, %v1804_v47  ;;  %v7684_v10 = vmov 11  }
 0x2cb   : > { %v2041_v41 = vand.u32 2147483647, %v2025_v22  ;;  %v1918_v40 = vmul.f32 %v7680_v0, %v7682_v37  ;;  %v1933_v45 = vadd.f32 %v1917_v38, %v1797_v34 }
 0x2cc   : > { %v5748_v48 = vpop.permute.xlu0 %2044  ;;  %v1941_v22 = vadd.f32 %v1925_v4, %v1805_v25  ;;  %v7460_v25 = vsub.s32 7, %v4595_v2 }
 0x2cd   : > { %4377 = vset.pattern.permute.xlu1 %v7681_v39  ;;  %v2141_v21 = vpop.permute.xlu1 %2140  ;;  %2508 = vperm.xlu0 %4372, %v4942_v31   ;;  %v2062_v50 = vmul.f32 %v5748_v48, %v2042_v29  ;;  %v2060_v1 = vmul.f32 %v5748_v48, %v2040_v57  ;;  %v2053_v62 = vmul.f32 %v5748_v48, %v2033_v8  ;;  %v7692_v57 = vld [vmem:[#allocation8_spill] sm:$0xff]  ;;  %v7693_v8 = vld [vmem:[#allocation105_spill] sm:$0xff] }
 0x2ce   : > { %2764 = vperm.xlu1 %4377, %v4823_v55   ;;  %v2061_v56 = vmul.f32 %v5748_v48, %v2041_v41  ;;  %v1934_v46 = vadd.f32 %v1918_v40, %v1798_v23  ;;  %v2054_v52 = vmul.f32 %v5748_v48, %v2034_v19  ;;  %v5811_v38 = vrot.slane %v7693_v8, %v7460_v25 }
 0x2cf   : > { %v5761_v53 = vadd.f32 %v2062_v50, %v1942_v20  ;;  %v2076_v61 = vadd.f32 %v2060_v1, %v1940_v5  ;;  %v2069_v18 = vadd.f32 %v2053_v62, %v1933_v45  ;;  %v7461_v20 = vmov 13  }
 0x2d0   : > { %v2077_v16 = vadd.f32 %v2061_v56, %v1941_v22  ;;  %v5775_v30 = vadd.f32 %v2054_v52, %v1934_v46  ;;  %7694 = vst [vmem:[#allocation72_spill] sm:$0xff] %v5811_v38  ;;  %v2162_v37 = vadd.f32 %v5811_v38, %v2141_v21  ;;  %v2160_v5 = vadd.f32 %v5811_v38, %v5734_v63  ;;  %v7697_v56 = vld [vmem:[#allocation110_spill] sm:$0xff] }
 0x2d1   : > { %2548 = vperm.xlu0 %4372, %v5282_v51   ;;  %v5765_v24 = vpop.permute.xlu0 %2084  ;;  %v2154_v46 = vadd.f32 %v5811_v38, %v7697_v56 }
 0x2d2   : > { %7683 = vst [vmem:[#allocation96_spill] sm:$0xff] %v5765_v24  ;;  %4378 = vset.pattern.permute.xlu1 %v7684_v10  ;;  %v5770_v12 = vpop.permute.xlu1 %2216  ;;  %v2178_v45 = vand.u32 2147483647, %v2162_v37  ;;  %v2176_v8 = vand.u32 2147483647, %v2160_v5 }
 0x2d3   : > { %7685 = vst [vmem:[#allocation68_spill] sm:$0xff] %v5770_v12  ;;  %2632 = vperm.xlu1 %4378, %v4909_v26   ;;  %v2170_v56 = vand.u32 2147483647, %v2154_v46 }
 0x2d5   : > { %4397 = vset.pattern.permute.xlu0 %v7684_v10  ;;  %v5778_v27 = vpop.permute.xlu0 %2096 }
 0x2d6   : > { %v5780_v29 = vpop.permute.xlu1 %2224  ;;  %2656 = vperm.xlu0 %4397, %v4922_v28  }
 0x2d7   : > { %7686 = vst [vmem:[#allocation104_spill] sm:$0xff] %v5780_v29  ;;  %2724 = vperm.xlu1 %4378, %v4626_v14  }
 0x2d9   : > { %v2105_v44 = vpop.permute.xlu0 %2104 }
 0x2da   : > { %v5784_v54 = vpop.permute.xlu1 %2228  ;;  %2664 = vperm.xlu0 %4397, %v4952_v33   ;;  %v2153_v1 = vadd.f32 %v5811_v38, %v2105_v44 }
 0x2db   : > { %7687 = vst [vmem:[#allocation42_spill] sm:$0xff] %v5784_v54  ;;  %4379 = vset.pattern.permute.xlu1 %v7461_v20 }
 0x2dc   : > { %2896 = vperm.xlu1 %4379, %v4828_v58   ;;  %v2169_v63 = vand.u32 2147483647, %v2153_v1 }
 0x2dd   : > { %v5789_v47 = vpop.permute.xlu0 %2112 }
 0x2de   : > { %v5791_v34 = vpop.permute.xlu1 %2236  ;;  %2640 = vperm.xlu0 %4397, %v4862_v13  }
 0x2df   : > { %7688 = vst [vmem:[#allocation98_spill] sm:$0xff] %v5791_v34 }
 0x2e0   : > { %4380 = vset.pattern.permute.xlu1 %v7684_v10 }
 0x2e1   : > { %2636 = vperm.xlu1 %4380, %v4872_v17   ;;  %v5796_v41 = vpop.permute.xlu0 %2120 }
 0x2e2   : > { %7689 = vst [vmem:[#allocation70_spill] sm:$0xff] %v5796_v41  ;;  %v5798_v50 = vpop.permute.xlu1 %2244  ;;  %2680 = vperm.xlu0 %4397, %v5134_v7  }
 0x2e5   : > { %2668 = vperm.xlu1 %4380, %v4853_v9   ;;  %v5803_v23 = vpop.permute.xlu0 %2128 }
 0x2e6   : > { %7690 = vst [vmem:[#allocation44_spill] sm:$0xff] %v5803_v23  ;;  %v5805_v42 = vpop.permute.xlu1 %2252  ;;  %2652 = vperm.xlu0 %4397, %v7692_v57  }
 0x2e7   : > { %7691 = vst [vmem:[#allocation99_spill] sm:$0xff] %v5805_v42 }
 0x2e9   : > { %4381 = vset.pattern.permute.xlu1 %v7461_v20  ;;  %v2137_v40 = vpop.permute.xlu0 %2136 }
 0x2ea   : > { %v2161_v19 = vadd.f32 %v5811_v38, %v2137_v40  ;;  %2932 = vperm.xlu1 %4381, %v4848_v6   ;;  %v5817_v4 = vpop.permute.xlu1 %2260  ;;  %4403 = vset.pattern.permute.xlu0 %v7681_v39 }
 0x2eb   : > { %7695 = vst [vmem:[#allocation46_spill] sm:$0xff] %v5817_v4  ;;  %2792 = vperm.xlu0 %4403, %v4922_v28  }
 0x2ec   : > { %v2177_v62 = vand.u32 2147483647, %v2161_v19 }
 0x2ed   : > { %v5824_v21 = vpop.permute.xlu0 %2180 }
 0x2ee   : > { %7696 = vst [vmem:[#allocation101_spill] sm:$0xff] %v5824_v21  ;;  %4382 = vset.pattern.permute.xlu1 %v7681_v39  ;;  %v2269_v22 = vpop.permute.xlu1 %2268  ;;  %v2198_v52 = vmul.f32 %v5824_v21, %v2178_v45  ;;  %v2196_v19 = vmul.f32 %v5824_v21, %v2176_v8  ;;  %v2189_v25 = vmul.f32 %v5824_v21, %v2169_v63 }
 0x2ef   : > { %2768 = vperm.xlu1 %4382, %v4909_v26   ;;  %2796 = vperm.xlu0 %4403, %v4848_v6   ;;  %v2197_v20 = vmul.f32 %v5824_v21, %v2177_v62  ;;  %v2190_v1 = vmul.f32 %v5824_v21, %v2170_v56 }
 0x2f0   : > { %v2214_v44 = vadd.f32 %v2198_v52, %v5761_v53  ;;  %v2212_v4 = vadd.f32 %v2196_v19, %v2076_v61  ;;  %v2205_v45 = vadd.f32 %v2189_v25, %v2069_v18  ;;  %v7463_v52 = vmov 14  }
 0x2f1   : > { %v2213_v5 = vadd.f32 %v2197_v20, %v2077_v16  ;;  %v2206_v62 = vadd.f32 %v2190_v1, %v5775_v30  ;;  %v7703_v16 = vld [vmem:[#allocation12_spill] sm:$0xff]  ;;  %v7704_v20 = vld [vmem:[#allocation10_spill] sm:$0xff]  ;;  %v7707_v19 = vmov 13  }
 0x2f2   : > { %v2277_v37 = vpop.permute.xlu1 %2276  ;;  %v5833_v40 = vpop.permute.xlu0 %2220 }
 0x2f3   : > { %7698 = vst [vmem:[#allocation73_spill] sm:$0xff] %v5833_v40  ;;  %2800 = vperm.xlu1 %4382, %v4952_v33   ;;  %2860 = vperm.xlu0 %4403, %v4626_v14  }
 0x2f6   : > { %v5841_v53 = vpop.permute.xlu0 %2232 }
 0x2f7   : > { %7699 = vst [vmem:[#allocation76_spill] sm:$0xff] %v5841_v53  ;;  %4383 = vset.pattern.permute.xlu1 %v7463_v52  ;;  %v5844_v8 = vpop.permute.xlu1 %2352  ;;  %2804 = vperm.xlu0 %4403, %v4853_v9   ;;  %v7709_v52 = vld [vmem:[#allocation6_spill] sm:$0xff] }
 0x2f8   : > { %7700 = vst [vmem:[#allocation103_spill] sm:$0xff] %v5844_v8  ;;  %3032 = vperm.xlu1 %4383, %v4828_v58   ;;  %v7712_v8 = vmov 14  }
 0x2fa   : > { %v2241_v46 = vpop.permute.xlu0 %2240 }
 0x2fb   : > { %v5849_v63 = vpop.permute.xlu1 %2360  ;;  %2776 = vperm.xlu0 %4403, %v4862_v13  }
 0x2fc   : > { %7701 = vst [vmem:[#allocation85_spill] sm:$0xff] %v5849_v63  ;;  %3064 = vperm.xlu1 %4383, %v4922_v28  }
 0x2fe   : > { %v5853_v61 = vpop.permute.xlu0 %2248 }
 0x2ff   : > { %v5855_v18 = vpop.permute.xlu1 %2364  ;;  %2784 = vperm.xlu0 %4403, %v7703_v16  }
 0x300   : > { %7702 = vst [vmem:[#allocation105_spill] sm:$0xff] %v5855_v18  ;;  %4384 = vset.pattern.permute.xlu1 %v7658_v15  ;;  %v7710_v18 = vld [vmem:[#allocation106_spill] sm:$0xff] }
 0x301   : > { %2540 = vperm.xlu1 %4384, %v7704_v20   ;;  %v5874_v63 = vrot.slane %v7710_v18, %v7709_v52 }
 0x302   : > { %v5860_v30 = vpop.permute.xlu0 %2256 }
 0x303   : > { %7705 = vst [vmem:[#allocation110_spill] sm:$0xff] %v5860_v30  ;;  %v5862_v25 = vpop.permute.xlu1 %2372  ;;  %4407 = vset.pattern.permute.xlu0 %v7707_v19  ;;  %7711 = vst [vmem:[#allocation6_spill] sm:$0xff] %v5874_v63  ;;  %v2289_v52 = vadd.f32 %v5874_v63, %v2241_v46  ;;  %v2290_v34 = vadd.f32 %v5874_v63, %v5798_v50 }
 0x304   : > { %7706 = vst [vmem:[#allocation125_spill] sm:$0xff] %v5862_v25  ;;  %2928 = vperm.xlu0 %4407, %v4922_v28   ;;  %v2298_v25 = vadd.f32 %v5874_v63, %v2277_v37 }
 0x305   : > { %4385 = vset.pattern.permute.xlu1 %v7681_v39  ;;  %v2305_v23 = vand.u32 2147483647, %v2289_v52 }
 0x306   : > { %2772 = vperm.xlu1 %4385, %v4872_v17   ;;  %v5868_v56 = vpop.permute.xlu0 %2264  ;;  %v2314_v54 = vand.u32 2147483647, %v2298_v25 }
 0x307   : > { %7708 = vst [vmem:[#allocation126_spill] sm:$0xff] %v5868_v56  ;;  %v5870_v1 = vpop.permute.xlu1 %2380  ;;  %v2296_v56 = vadd.f32 %v5874_v63, %v2269_v22  ;;  %v2306_v22 = vand.u32 2147483647, %v2290_v34 }
 0x308   : > { %2900 = vperm.xlu0 %4407, %v4823_v55  }
 0x309   : > { %v2312_v12 = vand.u32 2147483647, %v2296_v56 }
 0x30a   : > { %4386 = vset.pattern.permute.xlu1 %v7712_v8  ;;  %v2273_v30 = vpop.permute.xlu0 %2272 }
 0x30b   : > { %v2297_v40 = vadd.f32 %v5874_v63, %v2273_v30  ;;  %3036 = vperm.xlu1 %4386, %v4823_v55   ;;  %v5881_v42 = vpop.permute.xlu1 %2388 }
 0x30c   : > { %7713 = vst [vmem:[#allocation106_spill] sm:$0xff] %v5881_v42  ;;  %2936 = vperm.xlu0 %4407, %v4952_v33  }
 0x30d   : > { %v2313_v29 = vand.u32 2147483647, %v2297_v40 }
 0x30e   : > { %v5888_v37 = vpop.permute.xlu0 %2316 }
 0x30f   : > { %7714 = vst [vmem:[#allocation127_spill] sm:$0xff] %v5888_v37  ;;  %3068 = vperm.xlu1 %4386, %v4848_v6   ;;  %v5891_v30 = vpop.permute.xlu1 %2396  ;;  %v2334_v42 = vmul.f32 %v5888_v37, %v2314_v54  ;;  %v2332_v25 = vmul.f32 %v5888_v37, %v2312_v12  ;;  %v2325_v40 = vmul.f32 %v5888_v37, %v2305_v23 }
 0x310   : > { %7715 = vst [vmem:[#allocation128_spill] sm:$0xff] %v5891_v30  ;;  %2908 = vperm.xlu0 %4407, %v4872_v17   ;;  %v2333_v24 = vmul.f32 %v5888_v37, %v2313_v29  ;;  %v2326_v54 = vmul.f32 %v5888_v37, %v2306_v22 }
 0x311   : > { %v2350_v41 = vadd.f32 %v2334_v42, %v2214_v44  ;;  %v2348_v56 = vadd.f32 %v2332_v25, %v2212_v4  ;;  %v2341_v34 = vadd.f32 %v2325_v40, %v2205_v45  ;;  %v7465_v4 = vmov 15  }
 0x312   : > { %v2349_v42 = vadd.f32 %v2333_v24, %v2213_v5  ;;  %v2342_v44 = vadd.f32 %v2326_v54, %v2206_v62  ;;  %v7723_v25 = vsub.s32 1, %v4595_v2 }
 0x313   : > { %4387 = vset.pattern.permute.xlu1 %v7684_v10  ;;  %v2405_v46 = vpop.permute.xlu1 %2404  ;;  %v5896_v50 = vpop.permute.xlu0 %2356 }
 0x314   : > { %7716 = vst [vmem:[#allocation129_spill] sm:$0xff] %v5896_v50  ;;  %2672 = vperm.xlu1 %4387, %v4985_v43   ;;  %2948 = vperm.xlu0 %4407, %v7704_v20   ;;  %v5935_v40 = vrot.slane %v7710_v18, %v7723_v25 }
 0x316   : > { %7724 = vst [vmem:[#allocation136_spill] sm:$0xff] %v5935_v40  ;;  %v2426_v25 = vadd.f32 %v5935_v40, %v5870_v1  ;;  %v7728_v1 = vmov 15  }
 0x317   : > { %v2413_v52 = vpop.permute.xlu1 %2412  ;;  %v5904_v30 = vpop.permute.xlu0 %2368 }
 0x318   : > { %7717 = vst [vmem:[#allocation130_spill] sm:$0xff] %v5904_v30  ;;  %4388 = vset.pattern.permute.xlu1 %v7707_v19  ;;  %2920 = vperm.xlu0 %4407, %v7703_v16  }
 0x319   : > { %2904 = vperm.xlu1 %4388, %v4909_v26  }
 0x31b   : > { %v2377_v12 = vpop.permute.xlu0 %2376 }
 0x31c   : > { %v5909_v29 = vpop.permute.xlu1 %2488  ;;  %4412 = vset.pattern.permute.xlu0 %v7712_v8 }
 0x31d   : > { %7718 = vst [vmem:[#allocation131_spill] sm:$0xff] %v5909_v29  ;;  %2996 = vperm.xlu1 %4388, %v4626_v14   ;;  %3072 = vperm.xlu0 %4412, %v4952_v33  }
 0x31f   : > { %v5914_v24 = vpop.permute.xlu0 %2384 }
 0x320   : > { %v5916_v23 = vpop.permute.xlu1 %2496 }
 0x321   : > { %7719 = vst [vmem:[#allocation132_spill] sm:$0xff] %v5916_v23  ;;  %4389 = vset.pattern.permute.xlu1 %v7465_v4  ;;  %3044 = vperm.xlu0 %4412, %v4872_v17   ;;  %v2432_v23 = vadd.f32 %v5935_v40, %v2405_v46 }
 0x322   : > { %3168 = vperm.xlu1 %4389, %v4828_v58   ;;  %v2434_v58 = vadd.f32 %v5935_v40, %v2413_v52 }
 0x323   : > { %v5921_v45 = vpop.permute.xlu0 %2392  ;;  %v2448_v46 = vand.u32 2147483647, %v2432_v23 }
 0x324   : > { %7720 = vst [vmem:[#allocation133_spill] sm:$0xff] %v5921_v45  ;;  %v5923_v5 = vpop.permute.xlu1 %2500  ;;  %v2450_v29 = vand.u32 2147483647, %v2434_v58 }
 0x325   : > { %7721 = vst [vmem:[#allocation134_spill] sm:$0xff] %v5923_v5  ;;  %3080 = vperm.xlu0 %4412, %v4985_v43  }
 0x326   : > { %4390 = vset.pattern.permute.xlu1 %v7684_v10 }
 0x327   : > { %2644 = vperm.xlu1 %4390, %v4942_v31   ;;  %v5928_v62 = vpop.permute.xlu0 %2400 }
 0x328   : > { %7722 = vst [vmem:[#allocation135_spill] sm:$0xff] %v5928_v62  ;;  %v5930_v22 = vpop.permute.xlu1 %2520  ;;  %v2425_v62 = vadd.f32 %v5935_v40, %v2377_v12  ;;  %v2442_v12 = vand.u32 2147483647, %v2426_v25 }
 0x329   : > { %3052 = vperm.xlu0 %4412, %v4942_v31  }
 0x32a   : > { %v2441_v50 = vand.u32 2147483647, %v2425_v62 }
 0x32b   : > { %2676 = vperm.xlu1 %4390, %v7704_v20   ;;  %v2409_v54 = vpop.permute.xlu0 %2408 }
 0x32c   : > { %v2433_v4 = vadd.f32 %v5935_v40, %v2409_v54 }
 0x32d   : > { %v5941_v5 = vpop.permute.xlu1 %2624  ;;  %3056 = vperm.xlu0 %4412, %v7703_v16  }
 0x32e   : > { %7725 = vst [vmem:[#allocation137_spill] sm:$0xff] %v5941_v5  ;;  %v2449_v45 = vand.u32 2147483647, %v2433_v4 }
 0x32f   : > { %4391 = vset.pattern.permute.xlu1 %v7707_v19  ;;  %v5949_v52 = vpop.permute.xlu0 %2452 }
 0x330   : > { %7726 = vst [vmem:[#allocation138_spill] sm:$0xff] %v5949_v52  ;;  %2940 = vperm.xlu1 %4391, %v4853_v9   ;;  %v2470_v5 = vmul.f32 %v5949_v52, %v2450_v29  ;;  %v2468_v17 = vmul.f32 %v5949_v52, %v2448_v46  ;;  %v2461_v33 = vmul.f32 %v5949_v52, %v2441_v50 }
 0x331   : > { %v5952_v54 = vpop.permute.xlu1 %2628  ;;  %3092 = vperm.xlu0 %4412, %v5282_v51   ;;  %v2469_v29 = vmul.f32 %v5949_v52, %v2449_v45  ;;  %v2462_v23 = vmul.f32 %v5949_v52, %v2442_v12  ;;  %v7745_v12 = vld [vmem:[#allocation79_spill] sm:$0xff] }
 0x332   : > { %7727 = vst [vmem:[#allocation139_spill] sm:$0xff] %v5952_v54  ;;  %v5956_v60 = vadd.f32 %v2470_v5, %v2350_v41  ;;  %v5970_v41 = vadd.f32 %v2468_v17, %v2348_v56  ;;  %v5972_v5 = vadd.f32 %v2461_v33, %v2341_v34  ;;  %v7743_v34 = vld [vmem:[#allocation119_spill] sm:$0xff]  ;;  %v7755_v54 = vld [vmem:[#allocation97_spill] sm:$0xff] }
 0x333   : > { %v5974_v62 = vadd.f32 %v2469_v29, %v2349_v42  ;;  %v5976_v25 = vadd.f32 %v2462_v23, %v2342_v44  ;;  %v7744_v44 = vld [vmem:[#allocation77_spill] sm:$0xff]  ;;  %v7746_v29 = vld [vmem:[#allocation120_spill] sm:$0xff] }
 0x334   : > { %4392 = vset.pattern.permute.xlu1 %v7728_v1  ;;  %v5959_v58 = vpop.permute.xlu0 %2492  ;;  %7731 = vst [vmem:[#allocation142_spill] sm:$0xff] %v5970_v41  ;;  %7732 = vst [vmem:[#allocation143_spill] sm:$0xff] %v5972_v5  ;;  %v1199_v46 = vadd.f32 %v7743_v34, %v7744_v44  ;;  %v1340_v23 = vadd.f32 %v7746_v29, %v7745_v12  ;;  %v7747_v41 = vld [vmem:[#allocation81_spill] sm:$0xff]  ;;  %v1200_v5 = vadd.f32 %v7743_v34, %v7755_v54 }
 0x335   : > { %7729 = vst [vmem:[#allocation140_spill] sm:$0xff] %v5959_v58  ;;  %3172 = vperm.xlu1 %4392, %v4823_v55   ;;  %v5964_v4 = vpop.permute.xlu1 %2660  ;;  %4418 = vset.pattern.permute.xlu0 %v7728_v1  ;;  %7733 = vst [vmem:[#allocation144_spill] sm:$0xff] %v5974_v62  ;;  %v7753_v58 = vsub.s32 2, %v4595_v2  ;;  %v7767_v1 = vld [vmem:[#allocation56_spill] sm:$0xff] }
 0x336   : > { %7730 = vst [vmem:[#allocation141_spill] sm:$0xff] %v5964_v4  ;;  %3200 = vperm.xlu0 %4418, %v4922_v28   ;;  %7734 = vst [vmem:[#allocation145_spill] sm:$0xff] %v5976_v25  ;;  %v7748_v25 = vld [vmem:[#allocation121_spill] sm:$0xff]  ;;  %v7749_v4 = vld [vmem:[#allocation82_spill] sm:$0xff] }
 0x337   : > { %v1612_v62 = vadd.f32 %v5569_v32, %v7749_v4  ;;  %v1356_v4 = vand.u32 2147483647, %v1340_v23  ;;  %v7763_v23 = vsub.s32 6, %v4595_v2 }
 0x338   : > { %v5978_v50 = vpop.permute.xlu0 %2504 }
 0x339   : > { %7735 = vst [vmem:[#allocation146_spill] sm:$0xff] %v5978_v50  ;;  %4393 = vset.pattern.permute.xlu1 %v7658_v15  ;;  %v6046_v54 = vrot.slane %v7710_v18, %v7763_v23 }
 0x33a   : > { %2512 = vperm.xlu1 %4393, %v7703_v16   ;;  %v5982_v55 = vpop.permute.xlu1 %2588  ;;  %3204 = vperm.xlu0 %4418, %v4848_v6   ;;  %v7742_v6 = vld [vmem:[#allocation86_spill] sm:$0xff] }
 0x33b   : > { %7736 = vst [vmem:[#allocation147_spill] sm:$0xff] %v5982_v55  ;;  %v1198_v42 = vadd.f32 %v7743_v34, %v7742_v6  ;;  %7764 = vst [vmem:[#allocation121_spill] sm:$0xff] %v6046_v54  ;;  %v7769_v54 = vld [vmem:[#allocation50_spill] sm:$0xff] }
 0x33c   : > { %v5985_v45 = vpop.permute.xlu0 %2524 }
 0x33d   : > { %7737 = vst [vmem:[#allocation148_spill] sm:$0xff] %v5985_v45  ;;  %v1214_v44 = vand.u32 2147483647, %v1198_v42  ;;  %v1215_v45 = vand.u32 2147483647, %v1199_v46  ;;  %v7759_v42 = vsub.s32 4, %v4595_v2 }
 0x33e   : > { %2544 = vperm.xlu1 %4393, %v5134_v7   ;;  %3176 = vperm.xlu0 %4418, %v4909_v26  }
 0x33f   : > { %v5989_v17 = vpop.permute.xlu1 %2760 }
 0x340   : > { %7738 = vst [vmem:[#allocation149_spill] sm:$0xff] %v5989_v17  ;;  %v5991_v28 = vpop.permute.xlu0 %2528  ;;  %v1476_v17 = vadd.f32 %v7748_v25, %v7747_v41  ;;  %v6022_v41 = vrot.slane %v7710_v18, %v7753_v58  ;;  %v7761_v58 = vsub.s32 5, %v4595_v2 }
 0x341   : > { %7739 = vst [vmem:[#allocation150_spill] sm:$0xff] %v5991_v28  ;;  %v7752_v28 = vld [vmem:[#allocation48_spill] sm:$0xff] }
 0x342   : > { %4394 = vset.pattern.permute.xlu1 %v7681_v39  ;;  %3216 = vperm.xlu0 %4418, %v4985_v43   ;;  %v1339_v12 = vadd.f32 %v7746_v29, %v7752_v28  ;;  %7754 = vst [vmem:[#allocation119_spill] sm:$0xff] %v6022_v41  ;;  %v6036_v28 = vrot.slane %v7710_v18, %v7759_v42  ;;  %v1628_v42 = vand.u32 2147483647, %v1612_v62  ;;  %v7773_v62 = vld [vmem:[#allocation58_spill] sm:$0xff] }
 0x343   : > { %2808 = vperm.xlu1 %4394, %v4985_v43   ;;  %v6041_v46 = vrot.slane %v7710_v18, %v7761_v58  ;;  %v1341_v43 = vadd.f32 %v7746_v29, %v7767_v1 }
 0x344   : > { %v5996_v33 = vpop.permute.xlu1 %2532  ;;  %v5998_v56 = vpop.permute.xlu0 %2536  ;;  %7760 = vst [vmem:[#allocation120_spill] sm:$0xff] %v6036_v28  ;;  %v1355_v23 = vand.u32 2147483647, %v1339_v12  ;;  %v7781_v28 = vld [vmem:[#allocation52_spill] sm:$0xff] }
 0x345   : > { %7740 = vst [vmem:[#allocation151_spill] sm:$0xff] %v5996_v33  ;;  %7741 = vst [vmem:[#allocation152_spill] sm:$0xff] %v5998_v56  ;;  %v7750_v56 = vld [vmem:[#allocation84_spill] sm:$0xff] }
 0x346   : > { %3188 = vperm.xlu0 %4418, %v4942_v31   ;;  %v1748_v33 = vadd.f32 %v5579_v35, %v7750_v56  ;;  %7762 = vst [vmem:[#allocation81_spill] sm:$0xff] %v6041_v46  ;;  %v7768_v46 = vld [vmem:[#allocation91_spill] sm:$0xff] }
 0x347   : > { %4395 = vset.pattern.permute.xlu1 %v7712_v8  ;;  %v1239_v30 = vmul.f32 %v7768_v46, %v1214_v44  ;;  %v7775_v44 = vld [vmem:[#allocation63_spill] sm:$0xff] }
 0x348   : > { %3040 = vperm.xlu1 %4395, %v4909_v26   ;;  %v6015_v6 = vpop.permute.xlu0 %2508  ;;  %v7757_v26 = vsub.s32 3, %v4595_v2  ;;  %v1764_v50 = vand.u32 2147483647, %v1748_v33  ;;  %v1216_v33 = vand.u32 2147483647, %v1200_v5  ;;  %v1749_v12 = vadd.f32 %v5579_v35, %v7775_v44  ;;  %v7780_v5 = vld [vmem:[#allocation64_spill] sm:$0xff] }
 0x349   : > { %7751 = vst [vmem:[#allocation86_spill] sm:$0xff] %v6015_v6  ;;  %v6026_v51 = vpop.permute.xlu1 %2764  ;;  %v1492_v6 = vand.u32 2147483647, %v1476_v17  ;;  %v1477_v17 = vadd.f32 %v7748_v25, %v7773_v62 }
 0x34a   : > { %7756 = vst [vmem:[#allocation77_spill] sm:$0xff] %v6026_v51  ;;  %v6031_v56 = vrot.slane %v7710_v18, %v7757_v26  ;;  %3224 = vperm.xlu0 %4418, %v5134_v7   ;;  %v7765_v26 = vsub.s32 7, %v4595_v2  ;;  %v1475_v7 = vadd.f32 %v7748_v25, %v7769_v54  ;;  %v6061_v2 = vmul.f32 %v7768_v46, %v1215_v45  ;;  %v7777_v54 = vld [vmem:[#allocation102_spill] sm:$0xff] }
 0x34b   : > { %v1255_v45 = vadd.f32 %v1239_v30, %v7777_v54  ;;  %v6088_v30 = vmul.f32 %v7655_v36, %v1628_v42 }
 0x34c   : > { %7758 = vst [vmem:[#allocation79_spill] sm:$0xff] %v6031_v56  ;;  %v6052_v51 = vrot.slane %v7710_v18, %v7765_v26  ;;  %3132 = vperm.xlu1 %4395, %v4626_v14   ;;  %v2549_v58 = vpop.permute.xlu0 %2548  ;;  %7770 = vst [vmem:[#allocation84_spill] sm:$0xff] %v6061_v2  ;;  %v7771_v18 = vld [vmem:[#allocation19_spill] sm:$0xff]  ;;  %v6077_v2 = vmul.f32 %v7654_v59, %v1492_v6  ;;  %v1491_v44 = vand.u32 2147483647, %v1475_v7 }
 0x34d   : > { %v6064_v26 = vmul.f32 %v7771_v18, %v1356_v4  ;;  %v2570_v1 = vadd.f32 %v6022_v41, %v2549_v58  ;;  %v1357_v4 = vand.u32 2147483647, %v1341_v43  ;;  %v1375_v58 = vmul.f32 %v7771_v18, %v1355_v23  ;;  %7782 = vst [vmem:[#allocation91_spill] sm:$0xff] %v6088_v30 }
 0x34e   : > { %7766 = vst [vmem:[#allocation82_spill] sm:$0xff] %v6052_v51  ;;  %v7774_v51 = vld [vmem:[#allocation61_spill] sm:$0xff]  ;;  %v6073_v53 = vpop.permute.xlu1 %2632  ;;  %7778 = vst [vmem:[#allocation56_spill] sm:$0xff] %v6077_v2  ;;  %v6091_v43 = vmul.f32 %v7657_v3, %v1764_v50  ;;  %v1493_v6 = vand.u32 2147483647, %v1477_v17  ;;  %v1511_v30 = vmul.f32 %v7654_v59, %v1491_v44  ;;  %v7789_v2 = vld [vmem:[#allocation54_spill] sm:$0xff] }
 0x34f   : > { %7772 = vst [vmem:[#allocation48_spill] sm:$0xff] %v6064_v26  ;;  %v1613_v14 = vadd.f32 %v5569_v32, %v7774_v51  ;;  %7776 = vst [vmem:[#allocation97_spill] sm:$0xff] %v6073_v53  ;;  %v7779_v26 = vld [vmem:[#allocation80_spill] sm:$0xff]  ;;  %v2586_v13 = vand.u32 2147483647, %v2570_v1  ;;  %v1194_v51 = vadd.f32 %v7743_v34, %v7780_v5  ;;  %v1611_v53 = vadd.f32 %v5569_v32, %v7781_v28  ;;  %v7797_v44 = vld [vmem:[#allocation93_spill] sm:$0xff] }
 0x350   : > { %v1885_v62 = vadd.f32 %v5607_v11, %v7779_v26  ;;  %4396 = vset.pattern.permute.xlu1 %v7658_v15  ;;  %7783 = vst [vmem:[#allocation50_spill] sm:$0xff] %v6091_v43  ;;  %v6098_v1 = vmul.f32 %v7768_v46, %v1216_v33  ;;  %v1765_v23 = vand.u32 2147483647, %v1749_v12  ;;  %v1391_v28 = vadd.f32 %v1375_v58, %v1255_v45  ;;  %v7791_v45 = vld [vmem:[#allocation88_spill] sm:$0xff] }
 0x351   : > { %v2606_v26 = vmul.f32 %v5982_v55, %v2586_v13  ;;  %2516 = vperm.xlu1 %4396, %v7692_v57   ;;  %v6095_v15 = vpop.permute.xlu0 %2656  ;;  %v1629_v7 = vand.u32 2147483647, %v1613_v14  ;;  %v6103_v42 = vmul.f32 %v7771_v18, %v1357_v4  ;;  %v7788_v13 = vld [vmem:[#allocation31_spill] sm:$0xff]  ;;  %v1210_v43 = vand.u32 2147483647, %v1194_v51  ;;  %v7793_v58 = vld [vmem:[#allocation92_spill] sm:$0xff] }
 0x352   : > { %7784 = vst [vmem:[#allocation19_spill] sm:$0xff] %v6098_v1  ;;  %v6100_v5 = vpop.permute.xlu1 %2724  ;;  %v1901_v50 = vand.u32 2147483647, %v1885_v62  ;;  %v1335_v57 = vadd.f32 %v7746_v29, %v7788_v13  ;;  %v1627_v33 = vand.u32 2147483647, %v1611_v53  ;;  %v1747_v14 = vadd.f32 %v5579_v35, %v7789_v2  ;;  %v7792_v62 = vld [vmem:[#allocation90_spill] sm:$0xff] }
 0x353   : > { %7785 = vst [vmem:[#allocation58_spill] sm:$0xff] %v6100_v5  ;;  %7786 = vst [vmem:[#allocation61_spill] sm:$0xff] %v6103_v42  ;;  %v6106_v17 = vadd.f32 %v2606_v26, %v5956_v60  ;;  %v6114_v12 = vmul.f32 %v7654_v59, %v1493_v6  ;;  %v1201_v4 = vadd.f32 %v7743_v34, %v7791_v45  ;;  %v7798_v45 = vld [vmem:[#allocation95_spill] sm:$0xff] }
 0x354   : > { %v1342_v60 = vadd.f32 %v7746_v29, %v7792_v62  ;;  %v1478_v26 = vadd.f32 %v7748_v25, %v7793_v58  ;;  %v6126_v53 = vmul.f32 %v7655_v36, %v1629_v7  ;;  %v6129_v2 = vmul.f32 %v7657_v3, %v1765_v23  ;;  %v7799_v58 = vld [vmem:[#allocation89_spill] sm:$0xff] }
 0x355   : > { %7787 = vst [vmem:[#allocation63_spill] sm:$0xff] %v6106_v17  ;;  %7790 = vst [vmem:[#allocation102_spill] sm:$0xff] %v6114_v12  ;;  %4398 = vset.pattern.permute.xlu1 %v7681_v39  ;;  %v6123_v51 = vpop.permute.xlu0 %2664  ;;  %v1614_v6 = vadd.f32 %v5569_v32, %v7797_v44  ;;  %v1527_v13 = vadd.f32 %v1511_v30, %v1391_v28  ;;  %v1750_v62 = vadd.f32 %v5579_v35, %v7798_v45  ;;  %v7801_v7 = vld [vmem:[#allocation33_spill] sm:$0xff]  ;;  %v7802_v12 = vld [vmem:[#allocation78_spill] sm:$0xff] }
 0x356   : > { %7794 = vst [vmem:[#allocation80_spill] sm:$0xff] %v6123_v51  ;;  %7795 = vst [vmem:[#allocation64_spill] sm:$0xff] %v6126_v53  ;;  %2780 = vperm.xlu1 %4398, %v4942_v31   ;;  %v1202_v17 = vadd.f32 %v7743_v34, %v7799_v58  ;;  %v1351_v51 = vand.u32 2147483647, %v1335_v57  ;;  %v1471_v53 = vadd.f32 %v7748_v25, %v7801_v7  ;;  %v1763_v44 = vand.u32 2147483647, %v1747_v14 }
 0x357   : > { %7796 = vst [vmem:[#allocation52_spill] sm:$0xff] %v6129_v2  ;;  %v6138_v39 = vpop.permute.xlu1 %2896  ;;  %v1235_v23 = vmul.f32 %v7768_v46, %v1210_v43  ;;  %v1647_v2 = vmul.f32 %v7655_v36, %v1627_v33  ;;  %v1883_v30 = vadd.f32 %v5607_v11, %v7802_v12  ;;  %v6147_v28 = vmul.f32 %v7680_v0, %v1901_v50  ;;  %v7806_v14 = vld [vmem:[#allocation66_spill] sm:$0xff] }
 0x358   : > { %7800 = vst [vmem:[#allocation31_spill] sm:$0xff] %v6138_v39  ;;  %v1217_v45 = vand.u32 2147483647, %v1201_v4  ;;  %v1358_v42 = vand.u32 2147483647, %v1342_v60  ;;  %v7805_v39 = vld [vmem:[#allocation65_spill] sm:$0xff]  ;;  %v2019_v12 = vadd.f32 %v5616_v49, %v7806_v14  ;;  %v1371_v4 = vmul.f32 %v7771_v18, %v1351_v51 }
 0x359   : > { %7803 = vst [vmem:[#allocation54_spill] sm:$0xff] %v6147_v28  ;;  %v1494_v58 = vand.u32 2147483647, %v1478_v26  ;;  %v6149_v1 = vpop.permute.xlu0 %2640  ;;  %v1630_v57 = vand.u32 2147483647, %v1614_v6  ;;  %v1343_v7 = vadd.f32 %v7746_v29, %v7805_v39  ;;  %v1251_v43 = vadd.f32 %v1235_v23, %v7777_v54  ;;  %v7807_v26 = vld [vmem:[#allocation36_spill] sm:$0xff] }
 0x35a   : > { %7804 = vst [vmem:[#allocation88_spill] sm:$0xff] %v6149_v1  ;;  %2812 = vperm.xlu1 %4398, %v7704_v20   ;;  %v1663_v33 = vadd.f32 %v1647_v2, %v1527_v13  ;;  %v1766_v31 = vand.u32 2147483647, %v1750_v62  ;;  %v1218_v50 = vand.u32 2147483647, %v1202_v17  ;;  %v1607_v28 = vadd.f32 %v5569_v32, %v7807_v26 }
 0x35b   : > { %v1487_v60 = vand.u32 2147483647, %v1471_v53  ;;  %v1783_v39 = vmul.f32 %v7657_v3, %v1763_v44  ;;  %v1899_v1 = vand.u32 2147483647, %v1883_v30  ;;  %v2155_v23 = vadd.f32 %v5811_v38, %v5789_v47 }
 0x35c   : > { %v6160_v6 = vpop.permute.xlu1 %2636  ;;  %v6166_v2 = vmul.f32 %v7768_v46, %v1217_v45  ;;  %v6169_v13 = vmul.f32 %v7771_v18, %v1358_v42  ;;  %v6172_v17 = vmul.f32 %v7654_v59, %v1494_v58  ;;  %v6177_v53 = vmul.f32 %v7655_v36, %v1630_v57 }
 0x35d   : > { %7808 = vst [vmem:[#allocation90_spill] sm:$0xff] %v6160_v6  ;;  %v6174_v51 = vpop.permute.xlu0 %2680  ;;  %v1359_v62 = vand.u32 2147483647, %v1343_v7  ;;  %v1387_v44 = vadd.f32 %v1371_v4, %v1251_v43  ;;  %v1799_v30 = vadd.f32 %v1783_v39, %v1663_v33  ;;  %v2035_v47 = vand.u32 2147483647, %v2019_v12  ;;  %v7811_v7 = vld [vmem:[#allocation38_spill] sm:$0xff] }
 0x35e   : > { %7809 = vst [vmem:[#allocation92_spill] sm:$0xff] %v6174_v51  ;;  %4399 = vset.pattern.permute.xlu1 %v7712_v8  ;;  %v2291_v45 = vadd.f32 %v5874_v63, %v5853_v61  ;;  %v6183_v42 = vmul.f32 %v7657_v3, %v1766_v31  ;;  %v6186_v58 = vmul.f32 %v7768_v46, %v1218_v50  ;;  %v1623_v14 = vand.u32 2147483647, %v1607_v28  ;;  %v7813_v61 = vld [vmem:[#allocation67_spill] sm:$0xff]  ;;  %v7815_v39 = vld [vmem:[#allocation69_spill] sm:$0xff] }
 0x35f   : > { %3076 = vperm.xlu1 %4399, %v4853_v9   ;;  %v1507_v57 = vmul.f32 %v7654_v59, %v1487_v60  ;;  %v1743_v43 = vadd.f32 %v5579_v35, %v7811_v7  ;;  %v1919_v33 = vmul.f32 %v7680_v0, %v1899_v1  ;;  %v2171_v12 = vand.u32 2147483647, %v2155_v23  ;;  %v7816_v6 = vld [vmem:[#allocation71_spill] sm:$0xff] }
 0x360   : > { %7810 = vst [vmem:[#allocation93_spill] sm:$0xff] %v6183_v42  ;;  %v6192_v4 = vpop.permute.xlu1 %2668  ;;  %v2427_v31 = vadd.f32 %v5935_v40, %v5914_v24  ;;  %v6199_v50 = vadd.f32 %v7748_v25, %v7813_v61  ;;  %v2055_v60 = vmul.f32 %v5748_v48, %v2035_v47  ;;  %v6205_v28 = vmul.f32 %v7771_v18, %v1359_v62 }
 0x361   : > { %7812 = vst [vmem:[#allocation95_spill] sm:$0xff] %v6192_v4  ;;  %v6201_v26 = vpop.permute.xlu0 %2652  ;;  %v6209_v7 = vadd.f32 %v5569_v32, %v7815_v39  ;;  %v1523_v1 = vadd.f32 %v1507_v57, %v1387_v44  ;;  %v1935_v23 = vadd.f32 %v1919_v33, %v1799_v30  ;;  %v2307_v4 = vand.u32 2147483647, %v2291_v45  ;;  %v7817_v44 = vld [vmem:[#allocation74_spill] sm:$0xff]  ;;  %v7818_v45 = vld [vmem:[#allocation83_spill] sm:$0xff] }
 0x362   : > { %7814 = vst [vmem:[#allocation89_spill] sm:$0xff] %v6201_v26  ;;  %v2563_v24 = vadd.f32 %v6022_v41, %v5930_v22  ;;  %v2699_v61 = vadd.f32 %v6031_v56, %v6095_v15  ;;  %v2191_v47 = vmul.f32 %v5824_v21, %v2171_v12  ;;  %v6219_v62 = vadd.f32 %v5579_v35, %v7816_v6  ;;  %v7820_v6 = vld [vmem:[#allocation100_spill] sm:$0xff] }
 0x363   : > { %4400 = vset.pattern.permute.xlu1 %v7684_v10  ;;  %v1643_v39 = vmul.f32 %v7655_v36, %v1623_v14  ;;  %v1759_v26 = vand.u32 2147483647, %v1743_v43  ;;  %v1879_v30 = vadd.f32 %v5607_v11, %v7817_v44  ;;  %v2443_v22 = vand.u32 2147483647, %v2427_v31  ;;  %v7821_v43 = vld [vmem:[#allocation53_spill] sm:$0xff] }
 0x364   : > { %2648 = vperm.xlu1 %4400, %v7703_v16   ;;  %v6227_v15 = vadd.f32 %v5607_v11, %v7818_v45  ;;  %v2071_v33 = vadd.f32 %v2055_v60, %v1935_v23  ;;  %v2327_v12 = vmul.f32 %v5888_v37, %v2307_v4  ;;  %v2015_v51 = vadd.f32 %v5616_v49, %v7820_v6 }
 0x365   : > { %v6229_v57 = vpop.permute.xlu1 %2932  ;;  %v1495_v14 = vand.u32 2147483647, %v6199_v50  ;;  %v1195_v44 = vadd.f32 %v7743_v34, %v7821_v43  ;;  %v1659_v20 = vadd.f32 %v1643_v39, %v1523_v1  ;;  %v2579_v31 = vand.u32 2147483647, %v2563_v24  ;;  %v7822_v43 = vld [vmem:[#allocation120_spill] sm:$0xff]  ;;  %v7823_v39 = vld [vmem:[#allocation9_spill] sm:$0xff] }
 0x366   : > { %7819 = vst [vmem:[#allocation33_spill] sm:$0xff] %v6229_v57  ;;  %v2793_v16 = vpop.permute.xlu0 %2792  ;;  %v2715_v42 = vand.u32 2147483647, %v2699_v61  ;;  %v2207_v8 = vadd.f32 %v2191_v47, %v2071_v33  ;;  %v2463_v45 = vmul.f32 %v5949_v52, %v2443_v22  ;;  %v2151_v60 = vadd.f32 %v5811_v38, %v5778_v27  ;;  %v7824_v27 = vld [vmem:[#allocation55_spill] sm:$0xff]  ;;  %v7827_v57 = vld [vmem:[#allocation76_spill] sm:$0xff] }
 0x367   : > { %v1631_v4 = vand.u32 2147483647, %v6209_v7  ;;  %v1779_v23 = vmul.f32 %v7657_v3, %v1759_v26  ;;  %v1895_v6 = vand.u32 2147483647, %v1879_v30  ;;  %v1767_v50 = vand.u32 2147483647, %v6219_v62 }
 0x368   : > { %4401 = vset.pattern.permute.xlu1 %v7707_v19  ;;  %v2835_v1 = vadd.f32 %v7822_v43, %v2793_v16  ;;  %v2343_v24 = vadd.f32 %v2327_v12, %v2207_v8  ;;  %v2599_v61 = vmul.f32 %v5982_v55, %v2579_v31  ;;  %v2031_v47 = vand.u32 2147483647, %v2015_v51  ;;  %v7828_v12 = vld [vmem:[#allocation107_spill] sm:$0xff] }
 0x369   : > { %2912 = vperm.xlu1 %4401, %v7823_v39   ;;  %v1903_v22 = vand.u32 2147483647, %v6227_v15  ;;  %v1336_v7 = vadd.f32 %v7746_v29, %v7824_v27  ;;  %v1795_v33 = vadd.f32 %v1779_v23, %v1659_v20  ;;  %v2287_v62 = vadd.f32 %v5874_v63, %v7827_v57  ;;  %v7829_v20 = vld [vmem:[#allocation130_spill] sm:$0xff]  ;;  %v7831_v57 = vld [vmem:[#allocation16_spill] sm:$0xff] }
 0x36a   : > { %v6250_v26 = vpop.permute.xlu1 %2768  ;;  %v6252_v30 = vpop.permute.xlu0 %2796  ;;  %v1211_v16 = vand.u32 2147483647, %v1195_v44  ;;  %v2479_v38 = vadd.f32 %v2463_v45, %v2343_v24  ;;  %v2735_v8 = vmul.f32 %v6100_v5, %v2715_v42  ;;  %v1877_v51 = vadd.f32 %v5607_v11, %v7828_v12  ;;  %v7832_v42 = vld [vmem:[#allocation57_spill] sm:$0xff] }
 0x36b   : > { %7825 = vst [vmem:[#allocation78_spill] sm:$0xff] %v6250_v26  ;;  %7826 = vst [vmem:[#allocation65_spill] sm:$0xff] %v6252_v30  ;;  %v2167_v31 = vand.u32 2147483647, %v2151_v60  ;;  %v1915_v15 = vmul.f32 %v7680_v0, %v1895_v6  ;;  %v2051_v27 = vmul.f32 %v5748_v48, %v2031_v47  ;;  %v2423_v23 = vadd.f32 %v5935_v40, %v7829_v20  ;;  %v7830_v26 = vld [vmem:[#allocation146_spill] sm:$0xff]  ;;  %v7835_v20 = vld [vmem:[#allocation88_spill] sm:$0xff] }
 0x36c   : > { %v2559_v30 = vadd.f32 %v6022_v41, %v7830_v26  ;;  %v2851_v39 = vand.u32 2147483647, %v2835_v1  ;;  %v2615_v44 = vadd.f32 %v2599_v61, %v2479_v38  ;;  %v1352_v45 = vand.u32 2147483647, %v1336_v7  ;;  %v7836_v38 = vld [vmem:[#allocation60_spill] sm:$0xff]  ;;  %v7837_v7 = vld [vmem:[#allocation62_spill] sm:$0xff] }
 0x36d   : > { %2944 = vperm.xlu1 %4401, %v7831_v57   ;;  %v1472_v24 = vadd.f32 %v7748_v25, %v7832_v42  ;;  %v1931_v12 = vadd.f32 %v1915_v15, %v1795_v33  ;;  %v2187_v60 = vmul.f32 %v5824_v21, %v2167_v31  ;;  %v2303_v63 = vand.u32 2147483647, %v2287_v62 }
 0x36e   : > { %v6269_v6 = vpop.permute.xlu1 %2800  ;;  %v6271_v47 = vpop.permute.xlu0 %2860  ;;  %v2695_v40 = vadd.f32 %v6031_v56, %v7835_v20  ;;  %v2751_v26 = vadd.f32 %v2735_v8, %v2615_v44  ;;  %v1893_v57 = vand.u32 2147483647, %v1877_v51  ;;  %v1608_v61 = vadd.f32 %v5569_v32, %v7836_v38  ;;  %v7855_v56 = vld [vmem:[#allocation59_spill] sm:$0xff] }
 0x36f   : > { %7833 = vst [vmem:[#allocation66_spill] sm:$0xff] %v6269_v6  ;;  %7834 = vst [vmem:[#allocation36_spill] sm:$0xff] %v6271_v47  ;;  %v2871_v1 = vmul.f32 %v6271_v47, %v2851_v39  ;;  %v1744_v33 = vadd.f32 %v5579_v35, %v7837_v7  ;;  %v2067_v15 = vadd.f32 %v2051_v27, %v1931_v12  ;;  %v2439_v31 = vand.u32 2147483647, %v2423_v23  ;;  %v7840_v27 = vld [vmem:[#allocation14_spill] sm:$0xff] }
 0x370   : > { %v2575_v42 = vand.u32 2147483647, %v2559_v30  ;;  %v2323_v6 = vmul.f32 %v5888_v37, %v2303_v63  ;;  %v7838_v41 = vmov 15   ;;  %v6285_v8 = vmul.f32 %v7654_v59, %v1495_v14 }
 0x371   : > { %4402 = vset.pattern.permute.xlu1 %v7838_v41  ;;  %v6282_v62 = vadd.f32 %v2871_v1, %v2751_v26  ;;  %v6288_v39 = vmul.f32 %v7655_v36, %v1631_v4  ;;  %v6291_v51 = vmul.f32 %v7657_v3, %v1767_v50  ;;  %v6294_v44 = vmul.f32 %v7680_v0, %v1903_v22  ;;  %v7843_v4 = vld [vmem:[#allocation108_spill] sm:$0xff] }
 0x372   : > { %3208 = vperm.xlu1 %4402, %v7840_v27   ;;  %v6297_v30 = vpop.permute.xlu0 %2804  ;;  %v6300_v63 = vmul.f32 %v7768_v46, %v1211_v16  ;;  %v2203_v23 = vadd.f32 %v2187_v60, %v2067_v15  ;;  %v2459_v14 = vmul.f32 %v5949_v52, %v2439_v31  ;;  %v2711_v12 = vand.u32 2147483647, %v2695_v40  ;;  %v7845_v15 = vld [vmem:[#allocation109_spill] sm:$0xff]  ;;  %v7846_v31 = vld [vmem:[#allocation32_spill] sm:$0xff] }
 0x373   : > { %7839 = vst [vmem:[#allocation38_spill] sm:$0xff] %v6282_v62  ;;  %7841 = vst [vmem:[#allocation67_spill] sm:$0xff] %v6297_v30  ;;  %v6303_v20 = vpop.permute.xlu1 %3032  ;;  %v1878_v50 = vadd.f32 %v5607_v11, %v7843_v4  ;;  %v6308_v26 = vmul.f32 %v7771_v18, %v1352_v45  ;;  %v1488_v22 = vand.u32 2147483647, %v1472_v24  ;;  %v1624_v1 = vand.u32 2147483647, %v1608_v61 }
 0x374   : > { %7842 = vst [vmem:[#allocation69_spill] sm:$0xff] %v6303_v20  ;;  %v6311_v38 = vmul.f32 %v7680_v0, %v1893_v57  ;;  %v1760_v7 = vand.u32 2147483647, %v1744_v33  ;;  %v2339_v16 = vadd.f32 %v2323_v6, %v2203_v23  ;;  %v2595_v60 = vmul.f32 %v5982_v55, %v2575_v42  ;;  %v7847_v62 = vld [vmem:[#allocation34_spill] sm:$0xff]  ;;  %v7848_v45 = vld [vmem:[#allocation37_spill] sm:$0xff]  ;;  %v7849_v61 = vld [vmem:[#allocation7_spill] sm:$0xff] }
 0x375   : > { %v1880_v40 = vadd.f32 %v5607_v11, %v7845_v15  ;;  %v1193_v27 = vadd.f32 %v7743_v34, %v7846_v31  ;;  %v1334_v4 = vadd.f32 %v7746_v29, %v7847_v62  ;;  %v1470_v24 = vadd.f32 %v7748_v25, %v7848_v45  ;;  %v7850_v33 = vld [vmem:[#allocation39_spill] sm:$0xff]  ;;  %v7853_v45 = vld [vmem:[#allocation41_spill] sm:$0xff] }
 0x376   : > { %7844 = vst [vmem:[#allocation71_spill] sm:$0xff] %v6311_v38  ;;  %3268 = vperm.xlu1 %4402, %v7849_v61   ;;  %v2777_v57 = vpop.permute.xlu0 %2776  ;;  %v2475_v20 = vadd.f32 %v2459_v14, %v2339_v16  ;;  %v2731_v6 = vmul.f32 %v6100_v5, %v2711_v12  ;;  %v1606_v42 = vadd.f32 %v5569_v32, %v7850_v33  ;;  %v1894_v31 = vand.u32 2147483647, %v1878_v50  ;;  %v7852_v30 = vld [vmem:[#allocation111_spill] sm:$0xff]  ;;  %v7854_v14 = vld [vmem:[#allocation112_spill] sm:$0xff]  ;;  %v7879_v38 = vld [vmem:[#allocation61_spill] sm:$0xff] }
 0x377   : > { %v2831_v23 = vadd.f32 %v7822_v43, %v2777_v57  ;;  %v6327_v15 = vpop.permute.xlu1 %3064  ;;  %v1884_v62 = vadd.f32 %v5607_v11, %v7852_v30  ;;  %v6332_v52 = vmul.f32 %v7654_v59, %v1488_v22  ;;  %v1742_v61 = vadd.f32 %v5579_v35, %v7853_v45 }
 0x378   : > { %7851 = vst [vmem:[#allocation74_spill] sm:$0xff] %v6327_v15  ;;  %v1886_v12 = vadd.f32 %v5607_v11, %v7854_v14  ;;  %v6339_v16 = vmul.f32 %v7655_v36, %v1624_v1  ;;  %v2611_v33 = vadd.f32 %v2595_v60, %v2475_v20  ;;  %v1896_v43 = vand.u32 2147483647, %v1880_v40 }
 0x379   : > { %v2847_v57 = vand.u32 2147483647, %v2831_v23  ;;  %v6342_v50 = vmul.f32 %v7657_v3, %v1760_v7  ;;  %v1209_v15 = vand.u32 2147483647, %v1193_v27  ;;  %v1350_v30 = vand.u32 2147483647, %v1334_v4 }
 0x37a   : > { %4404 = vset.pattern.permute.xlu1 %v7684_v10  ;;  %v2747_v22 = vadd.f32 %v2731_v6, %v2611_v33  ;;  %v1486_v5 = vand.u32 2147483647, %v1470_v24  ;;  %v1622_v55 = vand.u32 2147483647, %v1606_v42  ;;  %v6348_v1 = vmul.f32 %v7680_v0, %v1894_v31  ;;  %v7857_v7 = vld [vmem:[#allocation87_spill] sm:$0xff]  ;;  %v7860_v6 = vld [vmem:[#allocation25_spill] sm:$0xff] }
 0x37b   : > { %v2867_v45 = vmul.f32 %v6271_v47, %v2847_v57  ;;  %2684 = vperm.xlu1 %4404, %v7855_v56   ;;  %v1900_v20 = vand.u32 2147483647, %v1884_v62  ;;  %v1758_v60 = vand.u32 2147483647, %v1742_v61  ;;  %v1190_v27 = vadd.f32 %v7743_v34, %v7857_v7  ;;  %v7859_v10 = vld [vmem:[#allocation23_spill] sm:$0xff]  ;;  %v7861_v31 = vld [vmem:[#allocation113_spill] sm:$0xff] }
 0x37c   : > { %v6350_v40 = vpop.permute.xlu1 %2540  ;;  %v1902_v4 = vand.u32 2147483647, %v1886_v12  ;;  %v1331_v24 = vadd.f32 %v7746_v29, %v7859_v10  ;;  %v1467_v42 = vadd.f32 %v7748_v25, %v7860_v6  ;;  %v6361_v14 = vmul.f32 %v7680_v0, %v1896_v43  ;;  %v7863_v12 = vld [vmem:[#allocation114_spill] sm:$0xff]  ;;  %v7865_v43 = vld [vmem:[#allocation27_spill] sm:$0xff]  ;;  %v7870_v47 = vld [vmem:[#allocation28_spill] sm:$0xff] }
 0x37d   : > { %7856 = vst [vmem:[#allocation83_spill] sm:$0xff] %v6350_v40  ;;  %v6354_v23 = vadd.f32 %v2867_v45, %v2747_v22  ;;  %v6365_v62 = vadd.f32 %v5616_v49, %v7861_v31  ;;  %v1234_v61 = vmul.f32 %v7768_v46, %v1209_v15  ;;  %v1370_v33 = vmul.f32 %v7771_v18, %v1350_v30  ;;  %v7866_v15 = vld [vmem:[#allocation115_spill] sm:$0xff] }
 0x37e   : > { %v6371_v57 = vadd.f32 %v5616_v49, %v7863_v12  ;;  %v6374_v22 = vmul.f32 %v7654_v59, %v1486_v5  ;;  %v6377_v45 = vmul.f32 %v7655_v36, %v1622_v55  ;;  %v1603_v7 = vadd.f32 %v5569_v32, %v7865_v43  ;;  %v7868_v5 = vld [vmem:[#allocation13_spill] sm:$0xff] }
 0x37f   : > { %7858 = vst [vmem:[#allocation100_spill] sm:$0xff] %v6354_v23  ;;  %7862 = vst [vmem:[#allocation53_spill] sm:$0xff] %v6365_v62  ;;  %4405 = vset.pattern.permute.xlu1 %v7707_v19  ;;  %v6383_v10 = vmul.f32 %v7680_v0, %v1900_v20  ;;  %v6387_v30 = vadd.f32 %v5616_v49, %v7866_v15  ;;  %v6390_v6 = vmul.f32 %v7657_v3, %v1758_v60  ;;  %v7871_v15 = vld [vmem:[#allocation84_spill] sm:$0xff]  ;;  %v7872_v60 = vld [vmem:[#allocation19_spill] sm:$0xff] }
 0x380   : > { %7864 = vst [vmem:[#allocation55_spill] sm:$0xff] %v6371_v57  ;;  %2916 = vperm.xlu1 %4405, %v7868_v5   ;;  %v1206_v31 = vand.u32 2147483647, %v1190_v27  ;;  %v6394_v55 = vmul.f32 %v7680_v0, %v1902_v4  ;;  %v1347_v23 = vand.u32 2147483647, %v1331_v24  ;;  %v1739_v20 = vadd.f32 %v5579_v35, %v7870_v47  ;;  %v7873_v5 = vld [vmem:[#allocation30_spill] sm:$0xff] }
 0x381   : > { %7867 = vst [vmem:[#allocation76_spill] sm:$0xff] %v6387_v30  ;;  %v6396_v12 = vpop.permute.xlu1 %2772  ;;  %v1483_v43 = vand.u32 2147483647, %v1467_v42  ;;  %v1256_v37 = vadd.f32 %v7871_v15, %v7777_v54  ;;  %v1257_v21 = vadd.f32 %v7872_v60, %v7777_v54  ;;  %v1875_v27 = vadd.f32 %v5607_v11, %v7873_v5  ;;  %v7875_v19 = vld [vmem:[#allocation116_spill] sm:$0xff]  ;;  %v7876_v5 = vld [vmem:[#allocation43_spill] sm:$0xff] }
 0x382   : > { %7869 = vst [vmem:[#allocation107_spill] sm:$0xff] %v6396_v12  ;;  %v1258_v24 = vadd.f32 %v6166_v2, %v7777_v54  ;;  %v1619_v42 = vand.u32 2147483647, %v1603_v7  ;;  %v7874_v12 = vld [vmem:[#allocation21_spill] sm:$0xff]  ;;  %v6415_v15 = vadd.f32 %v5616_v49, %v7875_v19  ;;  %v1231_v60 = vmul.f32 %v7768_v46, %v1206_v31  ;;  %v7877_v7 = vld [vmem:[#allocation11_spill] sm:$0xff]  ;;  %v7878_v62 = vld [vmem:[#allocation48_spill] sm:$0xff] }
 0x383   : > { %v1191_v47 = vadd.f32 %v7743_v34, %v7874_v12  ;;  %v1192_v4 = vadd.f32 %v7743_v34, %v7876_v5  ;;  %v1259_v2 = vadd.f32 %v6186_v58, %v7777_v54  ;;  %v1367_v12 = vmul.f32 %v7771_v18, %v1347_v23  ;;  %v7880_v23 = vld [vmem:[#allocation20_spill] sm:$0xff] }
 0x384   : > { %4406 = vset.pattern.permute.xlu1 %v7838_v41  ;;  %v1503_v40 = vmul.f32 %v7654_v59, %v1483_v43  ;;  %v1755_v57 = vand.u32 2147483647, %v1739_v20  ;;  %v1392_v19 = vadd.f32 %v7878_v62, %v1256_v37  ;;  %v1393_v30 = vadd.f32 %v7879_v38, %v1257_v21  ;;  %v7881_v38 = vld [vmem:[#allocation45_spill] sm:$0xff] }
 0x385   : > { %3180 = vperm.xlu1 %4406, %v7877_v7   ;;  %v1252_v31 = vadd.f32 %v6300_v63, %v7777_v54  ;;  %v1891_v34 = vand.u32 2147483647, %v1875_v27  ;;  %v1394_v5 = vadd.f32 %v6169_v13, %v1258_v24  ;;  %v6434_v58 = vmul.f32 %v7655_v36, %v1619_v42  ;;  %v7882_v62 = vld [vmem:[#allocation117_spill] sm:$0xff] }
 0x386   : > { %v6430_v41 = vpop.permute.xlu1 %3036  ;;  %v1207_v7 = vand.u32 2147483647, %v1191_v47  ;;  %v1332_v43 = vadd.f32 %v7746_v29, %v7880_v23  ;;  %v1250_v37 = vadd.f32 %v1234_v61, %v7777_v54  ;;  %v1208_v21 = vand.u32 2147483647, %v1192_v4  ;;  %v7883_v47 = vld [vmem:[#allocation56_spill] sm:$0xff]  ;;  %v7884_v61 = vld [vmem:[#allocation102_spill] sm:$0xff] }
 0x387   : > { %v1333_v63 = vadd.f32 %v7746_v29, %v7881_v38  ;;  %v6444_v27 = vadd.f32 %v5616_v49, %v7882_v62  ;;  %v1395_v13 = vadd.f32 %v6205_v28, %v1259_v2  ;;  %v1247_v24 = vadd.f32 %v1231_v60, %v7777_v54  ;;  %v7886_v60 = vld [vmem:[#allocation22_spill] sm:$0xff] }
 0x388   : > { %v6450_v42 = vmul.f32 %v7657_v3, %v1755_v57  ;;  %v1528_v23 = vadd.f32 %v7883_v47, %v1392_v19  ;;  %v1529_v4 = vadd.f32 %v7884_v61, %v1393_v30  ;;  %v1388_v20 = vadd.f32 %v6308_v26, %v1252_v31  ;;  %v7887_v30 = vld [vmem:[#allocation47_spill] sm:$0xff] }
 0x389   : > { %3212 = vperm.xlu1 %4406, %v4853_v9   ;;  %v6458_v38 = vmul.f32 %v7680_v0, %v1891_v34  ;;  %v1530_v28 = vadd.f32 %v6172_v17, %v1394_v5  ;;  %v1232_v9 = vmul.f32 %v7768_v46, %v1207_v7  ;;  %v1348_v2 = vand.u32 2147483647, %v1332_v43  ;;  %v7889_v7 = vld [vmem:[#allocation91_spill] sm:$0xff] }
 0x38a   : > { %v6455_v29 = vpop.permute.xlu1 %3068  ;;  %v1468_v57 = vadd.f32 %v7748_v25, %v7886_v60  ;;  %v1386_v62 = vadd.f32 %v1370_v33, %v1250_v37  ;;  %v1233_v19 = vmul.f32 %v7768_v46, %v1208_v21  ;;  %v1349_v47 = vand.u32 2147483647, %v1333_v63  ;;  %v7891_v46 = vld [vmem:[#allocation35_spill] sm:$0xff] }
 0x38b   : > { %7885 = vst [vmem:[#allocation130_spill] sm:$0xff] %v6455_v29  ;;  %v1469_v26 = vadd.f32 %v7748_v25, %v7887_v30  ;;  %v2036_v31 = vand.u32 2147483647, %v6444_v27  ;;  %v1531_v34 = vadd.f32 %v6285_v8, %v1395_v13  ;;  %v7888_v61 = vmov 12   ;;  %v7890_v29 = vld [vmem:[#allocation64_spill] sm:$0xff] }
 0x38c   : > { %v1383_v17 = vadd.f32 %v1367_v12, %v1247_v24  ;;  %v1248_v5 = vadd.f32 %v1232_v9, %v7777_v54  ;;  %v1664_v43 = vadd.f32 %v7889_v7, %v1528_v23  ;;  %v1665_v60 = vadd.f32 %v7890_v29, %v1529_v4  ;;  %v7892_v12 = vld [vmem:[#allocation24_spill] sm:$0xff]  ;;  %v7894_v29 = vld [vmem:[#allocation118_spill] sm:$0xff] }
 0x38d   : > { %4408 = vset.pattern.permute.xlu1 %v7888_v61  ;;  %v1524_v33 = vadd.f32 %v6332_v52, %v1388_v20  ;;  %v1249_v37 = vadd.f32 %v1233_v19, %v7777_v54  ;;  %v1666_v25 = vadd.f32 %v6177_v53, %v1530_v28  ;;  %v1368_v8 = vmul.f32 %v7771_v18, %v1348_v2  ;;  %v7893_v52 = vld [vmem:[#allocation49_spill] sm:$0xff]  ;;  %v7895_v2 = vld [vmem:[#allocation50_spill] sm:$0xff]  ;;  %v7896_v19 = vld [vmem:[#allocation52_spill] sm:$0xff] }
 0x38e   : > { %2816 = vperm.xlu1 %4408, %v7891_v46   ;;  %v1484_v63 = vand.u32 2147483647, %v1468_v57  ;;  %v1604_v13 = vadd.f32 %v5569_v32, %v7892_v12  ;;  %v1522_v24 = vadd.f32 %v6374_v22, %v1386_v62  ;;  %v1369_v23 = vmul.f32 %v7771_v18, %v1349_v47  ;;  %v7898_v47 = vld [vmem:[#allocation93_spill] sm:$0xff] }
 0x38f   : > { %v6477_v21 = vpop.permute.xlu1 %2672  ;;  %v1485_v4 = vand.u32 2147483647, %v1469_v26  ;;  %v1605_v20 = vadd.f32 %v5569_v32, %v7893_v52  ;;  %v6488_v54 = vadd.f32 %v5616_v49, %v7894_v29  ;;  %v1667_v53 = vadd.f32 %v6288_v39, %v1531_v34  ;;  %v7899_v32 = vld [vmem:[#allocation9_spill] sm:$0xff]  ;;  %v7900_v52 = vld [vmem:[#allocation26_spill] sm:$0xff] }
 0x390   : > { %v1519_v28 = vadd.f32 %v1503_v40, %v1383_v17  ;;  %v1384_v9 = vadd.f32 %v1368_v8, %v1248_v5  ;;  %v1800_v57 = vadd.f32 %v7895_v2, %v1664_v43  ;;  %v1801_v30 = vadd.f32 %v7896_v19, %v1665_v60  ;;  %v7901_v5 = vld [vmem:[#allocation51_spill] sm:$0xff] }
 0x391   : > { %v1660_v22 = vadd.f32 %v6339_v16, %v1524_v33  ;;  %v7897_v62 = vmov 14   ;;  %v1385_v18 = vadd.f32 %v1369_v23, %v1249_v37  ;;  %v1802_v26 = vadd.f32 %v7898_v47, %v1666_v25  ;;  %v7903_v23 = vld [vmem:[#allocation122_spill] sm:$0xff]  ;;  %v7907_v2 = vld [vmem:[#allocation15_spill] sm:$0xff] }
 0x392   : > { %4409 = vset.pattern.permute.xlu1 %v7897_v62  ;;  %v1504_v7 = vmul.f32 %v7654_v59, %v1484_v63  ;;  %v1620_v12 = vand.u32 2147483647, %v1604_v13  ;;  %v1740_v39 = vadd.f32 %v5579_v35, %v7900_v52  ;;  %v1658_v40 = vadd.f32 %v6377_v45, %v1522_v24  ;;  %v7902_v63 = vld [vmem:[#allocation54_spill] sm:$0xff] }
 0x393   : > { %3048 = vperm.xlu1 %4409, %v7899_v32   ;;  %v1505_v17 = vmul.f32 %v7654_v59, %v1485_v4  ;;  %v1621_v16 = vand.u32 2147483647, %v1605_v20  ;;  %v1741_v43 = vadd.f32 %v5579_v35, %v7901_v5  ;;  %v2038_v60 = vand.u32 2147483647, %v6488_v54  ;;  %v6516_v59 = vpop.permute.xlu0 %2784  ;;  %v7904_v35 = vld [vmem:[#allocation72_spill] sm:$0xff]  ;;  %v7905_v20 = vld [vmem:[#allocation29_spill] sm:$0xff] }
 0x394   : > { %v6501_v34 = vpop.permute.xlu1 %2904  ;;  %v1803_v33 = vadd.f32 %v6291_v51, %v1667_v53  ;;  %v1655_v37 = vadd.f32 %v6434_v58, %v1519_v28  ;;  %v1520_v25 = vadd.f32 %v1504_v7, %v1384_v9  ;;  %v6510_v8 = vadd.f32 %v6383_v10, %v1800_v57  ;;  %v7913_v5 = vld [vmem:[#allocation17_spill] sm:$0xff] }
 0x395   : > { %v6513_v45 = vadd.f32 %v7902_v63, %v1801_v30  ;;  %v1796_v13 = vadd.f32 %v6342_v50, %v1660_v22  ;;  %v1521_v24 = vadd.f32 %v1505_v17, %v1385_v18  ;;  %v6520_v4 = vadd.f32 %v7904_v35, %v7903_v23  ;;  %v7906_v50 = vld [vmem:[#allocation8_spill] sm:$0xff] }
 0x396   : > { %v1640_v51 = vmul.f32 %v7655_v36, %v1620_v12  ;;  %v1756_v58 = vand.u32 2147483647, %v1740_v39  ;;  %v1876_v10 = vadd.f32 %v5607_v11, %v7905_v20  ;;  %v1938_v29 = vadd.f32 %v6394_v55, %v1802_v26  ;;  %v7908_v11 = vld [vmem:[#allocation123_spill] sm:$0xff]  ;;  %v7909_v22 = vld [vmem:[#allocation40_spill] sm:$0xff]  ;;  %v7912_v39 = vld [vmem:[#allocation94_spill] sm:$0xff] }
 0x397   : > { %4410 = vset.pattern.permute.xlu1 %v7888_v61  ;;  %v1794_v54 = vadd.f32 %v6390_v6, %v1658_v40  ;;  %v1641_v28 = vmul.f32 %v7655_v36, %v1621_v16  ;;  %v1757_v9 = vand.u32 2147483647, %v1741_v43  ;;  %v2021_v61 = vadd.f32 %v5616_v49, %v7907_v2  ;;  %v7910_v26 = vld [vmem:[#allocation124_spill] sm:$0xff] }
 0x398   : > { %2788 = vperm.xlu1 %4410, %v7906_v50   ;;  %v6529_v53 = vpop.permute.xlu1 %2996  ;;  %v1939_v57 = vadd.f32 %v6294_v44, %v1803_v33  ;;  %v1791_v19 = vadd.f32 %v6450_v42, %v1655_v37  ;;  %v1656_v30 = vadd.f32 %v1640_v51, %v1520_v25  ;;  %v2012_v55 = vadd.f32 %v5616_v49, %v7908_v11  ;;  %v7911_v42 = vld [vmem:[#allocation75_spill] sm:$0xff] }
 0x399   : > { %v2023_v6 = vadd.f32 %v5616_v49, %v7909_v22  ;;  %v1932_v18 = vadd.f32 %v6361_v14, %v1796_v13  ;;  %v1657_v47 = vadd.f32 %v1641_v28, %v1521_v24  ;;  %v2163_v36 = vand.u32 2147483647, %v6520_v4  ;;  %v6556_v14 = vpop.permute.xlu0 %2928  ;;  %v7914_v24 = vld [vmem:[#allocation18_spill] sm:$0xff] }
 0x39a   : > { %v6544_v7 = vadd.f32 %v7904_v35, %v7910_v26  ;;  %v1776_v44 = vmul.f32 %v7657_v3, %v1756_v58  ;;  %v1892_v12 = vand.u32 2147483647, %v1876_v10  ;;  %v6549_v52 = vadd.f32 %v7904_v35, %v7911_v42  ;;  %v7920_v22 = vld [vmem:[#allocation70_spill] sm:$0xff] }
 0x39b   : > { %v6553_v40 = vadd.f32 %v7904_v35, %v7912_v39  ;;  %v1930_v49 = vadd.f32 %v6348_v1, %v1794_v54  ;;  %v1777_v17 = vmul.f32 %v7657_v3, %v1757_v9  ;;  %v2037_v16 = vand.u32 2147483647, %v2021_v61 }
 0x39c   : > { %2820 = vperm.xlu1 %4410, %v7855_v56   ;;  %v2156_v43 = vadd.f32 %v7904_v35, %v7913_v5  ;;  %v1927_v37 = vadd.f32 %v6458_v38, %v1791_v19  ;;  %v1792_v25 = vadd.f32 %v1776_v44, %v1656_v30  ;;  %v2028_v63 = vand.u32 2147483647, %v2012_v55  ;;  %v7919_v55 = vld [vmem:[#allocation96_spill] sm:$0xff] }
 0x39d   : > { %v6562_v33 = vpop.permute.xlu1 %3168  ;;  %v2039_v13 = vand.u32 2147483647, %v2023_v6  ;;  %v2158_v1 = vadd.f32 %v7904_v35, %v7914_v24  ;;  %v1793_v23 = vadd.f32 %v1777_v17, %v1657_v47  ;;  %v2165_v51 = vand.u32 2147483647, %v6544_v7  ;;  %v6589_v47 = vpop.permute.xlu0 %2900  ;;  %v7925_v5 = vld [vmem:[#allocation68_spill] sm:$0xff] }
 0x39e   : > { %v2056_v3 = vmul.f32 %v5748_v48, %v2036_v31  ;;  %v2057_v58 = vmul.f32 %v5748_v48, %v2037_v16  ;;  %v1912_v20 = vmul.f32 %v7680_v0, %v1892_v12  ;;  %v2166_v10 = vand.u32 2147483647, %v6549_v52  ;;  %v7916_v31 = vld [vmem:[#allocation76_spill] sm:$0xff]  ;;  %v7918_v0 = vld [vmem:[#allocation10_spill] sm:$0xff] }
 0x39f   : > { %v2168_v38 = vand.u32 2147483647, %v6553_v40  ;;  %v2058_v54 = vmul.f32 %v5748_v48, %v2038_v60  ;;  %v2059_v28 = vmul.f32 %v5748_v48, %v2039_v13  ;;  %v2172_v9 = vand.u32 2147483647, %v2156_v43  ;;  %v7922_v12 = vld [vmem:[#allocation44_spill] sm:$0xff]  ;;  %v7923_v40 = vld [vmem:[#allocation53_spill] sm:$0xff] }
 0x3a0   : > { %4411 = vset.pattern.permute.xlu1 %v7897_v62  ;;  %v7915_v2 = vand.u32 2147483647, %v6415_v15  ;;  %v7917_v61 = vand.u32 2147483647, %v7916_v31  ;;  %v1928_v30 = vadd.f32 %v1912_v20, %v1792_v25  ;;  %v2174_v11 = vand.u32 2147483647, %v2158_v1 }
 0x3a1   : > { %3084 = vperm.xlu1 %4411, %v7918_v0   ;;  %v2148_v60 = vadd.f32 %v7904_v35, %v7919_v55  ;;  %v2157_v6 = vadd.f32 %v7904_v35, %v7920_v22  ;;  %v7921_v15 = vld [vmem:[#allocation71_spill] sm:$0xff]  ;;  %v2159_v42 = vadd.f32 %v7904_v35, %v7922_v12  ;;  %v2072_v52 = vadd.f32 %v2056_v3, %v6510_v8  ;;  %v7926_v43 = vld [vmem:[#allocation6_spill] sm:$0xff]  ;;  %v7935_v22 = vld [vmem:[#allocation101_spill] sm:$0xff] }
 0x3a2   : > { %v2052_v27 = vmul.f32 %v5748_v48, %v7915_v2  ;;  %v2050_v19 = vmul.f32 %v5748_v48, %v7917_v61  ;;  %v6591_v26 = vpop.permute.xlu1 %2644  ;;  %v1929_v44 = vadd.f32 %v7921_v15, %v1793_v23  ;;  %v2073_v39 = vadd.f32 %v2057_v58, %v6513_v45  ;;  %v7927_v23 = vld [vmem:[#allocation104_spill] sm:$0xff]  ;;  %v7929_v45 = vld [vmem:[#allocation55_spill] sm:$0xff]  ;;  %v7931_v61 = vld [vmem:[#allocation42_spill] sm:$0xff] }
 0x3a3   : > { %v7924_v17 = vand.u32 2147483647, %v7923_v40  ;;  %v6603_v25 = vadd.f32 %v7926_v43, %v7925_v5  ;;  %v2074_v13 = vadd.f32 %v2058_v54, %v1938_v29  ;;  %v2075_v24 = vadd.f32 %v2059_v28, %v1939_v57  ;;  %v7932_v29 = vld [vmem:[#allocation98_spill] sm:$0xff]  ;;  %v7933_v54 = vld [vmem:[#allocation99_spill] sm:$0xff]  ;;  %v6632_v40 = vpop.permute.xlu0 %2936 }
 0x3a4   : > { %v2048_v1 = vmul.f32 %v5748_v48, %v2028_v63  ;;  %v6608_v20 = vadd.f32 %v7926_v43, %v7927_v23  ;;  %v2068_v35 = vadd.f32 %v2052_v27, %v1932_v18  ;;  %v2066_v8 = vadd.f32 %v2050_v19, %v1930_v49  ;;  %v7934_v27 = vld [vmem:[#allocation46_spill] sm:$0xff] }
 0x3a5   : > { %v2047_v16 = vmul.f32 %v5748_v48, %v7924_v17  ;;  %v7928_v3 = vmov 13   ;;  %v7930_v58 = vand.u32 2147483647, %v7929_v45  ;;  %v2164_v31 = vand.u32 2147483647, %v2148_v60 }
 0x3a6   : > { %4413 = vset.pattern.permute.xlu1 %v7928_v3  ;;  %v6616_v55 = vadd.f32 %v7926_v43, %v7931_v61  ;;  %v6620_v57 = vadd.f32 %v7926_v43, %v7932_v29  ;;  %v2173_v63 = vand.u32 2147483647, %v2157_v6  ;;  %v6623_v18 = vpop.permute.xlu1 %2676  ;;  %v2175_v49 = vand.u32 2147483647, %v2159_v42  ;;  %v7938_v29 = vld [vmem:[#allocation110_spill] sm:$0xff] }
 0x3a7   : > { %v2049_v2 = vmul.f32 %v5748_v48, %v7930_v58  ;;  %2952 = vperm.xlu1 %4413, %v7891_v46   ;;  %v2292_v28 = vadd.f32 %v7926_v43, %v7933_v54  ;;  %v2294_v48 = vadd.f32 %v7926_v43, %v7934_v27  ;;  %v2063_v19 = vadd.f32 %v2047_v16, %v1927_v37  ;;  %v7942_v27 = vld [vmem:[#allocation136_spill] sm:$0xff] }
 0x3a8   : > { %v2299_v60 = vand.u32 2147483647, %v6603_v25  ;;  %v2192_v15 = vmul.f32 %v7935_v22, %v2172_v9  ;;  %v2193_v12 = vmul.f32 %v7935_v22, %v2173_v63  ;;  %v2064_v6 = vadd.f32 %v2048_v1, %v1928_v30  ;;  %v7937_v30 = vld [vmem:[#allocation73_spill] sm:$0xff] }
 0x3a9   : > { %v2301_v17 = vand.u32 2147483647, %v6608_v20  ;;  %v2194_v42 = vmul.f32 %v7935_v22, %v2174_v11  ;;  %v2195_v5 = vmul.f32 %v7935_v22, %v2175_v49  ;;  %v2065_v23 = vadd.f32 %v2049_v2, %v1929_v44  ;;  %v7940_v2 = vld [vmem:[#allocation126_spill] sm:$0xff] }
 0x3aa   : > { %v2302_v45 = vand.u32 2147483647, %v6616_v55  ;;  %v2304_v37 = vand.u32 2147483647, %v6620_v57  ;;  %v2188_v16 = vmul.f32 %v7935_v22, %v2168_v38  ;;  %v2186_v9 = vmul.f32 %v7935_v22, %v2166_v10 }
 0x3ab   : > { %v7936_v25 = vmov 15   ;;  %v2308_v58 = vand.u32 2147483647, %v2292_v28  ;;  %v2310_v61 = vand.u32 2147483647, %v2294_v48  ;;  %v2284_v1 = vadd.f32 %v7926_v43, %v7937_v30  ;;  %v6647_v44 = vpop.permute.xlu1 %2940  ;;  %v7943_v30 = vld [vmem:[#allocation85_spill] sm:$0xff] }
 0x3ac   : > { %4414 = vset.pattern.permute.xlu1 %v7936_v25  ;;  %v2293_v11 = vadd.f32 %v7926_v43, %v7938_v29  ;;  %7939 = vst [vmem:[#allocation146_spill] sm:$0xff] %v6647_v44  ;;  %v2295_v55 = vadd.f32 %v7926_v43, %v7940_v2  ;;  %v2208_v38 = vadd.f32 %v2192_v15, %v2072_v52  ;;  %v6666_v43 = vpop.permute.xlu0 %2908  ;;  %v7947_v15 = vld [vmem:[#allocation106_spill] sm:$0xff]  ;;  %v7949_v2 = vld [vmem:[#allocation128_spill] sm:$0xff] }
 0x3ad   : > { %3184 = vperm.xlu1 %4414, %v7899_v32   ;;  %v2209_v57 = vadd.f32 %v2193_v12, %v2073_v39  ;;  %v2183_v10 = vmul.f32 %v7935_v22, %v2163_v36  ;;  %v2210_v63 = vadd.f32 %v2194_v42, %v2074_v13  ;;  %v2211_v49 = vadd.f32 %v2195_v5, %v2075_v24  ;;  %v7941_v32 = vld [vmem:[#allocation103_spill] sm:$0xff]  ;;  %v7945_v13 = vld [vmem:[#allocation105_spill] sm:$0xff] }
 0x3ae   : > { %v2184_v54 = vmul.f32 %v7935_v22, %v2164_v31  ;;  %v2185_v28 = vmul.f32 %v7935_v22, %v2165_v51  ;;  %v6660_v48 = vadd.f32 %v7942_v27, %v7941_v32  ;;  %v6664_v52 = vadd.f32 %v7942_v27, %v7943_v30  ;;  %7944 = vst [vmem:[#allocation16_spill] sm:$0xff] %v6666_v43  ;;  %v7946_v31 = vld [vmem:[#allocation125_spill] sm:$0xff] }
 0x3af   : > { %v2204_v39 = vadd.f32 %v2188_v16, %v2068_v35  ;;  %v2202_v4 = vadd.f32 %v2186_v9, %v2066_v8  ;;  %v2300_v36 = vand.u32 2147483647, %v2284_v1  ;;  %v6670_v24 = vadd.f32 %v7942_v27, %v7945_v13  ;;  %v7948_v35 = vld [vmem:[#allocation127_spill] sm:$0xff] }
 0x3b0   : > { %v2309_v7 = vand.u32 2147483647, %v2293_v11  ;;  %v6674_v51 = vadd.f32 %v7942_v27, %v7946_v31  ;;  %v2311_v22 = vand.u32 2147483647, %v2295_v55  ;;  %v2428_v12 = vadd.f32 %v7942_v27, %v7947_v15  ;;  %v6681_v42 = vpop.permute.xlu1 %3172 }
 0x3b1   : > { %4415 = vset.pattern.permute.xlu1 %v7928_v3  ;;  %v2328_v8 = vmul.f32 %v7948_v35, %v2308_v58  ;;  %v2199_v5 = vadd.f32 %v2183_v10, %v2063_v19  ;;  %v2330_v9 = vmul.f32 %v7948_v35, %v2310_v61  ;;  %v2200_v1 = vadd.f32 %v2184_v54, %v2064_v6  ;;  %v7950_v6 = vld [vmem:[#allocation129_spill] sm:$0xff] }
 0x3b2   : > { %2924 = vperm.xlu1 %4415, %v7906_v50   ;;  %v2329_v16 = vmul.f32 %v7948_v35, %v2309_v7  ;;  %v2201_v29 = vadd.f32 %v2185_v28, %v2065_v23  ;;  %v2430_v55 = vadd.f32 %v7942_v27, %v7949_v2  ;;  %v2331_v58 = vmul.f32 %v7948_v35, %v2311_v22  ;;  %v6698_v28 = vpop.permute.xlu0 %2948  ;;  %v7951_v7 = vld [vmem:[#allocation133_spill] sm:$0xff]  ;;  %v7952_v2 = vld [vmem:[#allocation119_spill] sm:$0xff] }
 0x3b3   : > { %v2440_v30 = vand.u32 2147483647, %v6674_v51  ;;  %v2324_v19 = vmul.f32 %v7948_v35, %v2304_v37  ;;  %v2322_v10 = vmul.f32 %v7948_v35, %v2302_v45  ;;  %v2444_v61 = vand.u32 2147483647, %v2428_v12 }
 0x3b4   : > { %v6696_v23 = vadd.f32 %v7942_v27, %v7950_v6  ;;  %v2344_v54 = vadd.f32 %v2328_v8, %v2208_v38  ;;  %v2319_v13 = vmul.f32 %v7948_v35, %v2299_v60  ;;  %v2429_v31 = vadd.f32 %v7942_v27, %v7951_v7  ;;  %v7953_v8 = vld [vmem:[#allocation131_spill] sm:$0xff] }
 0x3b5   : > { %v2345_v51 = vadd.f32 %v2329_v16, %v2209_v57  ;;  %v2346_v22 = vadd.f32 %v2330_v9, %v2210_v63  ;;  %v2513_v37 = vpop.permute.xlu1 %2512  ;;  %v2320_v45 = vmul.f32 %v7948_v35, %v2300_v36  ;;  %v2446_v15 = vand.u32 2147483647, %v2430_v55  ;;  %v7954_v60 = vld [vmem:[#allocation135_spill] sm:$0xff]  ;;  %v7955_v36 = vld [vmem:[#allocation92_spill] sm:$0xff] }
 0x3b6   : > { %2956 = vperm.xlu1 %4415, %v7855_v56   ;;  %v2347_v12 = vadd.f32 %v2331_v58, %v2211_v49  ;;  %v2561_v6 = vadd.f32 %v7952_v2, %v2513_v37  ;;  %v2321_v38 = vmul.f32 %v7948_v35, %v2301_v17  ;;  %v6711_v3 = vadd.f32 %v7952_v2, %v7953_v8  ;;  %v7956_v9 = vld [vmem:[#allocation79_spill] sm:$0xff]  ;;  %v7957_v17 = vld [vmem:[#allocation132_spill] sm:$0xff]  ;;  %v7958_v37 = vld [vmem:[#allocation134_spill] sm:$0xff] }
 0x3b7   : > { %v2431_v7 = vadd.f32 %v7942_v27, %v7954_v60  ;;  %v2340_v57 = vadd.f32 %v2324_v19, %v2204_v39  ;;  %v2338_v63 = vadd.f32 %v2322_v10, %v2202_v4  ;;  %v2436_v16 = vand.u32 2147483647, %v6696_v23  ;;  %v7959_v4 = vld [vmem:[#allocation137_spill] sm:$0xff]  ;;  %v6730_v10 = vpop.permute.xlu0 %2920  ;;  %v7960_v23 = vld [vmem:[#allocation147_spill] sm:$0xff] }
 0x3b8   : > { %v2705_v49 = vadd.f32 %v7956_v9, %v7955_v36  ;;  %v2577_v55 = vand.u32 2147483647, %v2561_v6  ;;  %v6719_v20 = vadd.f32 %v2319_v13, %v2199_v5  ;;  %v2557_v35 = vadd.f32 %v7952_v2, %v7957_v17  ;;  %v7961_v36 = vld [vmem:[#allocation138_spill] sm:$0xff] }
 0x3b9   : > { %v2445_v58 = vand.u32 2147483647, %v2429_v31  ;;  %v2558_v8 = vadd.f32 %v7952_v2, %v7958_v37  ;;  %v2545_v27 = vpop.permute.xlu1 %2544  ;;  %v2336_v39 = vadd.f32 %v2320_v45, %v2200_v1  ;;  %v6728_v19 = vadd.f32 %v7956_v9, %v7959_v4  ;;  %v7962_v37 = vld [vmem:[#allocation143_spill] sm:$0xff] }
 0x3ba   : > { %4416 = vset.pattern.permute.xlu1 %v7936_v25  ;;  %v2597_v5 = vmul.f32 %v7960_v23, %v2577_v55  ;;  %v2569_v13 = vadd.f32 %v7952_v2, %v2545_v27  ;;  %v2337_v6 = vadd.f32 %v2321_v38, %v2201_v29  ;;  %v2571_v31 = vand.u32 2147483647, %v6711_v3  ;;  %v7967_v27 = vld [vmem:[#allocation150_spill] sm:$0xff] }
 0x3bb   : > { %3220 = vperm.xlu1 %4416, %v7918_v0   ;;  %v2447_v60 = vand.u32 2147483647, %v2431_v7  ;;  %v2464_v17 = vmul.f32 %v7961_v36, %v2444_v61  ;;  %v2465_v0 = vmul.f32 %v7961_v36, %v2445_v58  ;;  %v2466_v1 = vmul.f32 %v7961_v36, %v2446_v15  ;;  %v7963_v61 = vld [vmem:[#allocation139_spill] sm:$0xff]  ;;  %v7964_v15 = vld [vmem:[#allocation148_spill] sm:$0xff] }
 0x3bc   : > { %v2721_v45 = vand.u32 2147483647, %v2705_v49  ;;  %v6739_v4 = vadd.f32 %v2597_v5, %v7962_v37  ;;  %v2585_v11 = vand.u32 2147483647, %v2569_v13  ;;  %v2573_v32 = vand.u32 2147483647, %v2557_v35 }
 0x3bd   : > { %v2574_v44 = vand.u32 2147483647, %v2558_v8  ;;  %v2467_v55 = vmul.f32 %v7961_v36, %v2447_v60  ;;  %v2460_v29 = vmul.f32 %v7961_v36, %v2440_v30  ;;  %v6747_v38 = vadd.f32 %v7956_v9, %v7963_v61  ;;  %v7966_v58 = vld [vmem:[#allocation140_spill] sm:$0xff]  ;;  %v7969_v61 = vld [vmem:[#allocation58_spill] sm:$0xff] }
 0x3be   : > { %v2564_v7 = vadd.f32 %v7952_v2, %v7964_v15  ;;  %v2605_v49 = vmul.f32 %v7960_v23, %v2585_v11  ;;  %v6753_v35 = vpop.permute.xlu1 %2808  ;;  %v2556_v30 = vadd.f32 %v7952_v2, %v7966_v58  ;;  %v2480_v8 = vadd.f32 %v2464_v17, %v2344_v54  ;;  %v6763_v11 = vpop.permute.xlu0 %3072  ;;  %v7972_v54 = vld [vmem:[#allocation152_spill] sm:$0xff] }
 0x3bf   : > { %4417 = vset.pattern.permute.xlu1 %v7897_v62  ;;  %7965 = vst [vmem:[#allocation57_spill] sm:$0xff] %v6753_v35  ;;  %v2481_v62 = vadd.f32 %v2465_v0, %v2345_v51  ;;  %v2565_v5 = vadd.f32 %v7952_v2, %v7967_v27  ;;  %v2482_v13 = vadd.f32 %v2466_v1, %v2346_v22  ;;  %v7968_v60 = vand.u32 2147483647, %v6670_v24  ;;  %v7971_v35 = vld [vmem:[#allocation151_spill] sm:$0xff] }
 0x3c0   : > { %3088 = vperm.xlu1 %4417, %v7891_v46   ;;  %v2741_v15 = vmul.f32 %v7969_v61, %v2721_v45  ;;  %v7970_v46 = vld [vmem:[#allocation144_spill] sm:$0xff]  ;;  %v2566_v43 = vadd.f32 %v7952_v2, %v7971_v35  ;;  %v2483_v58 = vadd.f32 %v2467_v55, %v2347_v12  ;;  %v2567_v51 = vadd.f32 %v7952_v2, %v7972_v54 }
 0x3c1   : > { %v2458_v37 = vmul.f32 %v7961_v36, %v7968_v60  ;;  %v2621_v3 = vadd.f32 %v2605_v49, %v7970_v46  ;;  %v2476_v17 = vadd.f32 %v2460_v29, %v2340_v57  ;;  %v2580_v0 = vand.u32 2147483647, %v2564_v7  ;;  %v7975_v60 = vld [vmem:[#allocation86_spill] sm:$0xff]  ;;  %v7977_v7 = vld [vmem:[#allocation141_spill] sm:$0xff] }
 0x3c2   : > { %v7973_v24 = vand.u32 2147483647, %v6660_v48  ;;  %v2456_v1 = vmul.f32 %v7961_v36, %v2436_v16  ;;  %v2572_v49 = vand.u32 2147483647, %v2556_v30  ;;  %v2581_v27 = vand.u32 2147483647, %v2565_v5 }
 0x3c3   : > { %v6775_v45 = vadd.f32 %v2741_v15, %v2621_v3  ;;  %v2560_v12 = vadd.f32 %v7952_v2, %v7975_v60  ;;  %v6779_v55 = vpop.permute.xlu1 %3040  ;;  %v7976_v57 = vand.u32 2147483647, %v6664_v52  ;;  %v2700_v48 = vadd.f32 %v7956_v9, %v7977_v7  ;;  %v7979_v52 = vld [vmem:[#allocation120_spill] sm:$0xff] }
 0x3c4   : > { %3060 = vperm.xlu1 %4417, %v7906_v50   ;;  %v2455_v22 = vmul.f32 %v7961_v36, %v7973_v24  ;;  %v2474_v35 = vadd.f32 %v2458_v37, %v2338_v63  ;;  %v2594_v46 = vmul.f32 %v7960_v23, %v2574_v44  ;;  %v2591_v16 = vmul.f32 %v7960_v23, %v2571_v31  ;;  %v7978_v24 = vld [vmem:[#allocation149_spill] sm:$0xff] }
 0x3c5   : > { %7974 = vst [vmem:[#allocation88_spill] sm:$0xff] %v6775_v45  ;;  %v2457_v29 = vmul.f32 %v7961_v36, %v7976_v57  ;;  %v2582_v3 = vand.u32 2147483647, %v2566_v43  ;;  %v2583_v30 = vand.u32 2147483647, %v2567_v51  ;;  %v2592_v5 = vmul.f32 %v7960_v23, %v2572_v49  ;;  %v6795_v36 = vpop.permute.xlu0 %3044  ;;  %v7980_v37 = vld [vmem:[#allocation97_spill] sm:$0xff] }
 0x3c6   : > { %v2593_v15 = vmul.f32 %v7960_v23, %v2573_v32  ;;  %v2600_v54 = vmul.f32 %v7960_v23, %v2580_v0  ;;  %v6793_v60 = vadd.f32 %v7979_v52, %v7978_v24  ;;  %v2471_v44 = vadd.f32 %v2455_v22, %v6719_v20  ;;  %v7981_v32 = vld [vmem:[#allocation12_spill] sm:$0xff]  ;;  %v8008_v45 = vld [vmem:[#allocation130_spill] sm:$0xff] }
 0x3c7   : > { %v2472_v63 = vadd.f32 %v2456_v1, %v2336_v39  ;;  %v2601_v43 = vmul.f32 %v7960_v23, %v2581_v27  ;;  %v2576_v31 = vand.u32 2147483647, %v2560_v12  ;;  %v2693_v51 = vadd.f32 %v7956_v9, %v7980_v37  ;;  %v6803_v0 = vpop.permute.xlu1 %3132  ;;  %v7982_v37 = vld [vmem:[#allocation77_spill] sm:$0xff] }
 0x3c8   : > { %4419 = vset.pattern.permute.xlu1 %v7936_v25  ;;  %v2473_v49 = vadd.f32 %v2457_v29, %v2337_v6  ;;  %v2708_v57 = vand.u32 2147483647, %v6747_v38  ;;  %v2716_v7 = vand.u32 2147483647, %v2700_v48  ;;  %v6806_v24 = vadd.f32 %v2594_v46, %v2474_v35  ;;  %v7983_v35 = vld [vmem:[#allocation89_spill] sm:$0xff] }
 0x3c9   : > { %3192 = vperm.xlu1 %4419, %v7981_v32   ;;  %v2607_v25 = vadd.f32 %v2591_v16, %v2471_v44  ;;  %v2602_v20 = vmul.f32 %v7960_v23, %v2582_v3  ;;  %v2603_v39 = vmul.f32 %v7960_v23, %v2583_v30  ;;  %v2608_v22 = vadd.f32 %v2592_v5, %v2472_v63  ;;  %v6825_v3 = vpop.permute.xlu0 %3080  ;;  %v7986_v63 = vld [vmem:[#allocation80_spill] sm:$0xff] }
 0x3ca   : > { %v2609_v1 = vadd.f32 %v2593_v15, %v2473_v49  ;;  %v2616_v27 = vadd.f32 %v2600_v54, %v2480_v8  ;;  %v6813_v32 = vadd.f32 %v7979_v52, %v7982_v37  ;;  %v2696_v6 = vadd.f32 %v7956_v9, %v6591_v26  ;;  %v7984_v8 = vld [vmem:[#allocation83_spill] sm:$0xff] }
 0x3cb   : > { %v6817_v38 = vadd.f32 %v2601_v43, %v2481_v62  ;;  %v2596_v29 = vmul.f32 %v7960_v23, %v2576_v31  ;;  %v2709_v48 = vand.u32 2147483647, %v2693_v51  ;;  %v2698_v46 = vadd.f32 %v7956_v9, %v7983_v35  ;;  %v7987_v51 = vld [vmem:[#allocation90_spill] sm:$0xff] }
 0x3cc   : > { %v2568_v16 = vadd.f32 %v7952_v2, %v7984_v8  ;;  %v2517_v30 = vpop.permute.xlu1 %2516  ;;  %v7985_v5 = vand.u32 2147483647, %v6728_v19  ;;  %v2728_v62 = vmul.f32 %v7969_v61, %v2708_v57  ;;  %v2736_v15 = vmul.f32 %v7969_v61, %v2716_v7  ;;  %v7988_v8 = vld [vmem:[#allocation31_spill] sm:$0xff] }
 0x3cd   : > { %3196 = vperm.xlu1 %4419, %v7906_v50   ;;  %v6832_v54 = vadd.f32 %v2602_v20, %v2482_v13  ;;  %v6834_v44 = vadd.f32 %v2603_v39, %v2483_v58  ;;  %v2701_v50 = vadd.f32 %v7956_v9, %v7986_v63  ;;  %v2562_v43 = vadd.f32 %v7952_v2, %v2517_v30  ;;  %v7993_v63 = vld [vmem:[#allocation145_spill] sm:$0xff] }
 0x3ce   : > { %v2727_v26 = vmul.f32 %v7969_v61, %v7985_v5  ;;  %v2844_v31 = vand.u32 2147483647, %v6813_v32  ;;  %v2694_v19 = vadd.f32 %v7956_v9, %v7987_v51  ;;  %v2712_v49 = vand.u32 2147483647, %v2696_v6  ;;  %v7989_v6 = vld [vmem:[#allocation81_spill] sm:$0xff]  ;;  %v7991_v5 = vld [vmem:[#allocation78_spill] sm:$0xff] }
 0x3cf   : > { %v2704_v57 = vadd.f32 %v7956_v9, %v6623_v18  ;;  %v2612_v37 = vadd.f32 %v2596_v29, %v2476_v17  ;;  %v2714_v7 = vand.u32 2147483647, %v2698_v46  ;;  %v2578_v13 = vand.u32 2147483647, %v2562_v43  ;;  %v7990_v18 = vld [vmem:[#allocation95_spill] sm:$0xff]  ;;  %v7994_v43 = vld [vmem:[#allocation66_spill] sm:$0xff] }
 0x3d0   : > { %v2729_v58 = vmul.f32 %v7969_v61, %v2709_v48  ;;  %v2584_v20 = vand.u32 2147483647, %v2568_v16  ;;  %v6846_v39 = vadd.f32 %v2727_v26, %v2607_v25  ;;  %v6848_v2 = vadd.f32 %v2728_v62, %v2608_v22  ;;  %v6860_v25 = vpop.permute.xlu0 %3052  ;;  %v7992_v62 = vld [vmem:[#allocation65_spill] sm:$0xff] }
 0x3d1   : > { %3228 = vperm.xlu1 %4419, %v7855_v56   ;;  %v6850_v32 = vadd.f32 %v2736_v15, %v2616_v27  ;;  %v2717_v35 = vand.u32 2147483647, %v2701_v50  ;;  %v6854_v30 = vadd.f32 %v7989_v6, %v7988_v8  ;;  %v2702_v17 = vadd.f32 %v7956_v9, %v7990_v18  ;;  %v2781_v56 = vpop.permute.xlu1 %2780 }
 0x3d2   : > { %v2598_v29 = vmul.f32 %v7960_v23, %v2578_v13  ;;  %v2710_v46 = vand.u32 2147483647, %v2694_v19  ;;  %v2732_v48 = vmul.f32 %v7969_v61, %v2712_v49  ;;  %v2720_v22 = vand.u32 2147483647, %v2704_v57 }
 0x3d3   : > { %v2832_v27 = vadd.f32 %v7979_v52, %v2781_v56  ;;  %v2734_v16 = vmul.f32 %v7969_v61, %v2714_v7  ;;  %v2829_v26 = vadd.f32 %v7979_v52, %v7991_v5  ;;  %v2836_v15 = vadd.f32 %v7979_v52, %v7992_v62 }
 0x3d4   : > { %v2614_v50 = vadd.f32 %v2598_v29, %v7993_v63  ;;  %v2837_v51 = vadd.f32 %v7979_v52, %v7994_v43  ;;  %v2604_v19 = vmul.f32 %v7960_v23, %v2584_v20  ;;  %v2745_v13 = vadd.f32 %v2729_v58, %v2609_v1  ;;  %v7996_v29 = vld [vmem:[#allocation36_spill] sm:$0xff] }
 0x3d5   : > { %v2848_v49 = vand.u32 2147483647, %v2832_v27  ;;  %v2737_v57 = vmul.f32 %v7969_v61, %v2717_v35  ;;  %v2718_v8 = vand.u32 2147483647, %v2702_v17  ;;  %v2976_v7 = vadd.f32 %v7989_v6, %v6698_v28  ;;  %v2813_v18 = vpop.permute.xlu1 %2812  ;;  %v7997_v17 = vld [vmem:[#allocation142_spill] sm:$0xff]  ;;  %v3057_v28 = vpop.permute.xlu0 %3056 }
 0x3d6   : > { %v6875_v56 = vadd.f32 %v2734_v16, %v2614_v50  ;;  %v2748_v5 = vadd.f32 %v2732_v48, %v2612_v37  ;;  %v2740_v62 = vmul.f32 %v7969_v61, %v2720_v22  ;;  %v2840_v43 = vadd.f32 %v7979_v52, %v2813_v18  ;;  %v7998_v48 = vld [vmem:[#allocation33_spill] sm:$0xff]  ;;  %v7999_v50 = vld [vmem:[#allocation67_spill] sm:$0xff] }
 0x3d7   : > { %v2868_v63 = vmul.f32 %v7996_v29, %v2848_v49  ;;  %v2730_v1 = vmul.f32 %v7969_v61, %v2710_v46  ;;  %v2845_v58 = vand.u32 2147483647, %v2829_v26  ;;  %v2852_v20 = vand.u32 2147483647, %v2836_v15 }
 0x3d8   : > { %7995 = vst [vmem:[#allocation60_spill] sm:$0xff] %v6875_v56  ;;  %v2853_v35 = vand.u32 2147483647, %v2837_v51  ;;  %v2620_v27 = vadd.f32 %v2604_v19, %v7997_v17  ;;  %v2856_v16 = vand.u32 2147483647, %v2840_v43  ;;  %v2738_v37 = vmul.f32 %v7969_v61, %v2718_v8 }
 0x3d9   : > { %v6883_v12 = vadd.f32 %v2868_v63, %v2748_v5  ;;  %v6888_v22 = vadd.f32 %v7989_v6, %v7998_v48  ;;  %v2838_v49 = vadd.f32 %v7979_v52, %v7999_v50  ;;  %v8000_v46 = vand.u32 2147483647, %v6793_v60 }
 0x3da   : > { %v2992_v15 = vand.u32 2147483647, %v2976_v7  ;;  %v2756_v51 = vadd.f32 %v2740_v62, %v2620_v27  ;;  %v2876_v19 = vmul.f32 %v7996_v29, %v2856_v16  ;;  %v6896_v18 = vpop.permute.xlu1 %3076  ;;  %v2864_v5 = vmul.f32 %v7996_v29, %v2844_v31 }
 0x3db   : > { %v2863_v26 = vmul.f32 %v7996_v29, %v8000_v46  ;;  %v2753_v8 = vadd.f32 %v2737_v57, %v6817_v38  ;;  %v2833_v63 = vadd.f32 %v7979_v52, %v6516_v59  ;;  %v2872_v43 = vmul.f32 %v7996_v29, %v2852_v20  ;;  %v8001_v38 = vld [vmem:[#allocation69_spill] sm:$0xff]  ;;  %v8003_v59 = vld [vmem:[#allocation74_spill] sm:$0xff]  ;;  %v8006_v46 = vld [vmem:[#allocation107_spill] sm:$0xff] }
 0x3dc   : > { %v2865_v17 = vmul.f32 %v7996_v29, %v2845_v58  ;;  %v6905_v60 = vadd.f32 %v2730_v1, %v6806_v24  ;;  %v2892_v7 = vadd.f32 %v2876_v19, %v2756_v51  ;;  %v2873_v62 = vmul.f32 %v7996_v29, %v2853_v35  ;;  %v8002_v57 = vld [vmem:[#allocation121_spill] sm:$0xff]  ;;  %v6923_v24 = vld [vmem:[%s7408_s8] sm:$0xff]   ;;  %v6926_v58 = vpop.permute.xlu0 %3092  ;;  %v6934_v35 = vld [vmem:[%s7408_s8 + $0x10] sm:$0xff]  }
 0x3dd   : > { %v3012_v27 = vmul.f32 %v6529_v53, %v2992_v15  ;;  %v6910_v16 = vadd.f32 %v2738_v37, %v6832_v54  ;;  %v2854_v31 = vand.u32 2147483647, %v2838_v49  ;;  %v6914_v48 = vadd.f32 %v8002_v57, %v8001_v38  ;;  %8004 = vst [vmem:[#allocation62_spill] sm:$0xff] %v6926_v58 }
 0x3de   : > { %v6918_v20 = vadd.f32 %v8002_v57, %v8003_v59  ;;  %v6929_v54 = vadd.f32 %v2863_v26, %v6846_v39  ;;  %v6937_v37 = vadd.f32 %v2864_v5, %v6848_v2  ;;  %v2849_v49 = vand.u32 2147483647, %v2833_v63 }
 0x3df   : > { %v6939_v50 = vadd.f32 %v3012_v27, %v2892_v7  ;;  %v2830_v15 = vadd.f32 %v7979_v52, %v8006_v46  ;;  %v2649_v51 = vpop.permute.xlu1 %2648  ;;  %v6944_v19 = vadd.f32 %v2872_v43, %v6850_v32  ;;  %v6946_v39 = vadd.f32 %v2865_v17, %v2745_v13 }
 0x3e0   : > { %v2969_v26 = vadd.f32 %v7989_v6, %v6730_v10  ;;  %v2697_v38 = vadd.f32 %v7956_v9, %v2649_v51  ;;  %v3908_v2 = vunpack.c.0.s8 %v6923_v24  ;;  %v6952_v5 = vadd.f32 %v2873_v62, %v2753_v8  ;;  %v3201_v46 = vpop.permute.xlu0 %3200 }
 0x3e1   : > { %8005 = vst [vmem:[#allocation14_spill] sm:$0xff] %v6939_v50  ;;  %v6955_v63 = vmul.f32 %v7996_v29, %v2854_v31  ;;  %v3115_v7 = vand.u32 2147483647, %v6914_v48  ;;  %v3123_v27 = vand.u32 2147483647, %v6918_v20  ;;  %v3924_v32 = vunpack.c.0.s8 %v6934_v35 }
 0x3e2   : > { %v2971_v13 = vadd.f32 %v7989_v6, %v6556_v14  ;;  %v2713_v43 = vand.u32 2147483647, %v2697_v38  ;;  %v3909_v10 = vunpack.c.1.s8 %v6923_v24  ;;  %v3928_v17 = vunpack.c.2.s8 %v6934_v35 }
 0x3e3   : > { %v2869_v8 = vmul.f32 %v7996_v29, %v2849_v49  ;;  %v2846_v62 = vand.u32 2147483647, %v2830_v15  ;;  %v2964_v31 = vadd.f32 %v7989_v6, %v6589_v47  ;;  %v3925_v48 = vunpack.c.1.s8 %v6934_v35 }
 0x3e4   : > { %v2985_v59 = vand.u32 2147483647, %v2969_v26  ;;  %v3105_v20 = vadd.f32 %v8002_v57, %v3057_v28  ;;  %v2733_v51 = vmul.f32 %v7969_v61, %v2713_v43  ;;  %v6970_v14 = vpop.permute.xlu1 %2912  ;;  %v6972_v38 = vcvt.s32.f32 %v3908_v2 }
 0x3e5   : > { %8007 = vst [vmem:[#allocation108_spill] sm:$0xff] %v6970_v14  ;;  %v3100_v1 = vadd.f32 %v8002_v57, %v6430_v41  ;;  %v2973_v49 = vadd.f32 %v7989_v6, %v6632_v40  ;;  %v6978_v15 = vcvt.s32.f32 %v3924_v32  ;;  %v3912_v47 = vunpack.c.2.s8 %v6923_v24  ;;  %v8013_v14 = vld [vmem:[#allocation38_spill] sm:$0xff] }
 0x3e6   : > { %v2987_v26 = vand.u32 2147483647, %v2971_v13  ;;  %v2749_v28 = vadd.f32 %v2733_v51, %v6739_v4  ;;  %v6982_v23 = vcvt.s32.f32 %v3909_v10  ;;  %v6984_v43 = vcvt.s32.f32 %v3928_v17 }
 0x3e7   : > { %v6987_v2 = vmul.f32 %v7996_v29, %v2846_v62  ;;  %v2980_v56 = vand.u32 2147483647, %v2964_v31  ;;  %v3108_v41 = vadd.f32 %v8002_v57, %v8008_v45  ;;  %v6991_v50 = vcvt.s32.f32 %v3925_v48  ;;  %v3205_v45 = vpop.permute.xlu0 %3204 }
 0x3e8   : > { %v6995_v40 = vadd.f32 %v7989_v6, %v6501_v34  ;;  %v3121_v32 = vand.u32 2147483647, %v3105_v20  ;;  %v2885_v13 = vadd.f32 %v2869_v8, %v2749_v28  ;;  %v6997_v4 = vpop.permute.xlu1 %2944  ;;  %v3005_v10 = vmul.f32 %v6529_v53, %v2985_v59  ;;  %v8010_v59 = vld [vmem:[#allocation82_spill] sm:$0xff] }
 0x3e9   : > { %v3116_v17 = vand.u32 2147483647, %v3100_v1  ;;  %v2989_v51 = vand.u32 2147483647, %v2973_v49  ;;  %v3109_v62 = vadd.f32 %v8002_v57, %v6763_v11  ;;  %v7002_v31 = vcvt.s32.f32 %v3912_v47 }
 0x3ea   : > { %v8009_v48 = vand.u32 2147483647, %v6854_v30  ;;  %v3007_v34 = vmul.f32 %v6529_v53, %v2987_v26  ;;  %v3021_v20 = vadd.f32 %v3005_v10, %v2885_v13  ;;  %v3141_v8 = vmul.f32 %v6803_v0, %v3121_v32 }
 0x3eb   : > { %v3124_v28 = vand.u32 2147483647, %v3108_v41  ;;  %v7011_v1 = vadd.f32 %v7956_v9, %v6477_v21  ;;  %v3235_v11 = vadd.f32 %v8010_v59, %v6562_v33  ;;  %v3236_v49 = vadd.f32 %v8010_v59, %v6681_v42 }
 0x3ec   : > { %v2999_v58 = vmul.f32 %v6529_v53, %v8009_v48  ;;  %vm3351_vm1 = vcmp.gt.f32.partialorder %v6972_v38, 0.0  ;;  %vm3359_vm2 = vcmp.gt.f32.partialorder %v6978_v15, 0.0  ;;  %v2981_v30 = vand.u32 2147483647, %v6995_v40 }
 0x3ed   : > { %v3243_v47 = vadd.f32 %v8010_v59, %v3201_v46  ;;  %v3000_v26 = vmul.f32 %v6529_v53, %v2980_v56  ;;  %v7022_v41 = vadd.f32 %v3141_v8, %v3021_v20  ;;  %v3209_v21 = vpop.permute.xlu1 %3208  ;;  %v3135_v32 = vmul.f32 %v6803_v0, %v3115_v7 }
 0x3ee   : > { %v3143_v33 = vmul.f32 %v6803_v0, %v3123_v27  ;;  %v3009_v13 = vmul.f32 %v6529_v53, %v2989_v51  ;;  %v8012_v42 = vand.u32 2147483647, %v6888_v22  ;;  %v3125_v48 = vand.u32 2147483647, %v3109_v62  ;;  %v3177_v27 = vpop.permute.xlu0 %3176 }
 0x3ef   : > { %8011 = vst [vmem:[#allocation109_spill] sm:$0xff] %v7022_v41  ;;  %v3245_v40 = vadd.f32 %v8010_v59, %v3209_v21  ;;  %v3015_v46 = vadd.f32 %v2999_v58, %v6929_v54  ;;  %v3023_v56 = vadd.f32 %v3007_v34, %v8013_v14  ;;  %v3251_v20 = vand.u32 2147483647, %v3235_v11 }
 0x3f0   : > { %v3008_v10 = vmul.f32 %v6529_v53, %v8012_v42  ;;  %v3252_v8 = vand.u32 2147483647, %v3236_v49  ;;  %v3244_v41 = vadd.f32 %v8010_v59, %v3205_v45  ;;  %v3101_v7 = vadd.f32 %v8002_v57, %v6779_v55 }
 0x3f1   : > { %vm3352_vm3 = vcmp.gt.f32.partialorder %v6982_v23, 0.0  ;;  %vm3361_vm4 = vcmp.gt.f32.partialorder %v6984_v43, 0.0  ;;  %v3259_v22 = vand.u32 2147483647, %v3243_v47  ;;  %v3261_v51 = vand.u32 2147483647, %v3245_v40  ;;  %v7040_v54 = vpop.permute.xlu1 %3268 }
 0x3f2   : > { %v3136_v62 = vmul.f32 %v6803_v0, %v3116_v17  ;;  %v3145_v58 = vmul.f32 %v6803_v0, %v3125_v48  ;;  %v3151_v14 = vadd.f32 %v3135_v32, %v3015_v46  ;;  %v3159_v34 = vadd.f32 %v3143_v33, %v3023_v56 }
 0x3f3   : > { %v3016_v45 = vadd.f32 %v3000_v26, %v6937_v37  ;;  %v3025_v11 = vadd.f32 %v3009_v13, %v6952_v5  ;;  %v3271_v55 = vmul.f32 %v7040_v54, %v3251_v20  ;;  %v3279_v49 = vmul.f32 %v7040_v54, %v3259_v22  ;;  %v8014_v22 = vld [vmem:[#allocation16_spill] sm:$0xff] }
 0x3f4   : > { %v3272_v47 = vmul.f32 %v7040_v54, %v3252_v8  ;;  %v3281_v21 = vmul.f32 %v7040_v54, %v3261_v51  ;;  %v3260_v42 = vand.u32 2147483647, %v3244_v41  ;;  %v3237_v17 = vadd.f32 %v8010_v59, %v3177_v27 }
 0x3f5   : > { %v3117_v48 = vand.u32 2147483647, %v3101_v7  ;;  %v3144_v40 = vmul.f32 %v6803_v0, %v3124_v28  ;;  %vm3360_vm5 = vcmp.gt.f32.partialorder %v6991_v50, 0.0  ;;  %v3287_v32 = vadd.f32 %v3271_v55, %v3151_v14 }
 0x3f6   : > { %v3295_v37 = vadd.f32 %v3279_v49, %v3159_v34  ;;  %v3152_v26 = vadd.f32 %v3136_v62, %v3016_v45  ;;  %v3161_v5 = vadd.f32 %v3145_v58, %v3025_v11  ;;  %v7053_v33 = vadd.f32 %v6987_v2, %v6905_v60  ;;  %v2685_v56 = vpop.permute.xlu1 %2684  ;;  %v8015_v2 = vld [vmem:[#allocation57_spill] sm:$0xff]  ;;  %v8016_v62 = vld [vmem:[#allocation146_spill] sm:$0xff] }
 0x3f7   : > { %v3024_v13 = vadd.f32 %v3008_v10, %v6944_v19  ;;  %v3280_v46 = vmul.f32 %v7040_v54, %v3260_v42  ;;  %v3001_v41 = vmul.f32 %v6529_v53, %v2981_v30  ;;  %v7060_v28 = vsel %vm3351_vm1, %v3287_v32, -1e+30 }
 0x3f8   : > { %v7064_v20 = vsel %vm3359_vm2, %v3295_v37, -1e+30  ;;  %v3288_v8 = vadd.f32 %v3272_v47, %v3152_v26  ;;  %v3297_v7 = vadd.f32 %v3281_v21, %v3161_v5  ;;  %v2966_v60 = vadd.f32 %v7989_v6, %v8014_v22  ;;  %3383 = vmax.xlane.f32.xlu0 %v7060_v28 }
 0x3f9   : > { %v2839_v19 = vadd.f32 %v7979_v52, %v8015_v2  ;;  %v2706_v10 = vadd.f32 %v7956_v9, %v2685_v56  ;;  %3399 = vmax.xlane.f32.xlu1 %v7064_v20  ;;  %vm3353_vm6 = vcmp.gt.f32.partialorder %v7002_v31, 0.0  ;;  %v3913_v38 = vunpack.c.3.s8 %v6923_v24 }
 0x3fa   : > { %v2719_v15 = vand.u32 2147483647, %v7011_v1  ;;  %v3253_v30 = vand.u32 2147483647, %v3237_v17  ;;  %v3160_v27 = vadd.f32 %v3144_v40, %v3024_v13  ;;  %v3137_v51 = vmul.f32 %v6803_v0, %v3117_v48  ;;  %v8017_v48 = vld [vmem:[#allocation63_spill] sm:$0xff] }
 0x3fb   : > { %v2974_v58 = vadd.f32 %v7989_v6, %v8016_v62  ;;  %v2975_v9 = vadd.f32 %v7989_v6, %v6997_v4  ;;  %v2722_v14 = vand.u32 2147483647, %v2706_v10  ;;  %v3017_v34 = vadd.f32 %v3001_v41, %v6946_v39  ;;  %v2917_v21 = vpop.permute.xlu1 %2916  ;;  %v7133_v62 = vld [vmem:[%s7408_s8 + $0x18] sm:$0xff]  }
 0x3fc   : > { %v7084_v45 = vsel %vm3352_vm3, %v3288_v8, -1e+30  ;;  %v7088_v24 = vsel %vm3361_vm4, %v3297_v7, -1e+30  ;;  %v3296_v1 = vadd.f32 %v3280_v46, %v3160_v27  ;;  %v3273_v11 = vmul.f32 %v7040_v54, %v3253_v30  ;;  %v3217_v8 = vpop.permute.xlu0 %3216 }
 0x3fd   : > { %v2982_v55 = vand.u32 2147483647, %v2966_v60  ;;  %v3102_v49 = vadd.f32 %v8002_v57, %v6795_v36  ;;  %v2855_v47 = vand.u32 2147483647, %v2839_v19  ;;  %v2742_v4 = vmul.f32 %v7969_v61, %v2722_v14  ;;  %3385 = vmax.xlane.f32.xlu0 %v7084_v45  ;;  %3403 = vmax.xlane.f32.xlu1 %v7088_v24 }
 0x3fe   : > { %v3104_v23 = vadd.f32 %v8002_v57, %v6860_v25  ;;  %v3110_v39 = vadd.f32 %v8002_v57, %v6896_v18  ;;  %v2968_v43 = vadd.f32 %v7989_v6, %v2917_v21  ;;  %v3153_v42 = vadd.f32 %v3137_v51, %v3017_v34 }
 0x3ff   : > { %v2739_v17 = vmul.f32 %v7969_v61, %v2719_v15  ;;  %v2991_v36 = vand.u32 2147483647, %v2975_v9  ;;  %v7103_v40 = vadd.f32 %v2742_v4, %v8017_v48  ;;  %v3338_v32 = vcvt.s32.f32 %v3913_v38 }
 0x400   : > { %v2990_v37 = vand.u32 2147483647, %v2974_v58  ;;  %v2984_v26 = vand.u32 2147483647, %v2968_v43  ;;  %v7107_v5 = vsel %vm3360_vm5, %v3296_v1, -1e+30  ;;  %v3289_v25 = vadd.f32 %v3273_v11, %v3153_v42  ;;  %v3181_v22 = vpop.permute.xlu1 %3180 }
 0x401   : > { %v3118_v13 = vand.u32 2147483647, %v3102_v49  ;;  %v2875_v18 = vmul.f32 %v7996_v29, %v2855_v47  ;;  %3401 = vmax.xlane.f32.xlu0 %v7107_v5  ;;  %v3002_v46 = vmul.f32 %v6529_v53, %v2982_v55  ;;  %v3929_v61 = vunpack.c.3.s8 %v6934_v35 }
 0x402   : > { %v3111_v41 = vadd.f32 %v8002_v57, %v6825_v3  ;;  %v3120_v56 = vand.u32 2147483647, %v3104_v23  ;;  %v3126_v7 = vand.u32 2147483647, %v3110_v39  ;;  %v3004_v50 = vmul.f32 %v6529_v53, %v2984_v26 }
 0x403   : > { %v2755_v60 = vadd.f32 %v2739_v17, %v6834_v44  ;;  %v3011_v2 = vmul.f32 %v6529_v53, %v2991_v36  ;;  %v3238_v19 = vadd.f32 %v8010_v59, %v3181_v22  ;;  %v3138_v10 = vmul.f32 %v6803_v0, %v3118_v13 }
 0x404   : > { %v3010_v38 = vmul.f32 %v6529_v53, %v2990_v37  ;;  %v3020_v35 = vadd.f32 %v3004_v50, %v6883_v12  ;;  %v7124_v3 = vsel %vm3353_vm6, %v3289_v25, -1e+30  ;;  %v3140_v15 = vmul.f32 %v6803_v0, %v3120_v56  ;;  %v3213_v9 = vpop.permute.xlu1 %3212 }
 0x405   : > { %v3247_v30 = vadd.f32 %v8010_v59, %v3217_v8  ;;  %v2891_v27 = vadd.f32 %v2875_v18, %v2755_v60  ;;  %v3254_v44 = vand.u32 2147483647, %v3238_v19  ;;  %3387 = vmax.xlane.f32.xlu0 %v7124_v3  ;;  %v3018_v51 = vadd.f32 %v3002_v46, %v7053_v33  ;;  %v7163_v60 = vld [vmem:[%s7408_s8 + $0x8] sm:$0xff]  }
 0x406   : > { %v2890_v12 = vadd.f32 %v6955_v63, %v6910_v16  ;;  %v3127_v31 = vand.u32 2147483647, %v3111_v41  ;;  %v3146_v58 = vmul.f32 %v6803_v0, %v3126_v7  ;;  %v7138_v14 = vadd.f32 %v3140_v15, %v3020_v35  ;;  %v8018_v41 = vld [vmem:[#allocation108_spill] sm:$0xff] }
 0x407   : > { %v3027_v34 = vadd.f32 %v3011_v2, %v2891_v27  ;;  %v3274_v1 = vmul.f32 %v7040_v54, %v3254_v44  ;;  %v3246_v11 = vadd.f32 %v8010_v59, %v3213_v9  ;;  %v3154_v33 = vadd.f32 %v3138_v10, %v3018_v51  ;;  %v3189_v2 = vpop.permute.xlu0 %3188 }
 0x408   : > { %v3026_v55 = vadd.f32 %v3010_v38, %v2890_v12  ;;  %vm3354_vm7 = vcmp.gt.f32.partialorder %v3338_v32, 0.0  ;;  %v3346_v49 = vcvt.s32.f32 %v3929_v61  ;;  %v3932_v47 = vunpack.c.0.s8 %v7133_v62  ;;  %v8019_v12 = vld [vmem:[#allocation100_spill] sm:$0xff] }
 0x409   : > { %v3263_v4 = vand.u32 2147483647, %v3247_v30  ;;  %v3262_v21 = vand.u32 2147483647, %v3246_v11  ;;  %v3290_v16 = vadd.f32 %v3274_v1, %v3154_v33  ;;  %v3147_v63 = vmul.f32 %v6803_v0, %v3127_v31  ;;  %v2817_v43 = vpop.permute.xlu1 %2816 }
 0x40a   : > { %v3162_v23 = vadd.f32 %v3146_v58, %v3026_v55  ;;  %vm3362_vm8 = vcmp.gt.f32.partialorder %v3346_v49, 0.0  ;;  %v3347_v48 = vcvt.s32.f32 %v3932_v47  ;;  %v2967_v56 = vadd.f32 %v7989_v6, %v8018_v41 }
 0x40b   : > { %v3282_v39 = vmul.f32 %v7040_v54, %v3262_v21  ;;  %v7145_v42 = vsel %vm3354_vm7, %v3290_v16, -1e+30  ;;  %v3163_v17 = vadd.f32 %v3147_v63, %v3027_v34  ;;  %v3283_v36 = vmul.f32 %v7040_v54, %v3263_v4  ;;  %v8020_v21 = vld [vmem:[#allocation62_spill] sm:$0xff] }
 0x40c   : > { %3389 = vmax.xlane.f32.xlu0 %v7145_v42  ;;  %vm3363_vm9 = vcmp.gt.f32.partialorder %v3347_v48, 0.0  ;;  %v2983_v7 = vand.u32 2147483647, %v2967_v56  ;;  %v3916_v19 = vunpack.c.0.s8 %v7163_v60  ;;  %v3240_v35 = vadd.f32 %v8010_v59, %v3189_v2 }
 0x40d   : > { %v3298_v32 = vadd.f32 %v3282_v39, %v3162_v23  ;;  %v3299_v26 = vadd.f32 %v3283_v36, %v3163_v17  ;;  %v3917_v51 = vunpack.c.1.s8 %v7163_v60  ;;  %v3114_v16 = vadd.f32 %v8002_v57, %v8020_v21 }
 0x40e   : > { %v3049_v25 = vpop.permute.xlu1 %3048  ;;  %v3003_v10 = vmul.f32 %v6529_v53, %v2983_v7  ;;  %v3339_v44 = vcvt.s32.f32 %v3916_v19  ;;  %v3256_v9 = vand.u32 2147483647, %v3240_v35  ;;  %v2841_v17 = vadd.f32 %v7979_v52, %v2817_v43 }
 0x40f   : > { %v7149_v37 = vsel %vm3362_vm8, %v3298_v32, -1e+30  ;;  %v7152_v13 = vsel %vm3363_vm9, %v3299_v26, -1e+30  ;;  %v3103_v8 = vadd.f32 %v8002_v57, %v3049_v25  ;;  %v3340_v55 = vcvt.s32.f32 %v3917_v51 }
 0x410   : > { %3405 = vmax.xlane.f32.xlu1 %v7149_v37  ;;  %v3019_v31 = vadd.f32 %v3003_v10, %v8019_v12  ;;  %vm3355_vm10 = vcmp.gt.f32.partialorder %v3339_v44, 0.0  ;;  %v3276_v4 = vmul.f32 %v7040_v54, %v3256_v9  ;;  %v3130_v41 = vand.u32 2147483647, %v3114_v16 }
 0x411   : > { %v3119_v22 = vand.u32 2147483647, %v3103_v8  ;;  %vm3356_vm11 = vcmp.gt.f32.partialorder %v3340_v55, 0.0  ;;  %v2857_v56 = vand.u32 2147483647, %v2841_v17  ;;  %v3936_v12 = vunpack.c.2.s8 %v7133_v62 }
 0x412   : > { %v3292_v39 = vadd.f32 %v3276_v4, %v7138_v14  ;;  %v3150_v10 = vmul.f32 %v6803_v0, %v3130_v41 }
 0x413   : > { %v7155_v18 = vpop.permute.xlu1 %2788  ;;  %v3139_v15 = vmul.f32 %v6803_v0, %v3119_v22  ;;  %v3349_v16 = vcvt.s32.f32 %v3936_v12 }
 0x414   : > { %3407 = vmax.xlane.f32.xlu1 %v7152_v13 }
 0x415   : > { %v3155_v34 = vadd.f32 %v3139_v15, %v3019_v31  ;;  %v2877_v15 = vmul.f32 %v7996_v29, %v2857_v56  ;;  %vm3365_vm13 = vcmp.gt.f32.partialorder %v3349_v16, 0.0 }
 0x417   : > { %v2821_v46 = vpop.permute.xlu1 %2820 }
 0x418   : > { %v2842_v27 = vadd.f32 %v7979_v52, %v2821_v46  ;;  %v3933_v46 = vunpack.c.1.s8 %v7133_v62 }
 0x41a   : > { %v2858_v33 = vand.u32 2147483647, %v2842_v27  ;;  %v3348_v19 = vcvt.s32.f32 %v3933_v46 }
 0x41c   : > { %v3085_v61 = vpop.permute.xlu1 %3084  ;;  %v2878_v36 = vmul.f32 %v7996_v29, %v2858_v33  ;;  %vm3364_vm12 = vcmp.gt.f32.partialorder %v3348_v19, 0.0  ;;  %v8022_v33 = vld [vmem:[#allocation88_spill] sm:$0xff] }
 0x41d   : > { %v3112_v49 = vadd.f32 %v8002_v57, %v3085_v61  ;;  %v7187_v61 = vsel %vm3356_vm11, %v3292_v39, -1e+30  ;;  %v2893_v55 = vadd.f32 %v2877_v15, %v8022_v33  ;;  %v8024_v15 = vld [vmem:[#allocation109_spill] sm:$0xff] }
 0x41e   : > { %v2894_v14 = vadd.f32 %v2878_v36, %v7103_v40  ;;  %v8021_v40 = vld [vmem:[#allocation14_spill] sm:$0xff] }
 0x41f   : > { %v3128_v32 = vand.u32 2147483647, %v3112_v49 }
 0x421   : > { %v3148_v7 = vmul.f32 %v6803_v0, %v3128_v32  ;;  %v3920_v32 = vunpack.c.2.s8 %v7163_v60 }
 0x422   : > { %v2953_v50 = vpop.permute.xlu1 %2952 }
 0x423   : > { %v2977_v26 = vadd.f32 %v7989_v6, %v2953_v50  ;;  %v3164_v27 = vadd.f32 %v3148_v7, %v8021_v40 }
 0x425   : > { %v2993_v2 = vand.u32 2147483647, %v2977_v26 }
 0x428   : > { %v3185_v38 = vpop.permute.xlu1 %3184 }
 0x429   : > { %v3239_v30 = vadd.f32 %v8010_v59, %v3185_v38  ;;  %v3225_v38 = vpop.permute.xlu0 %3224 }
 0x42a   : > { %v3249_v31 = vadd.f32 %v8010_v59, %v3225_v38  ;;  %v3937_v38 = vunpack.c.3.s8 %v7133_v62 }
 0x42b   : > { %v3255_v58 = vand.u32 2147483647, %v3239_v30 }
 0x42d   : > { %v3275_v1 = vmul.f32 %v7040_v54, %v3255_v58  ;;  %v2925_v11 = vpop.permute.xlu1 %2924  ;;  %v3013_v58 = vmul.f32 %v6529_v53, %v2993_v2 }
 0x42f   : > { %v3291_v47 = vadd.f32 %v3275_v1, %v3155_v34  ;;  %v2834_v34 = vadd.f32 %v7979_v52, %v7155_v18  ;;  %v3029_v39 = vadd.f32 %v3013_v58, %v2893_v55 }
 0x431   : > { %v2957_v63 = vpop.permute.xlu1 %2956  ;;  %v7178_v23 = vsel %vm3355_vm10, %v3291_v47, -1e+30  ;;  %v2970_v47 = vadd.f32 %v7989_v6, %v2925_v11  ;;  %v2850_v36 = vand.u32 2147483647, %v2834_v34 }
 0x432   : > { %v2978_v48 = vadd.f32 %v7989_v6, %v2957_v63  ;;  %3391 = vmax.xlane.f32.xlu0 %v7178_v23  ;;  %v3265_v63 = vand.u32 2147483647, %v3249_v31 }
 0x433   : > { %v2986_v26 = vand.u32 2147483647, %v2970_v47 }
 0x434   : > { %v2994_v25 = vand.u32 2147483647, %v2978_v48  ;;  %v3285_v18 = vmul.f32 %v7040_v54, %v3265_v63 }
 0x436   : > { %v3014_v43 = vmul.f32 %v6529_v53, %v2994_v25  ;;  %v3221_v8 = vpop.permute.xlu1 %3220  ;;  %3393 = vmax.xlane.f32.xlu0 %v7187_v61  ;;  %v2870_v25 = vmul.f32 %v7996_v29, %v2850_v36 }
 0x437   : > { %v3248_v22 = vadd.f32 %v8010_v59, %v3221_v8 }
 0x438   : > { %v3030_v50 = vadd.f32 %v3014_v43, %v2894_v14  ;;  %v3341_v14 = vcvt.s32.f32 %v3920_v32  ;;  %v3921_v43 = vunpack.c.3.s8 %v7163_v60 }
 0x439   : > { %v3264_v35 = vand.u32 2147483647, %v3248_v22  ;;  %v8023_v22 = vld [vmem:[#allocation60_spill] sm:$0xff] }
 0x43a   : > { %v7196_v30 = vadd.f32 %v3150_v10, %v3030_v50  ;;  %v2886_v2 = vadd.f32 %v2870_v25, %v8023_v22  ;;  %vm3357_vm14 = vcmp.gt.f32.partialorder %v3341_v14, 0.0  ;;  %v3342_v10 = vcvt.s32.f32 %v3921_v43 }
 0x43b   : > { %v3284_v44 = vmul.f32 %v7040_v54, %v3264_v35  ;;  %v3089_v51 = vpop.permute.xlu1 %3088 }
 0x43c   : > { %v3113_v9 = vadd.f32 %v8002_v57, %v3089_v51  ;;  %vm3358_vm15 = vcmp.gt.f32.partialorder %v3342_v10, 0.0 }
 0x43d   : > { %v3300_v1 = vadd.f32 %v3284_v44, %v3164_v27 }
 0x43e   : > { %v3129_v49 = vand.u32 2147483647, %v3113_v9 }
 0x43f   : > { %v3061_v4 = vpop.permute.xlu1 %3060  ;;  %v7208_v21 = vsel %vm3364_vm12, %v3300_v1, -1e+30 }
 0x440   : > { %v3149_v17 = vmul.f32 %v6803_v0, %v3129_v49  ;;  %3409 = vmax.xlane.f32.xlu1 %v7208_v21  ;;  %v3106_v48 = vadd.f32 %v8002_v57, %v3061_v4  ;;  %v3006_v57 = vmul.f32 %v6529_v53, %v2986_v26 }
 0x442   : > { %v3165_v52 = vadd.f32 %v3149_v17, %v3029_v39  ;;  %v3122_v46 = vand.u32 2147483647, %v3106_v48  ;;  %v3022_v35 = vadd.f32 %v3006_v57, %v2886_v2 }
 0x444   : > { %v3193_v6 = vpop.permute.xlu1 %3192  ;;  %v3301_v11 = vadd.f32 %v3285_v18, %v3165_v52  ;;  %v3142_v50 = vmul.f32 %v6803_v0, %v3122_v46  ;;  %v3350_v0 = vcvt.s32.f32 %v3937_v38 }
 0x445   : > { %v3241_v41 = vadd.f32 %v8010_v59, %v3193_v6 }
 0x446   : > { %v7217_v56 = vsel %vm3365_vm13, %v3301_v11, -1e+30  ;;  %v3158_v27 = vadd.f32 %v3142_v50, %v3022_v35  ;;  %vm3366_vm0 = vcmp.gt.f32.partialorder %v3350_v0, 0.0 }
 0x447   : > { %v3257_v8 = vand.u32 2147483647, %v3241_v41  ;;  %3411 = vmax.xlane.f32.xlu1 %v7217_v56 }
 0x448   : > { %v3197_v7 = vpop.permute.xlu1 %3196 }
 0x449   : > { %v3277_v29 = vmul.f32 %v7040_v54, %v3257_v8  ;;  %v3242_v19 = vadd.f32 %v8010_v59, %v3197_v7 }
 0x44b   : > { %v3258_v60 = vand.u32 2147483647, %v3242_v19  ;;  %v3293_v53 = vadd.f32 %v3277_v29, %v8024_v15 }
 0x44c   : > { %v3229_v40 = vpop.permute.xlu1 %3228 }
 0x44d   : > { %v3278_v44 = vmul.f32 %v7040_v54, %v3258_v60  ;;  %v3250_v51 = vadd.f32 %v8010_v59, %v3229_v40  ;;  %v7230_v12 = vsel %vm3357_vm14, %v3293_v53, -1e+30 }
 0x44e   : > { %3395 = vmax.xlane.f32.xlu0 %v7230_v12 }
 0x44f   : > { %v3266_v31 = vand.u32 2147483647, %v3250_v51  ;;  %v3294_v58 = vadd.f32 %v3278_v44, %v3158_v27 }
 0x451   : > { %v3286_v62 = vmul.f32 %v7040_v54, %v3266_v31  ;;  %v7234_v9 = vsel %vm3358_vm15, %v3294_v58, -1e+30 }
 0x452   : > { %3397 = vmax.xlane.f32.xlu0 %v7234_v9 }
 0x453   : > { %v3302_v34 = vadd.f32 %v3286_v62, %v7196_v30 }
 0x455   : > { %v7238_v1 = vsel %vm3366_vm0, %v3302_v34, -1e+30 }
 0x456   : > { %3413 = vmax.xlane.f32.xlu1 %v7238_v1 }
 0x481   : > { %v3384_v33 = vpop.xlane.xlu0 %3383 }
 0x482   : > { %v3400_v59 = vpop.xlane.xlu1 %3399  ;;  %v3415_v49 = vsub.f32 %v7060_v28, %v3384_v33 }
 0x483   : > { %v3423_v55 = vsub.f32 %v7064_v20, %v3400_v59 }
 0x484   : > { %v3431_v4 = vmul.f32 1.442695, %v3415_v49 }
 0x485   : > { %v3447_v47 = vmul.f32 1.442695, %v3423_v55 }
 0x486   : > { %v3386_v54 = vpop.xlane.xlu0 %3385  ;;  %v3404_v16 = vpop.xlane.xlu1 %3403 }
 0x487   : > { %4420 = vpow2.f32 %v3447_v47  ;;  %v3416_v63 = vsub.f32 %v7084_v45, %v3386_v54  ;;  %v3425_v30 = vsub.f32 %v7088_v24, %v3404_v16 }
 0x488   : > { %4422 = vpow2.f32 %v3431_v4 }
 0x489   : > { %v3433_v39 = vmul.f32 1.442695, %v3416_v63  ;;  %v3451_v52 = vmul.f32 1.442695, %v3425_v30 }
 0x48a   : > { %v3402_v17 = vpop.xlane.xlu0 %3401 }
 0x48b   : > { %v3424_v36 = vsub.f32 %v7107_v5, %v3402_v17  ;;  %4424 = vpow2.f32 %v3433_v39 }
 0x48d   : > { %v3449_v48 = vmul.f32 1.442695, %v3424_v36 }
 0x48e   : > { %v3388_v20 = vpop.xlane.xlu0 %3387 }
 0x48f   : > { %4426 = vpow2.f32 %v3449_v48  ;;  %v3417_v28 = vsub.f32 %v7124_v3, %v3388_v20 }
 0x490   : > { %4428 = vpow2.f32 %v3451_v52 }
 0x491   : > { %v3435_v18 = vmul.f32 1.442695, %v3417_v28 }
 0x493   : > { %4430 = vpow2.f32 %v3435_v18 }
 0x494   : > { %v7247_v32 = vpop.eup %4420 }
 0x495   : > { %v7249_v45 = vpop.eup %4422  ;;  %3479 = vadd.xlane.f32.xlu1 %v7247_v32  ;;  %v3390_v24 = vpop.xlane.xlu0 %3389 }
 0x496   : > { %3463 = vadd.xlane.f32.xlu0 %v7249_v45  ;;  %v3418_v5 = vsub.f32 %v7145_v42, %v3390_v24 }
 0x498   : > { %v3437_v26 = vmul.f32 1.442695, %v3418_v5  ;;  %v7254_v6 = vpop.eup %4424 }
 0x499   : > { %v3406_v11 = vpop.xlane.xlu1 %3405 }
 0x49a   : > { %4432 = vpow2.f32 %v3437_v26  ;;  %v3426_v3 = vsub.f32 %v7149_v37, %v3406_v11  ;;  %3465 = vadd.xlane.f32.xlu0 %v7254_v6 }
 0x49c   : > { %v7258_v25 = vpop.eup %4426  ;;  %v3453_v46 = vmul.f32 1.442695, %v3426_v3 }
 0x49d   : > { %v3408_v41 = vpop.xlane.xlu1 %3407  ;;  %3481 = vadd.xlane.f32.xlu1 %v7258_v25  ;;  %v7262_v43 = vpop.eup %4428 }
 0x49e   : > { %4434 = vpow2.f32 %v3453_v46  ;;  %v3427_v14 = vsub.f32 %v7152_v13, %v3408_v41 }
 0x4a0   : > { %v7264_v42 = vpop.eup %4430  ;;  %v3455_v57 = vmul.f32 1.442695, %v3427_v14 }
 0x4a1   : > { %3483 = vadd.xlane.f32.xlu1 %v7262_v43  ;;  %3467 = vadd.xlane.f32.xlu0 %v7264_v42 }
 0x4a2   : > { %4436 = vpow2.f32 %v3455_v57 }
 0x4a7   : > { %v7268_v37 = vpop.eup %4432 }
 0x4a8   : > { %3469 = vadd.xlane.f32.xlu0 %v7268_v37 }
 0x4ab   : > { %v7271_v8 = vpop.eup %4434 }
 0x4ac   : > { %3485 = vadd.xlane.f32.xlu1 %v7271_v8 }
 0x4af   : > { %v7274_v7 = vpop.eup %4436 }
 0x4b0   : > { %3487 = vadd.xlane.f32.xlu1 %v7274_v7 }
 0x4bb   : > { %v3392_v13 = vpop.xlane.xlu0 %3391 }
 0x4bc   : > { %v3419_v22 = vsub.f32 %v7178_v23, %v3392_v13 }
 0x4be   : > { %v3439_v2 = vmul.f32 1.442695, %v3419_v22 }
 0x4bf   : > { %v3394_v50 = vpop.xlane.xlu0 %3393 }
 0x4c0   : > { %4438 = vpow2.f32 %v3439_v2  ;;  %v3420_v29 = vsub.f32 %v7187_v61, %v3394_v50 }
 0x4c2   : > { %v3441_v19 = vmul.f32 1.442695, %v3420_v29 }
 0x4c4   : > { %4440 = vpow2.f32 %v3441_v19 }
 0x4c9   : > { %v3410_v10 = vpop.xlane.xlu1 %3409 }
 0x4ca   : > { %v3428_v38 = vsub.f32 %v7208_v21, %v3410_v10 }
 0x4cc   : > { %v3457_v35 = vmul.f32 1.442695, %v3428_v38 }
 0x4cd   : > { %v7280_v60 = vpop.eup %4438 }
 0x4ce   : > { %4442 = vpow2.f32 %v3457_v35  ;;  %3471 = vadd.xlane.f32.xlu0 %v7280_v60 }
 0x4d0   : > { %v3412_v15 = vpop.xlane.xlu1 %3411 }
 0x4d1   : > { %v7283_v53 = vpop.eup %4440  ;;  %v3429_v23 = vsub.f32 %v7217_v56, %v3412_v15 }
 0x4d2   : > { %3473 = vadd.xlane.f32.xlu0 %v7283_v53 }
 0x4d3   : > { %v3459_v40 = vmul.f32 1.442695, %v3429_v23  ;;  %v7325_v23 = vld [vmem:[%s451_s27] ss:$0 sm:$0xff] }
 0x4d5   : > { %4444 = vpow2.f32 %v3459_v40 }
 0x4d7   : > { %v3396_v61 = vpop.xlane.xlu0 %3395 }
 0x4d8   : > { %v3421_v27 = vsub.f32 %v7230_v12, %v3396_v61 }
 0x4da   : > { %v3443_v44 = vmul.f32 1.442695, %v3421_v27 }
 0x4db   : > { %v7288_v21 = vpop.eup %4442  ;;  %v3398_v51 = vpop.xlane.xlu0 %3397 }
 0x4dc   : > { %4446 = vpow2.f32 %v3443_v44  ;;  %v3422_v0 = vsub.f32 %v7234_v9, %v3398_v51  ;;  %3489 = vadd.xlane.f32.xlu1 %v7288_v21 }
 0x4de   : > { %v3445_v31 = vmul.f32 1.442695, %v3422_v0 }
 0x4df   : > { %v3414_v58 = vpop.xlane.xlu1 %3413 }
 0x4e0   : > { %4448 = vpow2.f32 %v3445_v31  ;;  %v3430_v56 = vsub.f32 %v7238_v1, %v3414_v58 }
 0x4e2   : > { %v7293_v62 = vpop.eup %4444  ;;  %v3461_v34 = vmul.f32 1.442695, %v3430_v56 }
 0x4e3   : > { %3491 = vadd.xlane.f32.xlu1 %v7293_v62 }
 0x4e4   : > { %4450 = vpow2.f32 %v3461_v34 }
 0x4e9   : > { %v7296_v12 = vpop.eup %4446 }
 0x4ea   : > { %3475 = vadd.xlane.f32.xlu0 %v7296_v12 }
 0x4ed   : > { %v7299_v59 = vpop.eup %4448 }
 0x4ee   : > { %3477 = vadd.xlane.f32.xlu0 %v7299_v59 }
 0x4f1   : > { %v7302_v9 = vpop.eup %4450 }
 0x4f2   : > { %3493 = vadd.xlane.f32.xlu1 %v7302_v9 }
 0x51e   : > { %v3480_v33 = vpop.xlane.xlu1 %3479 }
 0x51f   : > { %4452 = vrcp.f32 %v3480_v33  ;;  %v3464_v1 = vpop.xlane.xlu0 %3463 }
 0x520   : > { %4454 = vrcp.f32 %v3464_v1 }
 0x523   : > { %v3466_v55 = vpop.xlane.xlu0 %3465 }
 0x524   : > { %4456 = vrcp.f32 %v3466_v55 }
 0x526   : > { %v3482_v49 = vpop.xlane.xlu1 %3481 }
 0x527   : > { %4458 = vrcp.f32 %v3482_v49 }
 0x52a   : > { %v3484_v47 = vpop.xlane.xlu1 %3483  ;;  %v3468_v4 = vpop.xlane.xlu0 %3467 }
 0x52b   : > { %4460 = vrcp.f32 %v3484_v47 }
 0x52c   : > { %v4453_v54 = vpop.eup %4452  ;;  %4462 = vrcp.f32 %v3468_v4 }
 0x52d   : > { %v4455_v16 = vpop.eup %4454  ;;  %v3519_v63 = vmul.f32 %v4453_v54, %v7247_v32 }
 0x52e   : > { %v3511_v39 = vmul.f32 %v4455_v16, %v7249_v45 }
 0x52f   : > { %4190 = vmatprep.mubr.f32.mxu1 %v3519_v63 }
 0x530   : > { %4178 = vmatprep.mubr.f32.mxu0 %v3511_v39 }
 0x531   : > { %v4457_v30 = vpop.eup %4456  ;;  %v3470_v17 = vpop.xlane.xlu0 %3469 }
 0x532   : > { %4464 = vrcp.f32 %v3470_v17  ;;  %v3512_v36 = vmul.f32 %v4457_v30, %v7254_v6 }
 0x534   : > { %v4459_v48 = vpop.eup %4458  ;;  %4179 = vmatmul.mubr.f32.vlgmr.msra.gmra.mxu0 %v3512_v36 }
 0x535   : > { %v3486_v52 = vpop.xlane.xlu1 %3485  ;;  %v3520_v20 = vmul.f32 %v4459_v48, %v7258_v25 }
 0x536   : > { %4466 = vrcp.f32 %v3486_v52 }
 0x537   : > { %4191 = vmatmul.mubr.f32.vlgmr.msra.gmra.mxu1 %v3520_v20 }
 0x538   : > { %v4461_v28 = vpop.eup %4460 }
 0x539   : > { %v4463_v18 = vpop.eup %4462  ;;  %v3488_v24 = vpop.xlane.xlu1 %3487  ;;  %v3521_v32 = vmul.f32 %v4461_v28, %v7262_v43 }
 0x53a   : > { %4468 = vrcp.f32 %v3488_v24  ;;  %v3513_v45 = vmul.f32 %v4463_v18, %v7264_v42 }
 0x53b   : > { %4193 = vmatprep.mubr.f32.mxu1 %v3521_v32 }
 0x53c   : > { %4181 = vmatprep.mubr.f32.mxu0 %v3513_v45 }
 0x53f   : > { %v4465_v5 = vpop.eup %4464 }
 0x540   : > { %v3514_v26 = vmul.f32 %v4465_v5, %v7268_v37 }
 0x542   : > { %4182 = vmatmul.mubr.f32.gmra.mxu0 %v3514_v26 }
 0x543   : > { %v4467_v6 = vpop.eup %4466 }
 0x544   : > { %v3522_v11 = vmul.f32 %v4467_v6, %v7271_v8 }
 0x546   : > { %4194 = vmatmul.mubr.f32.gmra.mxu1 %v3522_v11 }
 0x547   : > { %v4469_v3 = vpop.eup %4468 }
 0x548   : > { %v3523_v25 = vmul.f32 %v4469_v3, %v7274_v7 }
 0x54a   : > { %4196 = vmatprep.mubr.f32.mxu1 %v3523_v25 }
 0x557   : > { %v3472_v46 = vpop.xlane.xlu0 %3471 }
 0x558   : > { %4470 = vrcp.f32 %v3472_v46 }
 0x55b   : > { %v3474_v41 = vpop.xlane.xlu0 %3473 }
 0x55c   : > { %4472 = vrcp.f32 %v3474_v41 }
 0x565   : > { %v4471_v14 = vpop.eup %4470  ;;  %v3490_v43 = vpop.xlane.xlu1 %3489 }
 0x566   : > { %4474 = vrcp.f32 %v3490_v43  ;;  %v3515_v42 = vmul.f32 %v4471_v14, %v7280_v60 }
 0x568   : > { %4184 = vmatprep.mubr.f32.mxu0 %v3515_v42 }
 0x569   : > { %v4473_v57 = vpop.eup %4472 }
 0x56a   : > { %v3516_v37 = vmul.f32 %v4473_v57, %v7283_v53 }
 0x56c   : > { %v3492_v13 = vpop.xlane.xlu1 %3491  ;;  %4185 = vmatmul.mubr.f32.gmra.mxu0 %v3516_v37 }
 0x56d   : > { %4476 = vrcp.f32 %v3492_v13 }
 0x573   : > { %v4475_v8 = vpop.eup %4474  ;;  %v3476_v22 = vpop.xlane.xlu0 %3475 }
 0x574   : > { %4478 = vrcp.f32 %v3476_v22  ;;  %v3524_v7 = vmul.f32 %v4475_v8, %v7288_v21 }
 0x576   : > { %4197 = vmatmul.mubr.f32.gmra.mxu1 %v3524_v7 }
 0x577   : > { %v3478_v2 = vpop.xlane.xlu0 %3477 }
 0x578   : > { %4480 = vrcp.f32 %v3478_v2 }
 0x57a   : > { %v4477_v50 = vpop.eup %4476 }
 0x57b   : > { %v3494_v29 = vpop.xlane.xlu1 %3493  ;;  %v3525_v19 = vmul.f32 %v4477_v50, %v7293_v62 }
 0x57c   : > { %4482 = vrcp.f32 %v3494_v29 }
 0x57d   : > { %4199 = vmatprep.mubr.f32.mxu1 %v3525_v19 }
 0x581   : > { %v4479_v10 = vpop.eup %4478 }
 0x582   : > { %v3517_v38 = vmul.f32 %v4479_v10, %v7296_v12 }
 0x584   : > { %4187 = vmatprep.mubr.f32.mxu0 %v3517_v38 }
 0x585   : > { %v4481_v35 = vpop.eup %4480 }
 0x586   : > { %v3518_v60 = vmul.f32 %v4481_v35, %v7299_v59 }
 0x588   : > { %4188 = vmatmul.mubr.f32.gmra.mxu0 %v3518_v60 }
 0x589   : > { %v4483_v15 = vpop.eup %4482 }
 0x58a   : > { %v3526_v53 = vmul.f32 %v4483_v15, %v7302_v9 }
 0x58c   : > { %4200 = vmatmul.mubr.f32.gmra.mxu1 %v3526_v53 }
 0x5f4   : > { %v4180_v40 = vpop.f32.mrf.mxu0 }
 0x5f5   : > { %v3622_v61 = vadd.f32 %v4180_v40, %v7325_v23 }
 0x5f6   : > { %v3616_v27 = vpop.f32.mrf.mxu0 }
 0x5f7   : > { %v3696_v44 = vmax.f32 %v3622_v61, 0.0  ;;  %v3617_v21 = vadd.f32 %v7325_v23, %v3616_v27  ;;  %v4192_v51 = vpop.f32.mrf.mxu1 }
 0x5f8   : > { %v3662_v0 = vadd.f32 %v4192_v51, %v7325_v23 }
 0x5f9   : > { %3713 = vst [vmem:[#allocation5] sm:$0xff] %v3696_v44  ;;  %3729 = vst [vmem:[%s7409_s9 + $0x8] sm:$0xff] %v3696_v44  ;;  %v3695_v31 = vmax.f32 %v3617_v21, 0.0  ;;  %v3656_v58 = vpop.f32.mrf.mxu1 }
 0x5fa   : > { %v3704_v56 = vmax.f32 %v3662_v0, 0.0  ;;  %v3657_v62 = vadd.f32 %v7325_v23, %v3656_v58 }
 0x5fb   : > { %3712 = vst [vmem:[#allocation5 + $0x30] sm:$0xff] %v3695_v31  ;;  %3728 = vst [vmem:[%s7409_s9] sm:$0xff] %v3695_v31 }
 0x5fc   : > { %3721 = vst [vmem:[#allocation5 + $0x20] sm:$0xff] %v3704_v56  ;;  %3737 = vst [vmem:[%s7409_s9 + $0x48] sm:$0xff] %v3704_v56  ;;  %v3703_v34 = vmax.f32 %v3657_v62, 0.0 }
 0x5fe   : > { %3720 = vst [vmem:[#allocation5 + $0x40] sm:$0xff] %v3703_v34  ;;  %3736 = vst [vmem:[%s7409_s9 + $0x40] sm:$0xff] %v3703_v34 }
 0x602   : > { %v4183_v12 = vpop.f32.mrf.mxu0 }
 0x603   : > { %v3632_v59 = vadd.f32 %v4183_v12, %v7325_v23 }
 0x604   : > { %v3626_v9 = vpop.f32.mrf.mxu0 }
 0x605   : > { %v3698_v33 = vmax.f32 %v3632_v59, 0.0  ;;  %v3627_v1 = vadd.f32 %v7325_v23, %v3626_v9 }
 0x606   : > { %v4195_v55 = vpop.f32.mrf.mxu1 }
 0x607   : > { %3715 = vst [vmem:[#allocation5 + $0x18] sm:$0xff] %v3698_v33  ;;  %3731 = vst [vmem:[%s7409_s9 + $0x18] sm:$0xff] %v3698_v33  ;;  %v3697_v49 = vmax.f32 %v3627_v1, 0.0  ;;  %v3672_v47 = vadd.f32 %v4195_v55, %v7325_v23 }
 0x608   : > { %v3666_v4 = vpop.f32.mrf.mxu1 }
 0x609   : > { %3714 = vst [vmem:[#allocation5 + $0x58] sm:$0xff] %v3697_v49  ;;  %3730 = vst [vmem:[%s7409_s9 + $0x10] sm:$0xff] %v3697_v49  ;;  %v3706_v54 = vmax.f32 %v3672_v47, 0.0  ;;  %v3667_v16 = vadd.f32 %v7325_v23, %v3666_v4 }
 0x60b   : > { %3723 = vst [vmem:[#allocation5 + $0x38] sm:$0xff] %v3706_v54  ;;  %3739 = vst [vmem:[%s7409_s9 + $0x58] sm:$0xff] %v3706_v54  ;;  %v3705_v63 = vmax.f32 %v3667_v16, 0.0 }
 0x60d   : > { %3722 = vst [vmem:[#allocation5 + $0x10] sm:$0xff] %v3705_v63  ;;  %3738 = vst [vmem:[%s7409_s9 + $0x50] sm:$0xff] %v3705_v63 }
 0x62c   : > { %v4186_v39 = vpop.f32.mrf.mxu0 }
 0x62d   : > { %v3642_v30 = vadd.f32 %v4186_v39, %v7325_v23 }
 0x62e   : > { %v3636_v17 = vpop.f32.mrf.mxu0 }
 0x62f   : > { %v3700_v36 = vmax.f32 %v3642_v30, 0.0  ;;  %v3637_v48 = vadd.f32 %v7325_v23, %v3636_v17 }
 0x631   : > { %3717 = vst [vmem:[#allocation5 + $0x68] sm:$0xff] %v3700_v36  ;;  %3733 = vst [vmem:[%s7409_s9 + $0x28] sm:$0xff] %v3700_v36  ;;  %v3699_v52 = vmax.f32 %v3637_v48, 0.0 }
 0x633   : > { %3716 = vst [vmem:[#allocation5 + $0x50] sm:$0xff] %v3699_v52  ;;  %3732 = vst [vmem:[%s7409_s9 + $0x20] sm:$0xff] %v3699_v52 }
 0x636   : > { %v4198_v20 = vpop.f32.mrf.mxu1 }
 0x637   : > { %v3682_v28 = vadd.f32 %v4198_v20, %v7325_v23 }
 0x638   : > { %v3676_v18 = vpop.f32.mrf.mxu1 }
 0x639   : > { %v3708_v24 = vmax.f32 %v3682_v28, 0.0  ;;  %v3677_v32 = vadd.f32 %v7325_v23, %v3676_v18 }
 0x63b   : > { %3725 = vst [vmem:[#allocation5 + $0x70] sm:$0xff] %v3708_v24  ;;  %3741 = vst [vmem:[%s7409_s9 + $0x68] sm:$0xff] %v3708_v24  ;;  %v3707_v45 = vmax.f32 %v3677_v32, 0.0 }
 0x63d   : > { %3724 = vst [vmem:[#allocation5 + $0x60] sm:$0xff] %v3707_v45  ;;  %3740 = vst [vmem:[%s7409_s9 + $0x60] sm:$0xff] %v3707_v45 }
 0x648   : > { %v4189_v5 = vpop.f32.mrf.mxu0 }
 0x649   : > { %v3652_v26 = vadd.f32 %v4189_v5, %v7325_v23 }
 0x64a   : > { %v3646_v6 = vpop.f32.mrf.mxu0 }
 0x64b   : > { %v3702_v11 = vmax.f32 %v3652_v26, 0.0  ;;  %v3647_v3 = vadd.f32 %v7325_v23, %v3646_v6 }
 0x64c   : > { %v4201_v25 = vpop.f32.mrf.mxu1 }
 0x64d   : > { %3719 = vst [vmem:[#allocation5 + $0x48] sm:$0xff] %v3702_v11  ;;  %3735 = vst [vmem:[%s7409_s9 + $0x38] sm:$0xff] %v3702_v11  ;;  %v3701_v46 = vmax.f32 %v3647_v3, 0.0  ;;  %v3692_v41 = vadd.f32 %v4201_v25, %v7325_v23 }
 0x64e   : > { %v3686_v14 = vpop.f32.mrf.mxu1 }
 0x64f   : > { %3718 = vst [vmem:[#allocation5 + $0x8] sm:$0xff] %v3701_v46  ;;  %3734 = vst [vmem:[%s7409_s9 + $0x30] sm:$0xff] %v3701_v46  ;;  %v3710_v43 = vmax.f32 %v3692_v41, 0.0  ;;  %v3687_v42 = vadd.f32 %v7325_v23, %v3686_v14 }
 0x651   : > { %3727 = vst [vmem:[#allocation5 + $0x28] sm:$0xff] %v3710_v43  ;;  %3743 = vst [vmem:[%s7409_s9 + $0x78] sm:$0xff] %v3710_v43  ;;  %v3709_v57 = vmax.f32 %v3687_v42, 0.0 }
 0x653   : > { %3726 = vst [vmem:[#allocation5 + $0x78] sm:$0xff] %v3709_v57  ;;  %3742 = vst [vmem:[%s7409_s9 + $0x70] sm:$0xff] %v3709_v57 }
 0x654 PF: > { %s19_s11 = sadd.s32 1, %s4506_s11   ;;  %s8025_s30 = smov %s4502_s10 }
 0x655   : > { %p16_p6 = scmp.ge.s32.totalorder %s19_s11, 4   ;;  %s8026_s10 = smov %s8028_s12 }
 0x657   :  { %18 = sbr.rel (!%p16_p6) target bundleno = 2 (0x2), region = 113 }

</bundles_post_ra>
